<compile_context>
chip_gen: v7x
topology: tpu7x:2x2x1
jax: 0.10.0
libtpu: 0.0.40
codegen_flags: <defaults>
</compile_context>

<pallas_src>
import functools

import jax
import jax.numpy as jnp
from jax.experimental import pallas as pl
from jax.experimental.pallas import tpu as pltpu

T_PAST = 3
DENSE_DIM = 32
MID_CHANS = 64
N_NEGS = 8                       # hyp.motioncost_num_negs
SMOOTH_COEFF = 1.0               # hyp.motioncost_smooth_coeff
MAXMARGIN_COEFF = 1.0            # hyp.motioncost_maxmargin_coeff
# TODO(synk): vox_util bounds are not given; fixed synthetic scene bounds used.
XMIN, XMAX = -8.0, 8.0
YMIN, YMAX = -4.0, 4.0
ZMIN, ZMAX = 0.0, 16.0


def _round_up(v, m):
    return ((v + m - 1) // m) * m


# ----------------------------- Pallas kernels ------------------------------

def _matmul_bias_relu_kernel(a_ref, b_ref, bias_ref, o_ref):
    acc = jnp.dot(a_ref[...], b_ref[...], preferred_element_type=jnp.float32)
    acc = acc + bias_ref[...]
    o_ref[...] = jnp.maximum(acc, 0.0)


def _matmul_bias_kernel(a_ref, b_ref, bias_ref, o_ref):
    acc = jnp.dot(a_ref[...], b_ref[...], preferred_element_type=jnp.float32)
    o_ref[...] = acc + bias_ref[...]


def pallas_matmul_bias_act(a, w, bias, relu=True):
    """act(a @ w + bias): a (M,K) f32, w (K,N) f32, bias (N,) f32 -> (M,N) f32.

    K, N are zero-padded to multiples of 128 (lane-dense, unmasked vld/vst),
    M is rounded to a multiple of 16 (bf16 sublane packing) and tiled so the
    grid has 1 or an even number of steps. Operands go to the MXU in bf16 with
    f32 accumulation; bias add and ReLU are fused (free VPU slots).
    """
    M, K = a.shape
    K2, N = w.shape
    assert K == K2
    Kp = _round_up(K, 128)
    Np = _round_up(N, 128)
    Mp16 = _round_up(M, 16)
    if Mp16 <= 256:
        tm = Mp16                                   # single block, no M padding waste
    else:
        tm = min(512, _round_up((Mp16 + 1) // 2, 16))   # even grid for v7x 2 TCs
    Mp = _round_up(Mp16, tm)

    a_p = jnp.zeros((Mp, Kp), jnp.bfloat16).at[:M, :K].set(a.astype(jnp.bfloat16))
    w_p = jnp.zeros((Kp, Np), jnp.bfloat16).at[:K, :N].set(w.astype(jnp.bfloat16))
    b_p = jnp.zeros((1, Np), jnp.float32).at[0, :N].set(bias.astype(jnp.float32))

    kernel = _matmul_bias_relu_kernel if relu else _matmul_bias_kernel
    out = pl.pallas_call(
        kernel,
        out_shape=jax.ShapeDtypeStruct((Mp, Np), jnp.float32),
        grid=(Mp // tm,),
        in_specs=[pl.BlockSpec((tm, Kp), lambda i: (i, 0)),
                  pl.BlockSpec((Kp, Np), lambda i: (0, 0)),
                  pl.BlockSpec((1, Np), lambda i: (0, 0))],
        out_specs=pl.BlockSpec((tm, Np), lambda i: (i, 0)),
        compiler_params=pltpu.CompilerParams(
            dimension_semantics=("parallel",)),
    )(a_p, w_p, b_p)
    return out[:M, :N]


def _cost_tail_kernel(cm_ref, uz_ref, uxt_ref, wz_ref, wx_ref,
                      cost_ref, sp_ref, st_ref, samp_ref, *, B, T):
    """Fused: x4 bilinear upsample + clamp + smoothness loss + bilinear
    trajectory-cost sampling, batched over all B*T_futu cost maps."""
    cm = cm_ref[...]                                  # (BT, Hin, Win)
    uz = uz_ref[...]                                  # (Z, Hin)
    uxt = uxt_ref[...]                                # (Win, X)
    BT, Hin, Win = cm.shape
    Zd = uz.shape[0]
    Xd = uxt.shape[1]

    # bilinear upsample (align_corners=False) as two batched matmuls, + clamp
    uxt_b = jnp.broadcast_to(uxt[None], (BT, Win, Xd))
    t1 = jnp.einsum('bhw,bwx->bhx', cm, uxt_b,
                    preferred_element_type=jnp.float32)       # (BT, Hin, X)
    uz_b = jnp.broadcast_to(uz[None], (BT, Zd, Hin))
    cmap = jnp.einsum('bzh,bhx->bzx', uz_b, t1,
                      preferred_element_type=jnp.float32)     # (BT, Z, X)
    cmap = jnp.clip(cmap, -1000.0, 1000.0)
    cost_ref[...] = cmap

    # smoothness loss (gradient2D zero-pads, so the mean divides by full Z*X)
    dz = jnp.abs(cmap[:, 1:, :] - cmap[:, :-1, :])
    dx = jnp.abs(cmap[:, :, 1:] - cmap[:, :, :-1])
    c4 = cmap.reshape(B, T, Zd, Xd)
    dt = jnp.abs(c4[:, 1:] - c4[:, :-1])
    sp = (jnp.sum(dz) + jnp.sum(dx)) / float(BT * Zd * Xd)
    st = jnp.sum(dt) / float(B * (T - 1) * Zd * Xd)
    sp_ref[...] = jnp.broadcast_to(sp, (1, 1))
    st_ref[...] = jnp.broadcast_to(st, (1, 1))

    # bilinear sample: samp[b,p] = sum_z sum_x Wz[b,p,z] * cmap[b,z,x] * Wx[b,p,x]
    wz = wz_ref[...]                                  # (BT, P, Z)
    wx = wx_ref[...]                                  # (BT, P, X)
    tmp = jnp.einsum('bpz,bzx->bpx', wz, cmap,
                     preferred_element_type=jnp.float32)
    samp_ref[...] = jnp.sum(tmp * wx, axis=2)


def pallas_cost_tail(cost_small_bt, Uz, UxT, Wz, Wx, B, T):
    BT, Hin, Win = cost_small_bt.shape
    Zd = Uz.shape[0]
    Xd = UxT.shape[1]
    P = Wz.shape[1]
    kernel = functools.partial(_cost_tail_kernel, B=B, T=T)
    cost_maps, sp, st, samp = pl.pallas_call(
        kernel,
        out_shape=(jax.ShapeDtypeStruct((BT, Zd, Xd), jnp.float32),
                   jax.ShapeDtypeStruct((1, 1), jnp.float32),
                   jax.ShapeDtypeStruct((1, 1), jnp.float32),
                   jax.ShapeDtypeStruct((BT, P), jnp.float32)),
    )(cost_small_bt, Uz, UxT, Wz, Wx)
    return cost_maps, sp[0, 0], st[0, 0], samp


# ------------------------------- Wrappers -----------------------------------

def conv2d(x, w_hwio, bias, stride=1, padding=1, relu=True):
    """NHWC conv via NHWC im2col + fused Pallas matmul(+bias+ReLU)."""
    Bn, H, W, Cin = x.shape
    kh, kw, Cin2, Cout = w_hwio.shape
    assert Cin == Cin2
    xp = jnp.pad(x, ((0, 0), (padding, padding), (padding, padding), (0, 0)))
    Ho = (H + 2 * padding - kh) // stride + 1
    Wo = (W + 2 * padding - kw) // stride + 1
    taps = [xp[:, i:i + stride * Ho:stride, j:j + stride * Wo:stride, :]
            for i in range(kh) for j in range(kw)]
    patches = jnp.concatenate(taps, axis=-1)          # (Bn, Ho, Wo, kh*kw*Cin)
    a = patches.reshape(Bn * Ho * Wo, kh * kw * Cin)
    wmat = w_hwio.reshape(kh * kw * Cin, Cout)
    out = pallas_matmul_bias_act(a, wmat, bias, relu=relu)
    return out.reshape(Bn, Ho, Wo, Cout)


def _upsample_matrix(n_in, scale):
    """PyTorch bilinear (align_corners=False) as a (n_out, n_in) linear map."""
    n_out = n_in * scale
    o = jnp.arange(n_out, dtype=jnp.float32)
    src = jnp.maximum((o + 0.5) / scale - 0.5, 0.0)
    i0 = jnp.minimum(jnp.floor(src).astype(jnp.int32), n_in - 1)
    i1 = jnp.minimum(i0 + 1, n_in - 1)
    w1 = src - i0.astype(jnp.float32)
    w0 = 1.0 - w1
    eye = jnp.eye(n_in, dtype=jnp.float32)
    return w0[:, None] * eye[i0] + w1[:, None] * eye[i1]


def _bilinear_weights(coords, dim):
    """coords: (BT, P) pixel coords -> (BT, P, dim) separable bilinear rows
    (fractional weights, clamped gather indices, as in utils_samp.bilinear_sample2D)."""
    c0f = jnp.floor(coords)
    w1 = coords - c0f
    w0 = 1.0 - w1
    i0 = jnp.clip(c0f.astype(jnp.int32), 0, dim - 1)
    i1 = jnp.clip(c0f.astype(jnp.int32) + 1, 0, dim - 1)
    eye = jnp.eye(dim, dtype=jnp.float32)
    return w0[..., None] * eye[i0] + w1[..., None] * eye[i1]


def meshgrid2d(Bn, H, W):
    """utils_basic.meshgrid2D(..., stack=True, norm=True) in NHWC layout."""
    gy = jnp.broadcast_to(jnp.linspace(-1.0, 1.0, H)[:, None], (H, W))
    gx = jnp.broadcast_to(jnp.linspace(-1.0, 1.0, W)[None, :], (H, W))
    grid = jnp.stack([gx, gy], axis=-1)               # (H, W, 2)
    return jnp.broadcast_to(grid[None], (Bn, H, W, 2)).astype(jnp.float32)


def ref2mem(xyz, Z, Y, X):
    # TODO(synk): utils_vox.Ref2Mem depends on vox_util; simple affine stand-in.
    x, y, z = xyz[..., 0], xyz[..., 1], xyz[..., 2]
    xm = (x - XMIN) / (XMAX - XMIN) * X - 0.5
    ym = (y - YMIN) / (YMAX - YMIN) * Y - 0.5
    zm = (z - ZMIN) / (ZMAX - ZMIN) * Z - 0.5
    return jnp.stack([xm, ym, zm], axis=-1)


# ------------------------- Module building blocks ---------------------------

def densifier(feats, masks, halfgrids, p):
    # TODO(synk): exact sparse_invar_encoder2D.CustomCNN arch unavailable;
    # sparse-invariant 3x3/stride-2 conv + 3x3 conv to dense_dim (NHWC).
    num = conv2d(feats * masks, p['d_w1'],
                 jnp.zeros((DENSE_DIM,), jnp.float32),
                 stride=2, padding=1, relu=False)
    # 3x3/stride-2 all-ones conv of the single-channel mask == sum of 9 taps.
    Bn, H, W, _ = masks.shape
    Ho, Wo = H // 2, W // 2
    mp = jnp.pad(masks, ((0, 0), (1, 1), (1, 1), (0, 0)))
    den = sum(mp[:, i:i + 2 * Ho:2, j:j + 2 * Wo:2, :]
              for i in range(3) for j in range(3))
    y = jax.nn.relu(num / (den + 1e-4) + p['d_b1'][None, None, None, :])
    new_mask = (den > 0).astype(jnp.float32)
    y = jnp.concatenate([y, halfgrids], axis=-1)
    y = conv2d(y, p['d_w2'], p['d_b2'], stride=1, padding=1, relu=True)
    return y, new_mask


def motioncoster(x, p):
    # TODO(synk): exact encoder2D.Net2D arch unavailable; /2 downsample net.
    y = conv2d(x, p['m_w1'], p['m_b1'], stride=2, padding=1, relu=True)
    y = conv2d(y, p['m_w2'], p['m_b2'], stride=1, padding=1, relu=True)
    y = conv2d(y, p['m_w3'], p['m_b3'], stride=1, padding=0, relu=False)
    return y


def sample_trajs(key, N, clist_cam, T_past):
    # TODO(synk): original uses np.random + fresnel; deterministic straight-line
    # negatives generated with jax.random instead.
    B, S, _ = clist_cam.shape
    T_futu = S - T_past
    vel = clist_cam[:, T_past - 1] - clist_cam[:, T_past - 2]        # (B, 3)
    k1, k2 = jax.random.split(key, 2)
    speeds = jax.random.uniform(k1, (B, N), minval=0.1, maxval=2.0)
    thetas = jax.random.uniform(k2, (B, N), minval=-0.5, maxval=0.5)
    t = jnp.arange(1, T_futu + 1, dtype=jnp.float32)
    ang = jnp.arctan2(vel[:, 2], vel[:, 0])[:, None] + thetas        # (B, N)
    anchor = clist_cam[:, T_past - 1]                                # (B, 3)
    fx = anchor[:, None, None, 0] + (jnp.cos(ang) * speeds)[..., None] * t
    fz = anchor[:, None, None, 2] + (jnp.sin(ang) * speeds)[..., None] * t
    futu = jnp.stack([fx, jnp.zeros_like(fx), fz], axis=-1)          # (B,N,Tf,3)
    past = clist_cam[:, None, :T_past, :]
    past = jnp.stack([past[..., 0], jnp.zeros_like(past[..., 0]),
                      past[..., 2]], axis=-1)
    past = jnp.broadcast_to(past, (B, N, T_past, 3))
    return jnp.concatenate([past, futu], axis=2)                     # (B,N,S,3)


def init_params(key, in_chan, S=8):
    ks = jax.random.split(key, 5)
    s = 0.05
    super_dim = DENSE_DIM * T_PAST
    T_futu = S - T_PAST
    return {
        # HWIO conv weights (NHWC activations)
        'd_w1': jax.random.normal(ks[0], (3, 3, in_chan, DENSE_DIM)) * s,
        'd_b1': jnp.zeros((DENSE_DIM,), jnp.float32),
        'd_w2': jax.random.normal(ks[1], (3, 3, DENSE_DIM + 2, DENSE_DIM)) * s,
        'd_b2': jnp.zeros((DENSE_DIM,), jnp.float32),
        'm_w1': jax.random.normal(ks[2], (3, 3, super_dim, MID_CHANS)) * s,
        'm_b1': jnp.zeros((MID_CHANS,), jnp.float32),
        'm_w2': jax.random.normal(ks[3], (3, 3, MID_CHANS, MID_CHANS)) * s,
        'm_b2': jnp.zeros((MID_CHANS,), jnp.float32),
        'm_w3': jax.random.normal(ks[4], (1, 1, MID_CHANS, T_futu)) * s,
        'm_b3': jnp.zeros((T_futu,), jnp.float32),
    }


# -------------------------------- Forward -----------------------------------

def motioncost_forward(clist_cam, occs, params, key):
    B, S, C, Z, Y, X = occs.shape
    T_futu = S - T_PAST

    # pack_seqdim + permute(0,1,3,2,4) + reshape, expressed in NHWC:
    # channel index is c*Y + y, identical to the original NCHW packing.
    occs_ = occs.reshape(B * S, C, Z, Y, X)
    feats_ = occs_.transpose(0, 2, 4, 1, 3).reshape(B * S, Z, X, C * Y)
    masks_ = 1.0 - jnp.all(feats_ == 0, axis=-1, keepdims=True).astype(jnp.float32)
    halfgrids_ = meshgrid2d(B * S, Z // 2, X // 2)

    feats = feats_.reshape(B, S, Z, X, C * Y)
    masks = masks_.reshape(B, S, Z, X, 1)
    halfgrids = halfgrids_.reshape(B, S, Z // 2, X // 2, 2)

    input_feats = feats[:, :T_PAST].reshape(B * T_PAST, Z, X, C * Y)
    input_masks = masks[:, :T_PAST].reshape(B * T_PAST, Z, X, 1)
    input_hg = halfgrids[:, :T_PAST].reshape(B * T_PAST, Z // 2, X // 2, 2)

    dense_feats_, _ = densifier(input_feats, input_masks, input_hg, params)
    # super_feat channel index = t*dense_dim + c (matches original reshape)
    super_feat = (dense_feats_
                  .reshape(B, T_PAST, Z // 2, X // 2, DENSE_DIM)
                  .transpose(0, 2, 3, 1, 4)
                  .reshape(B, Z // 2, X // 2, T_PAST * DENSE_DIM))
    cost_small = motioncoster(super_feat, params)        # (B, Z/4, X/4, T_futu)
    cost_small_bt = (cost_small.transpose(0, 3, 1, 2)
                     .reshape(B * T_futu, Z // 4, X // 4))

    # upsample matrices for F.interpolate(scale_factor=4, mode='bilinear')
    Uz = _upsample_matrix(Z // 4, 4)                     # (Z, Z/4)
    UxT = _upsample_matrix(X // 4, 4).T                  # (X/4, X)

    # trajectories
    N = N_NEGS
    sampled_trajs_cam = sample_trajs(key, N, clist_cam, T_PAST)
    clist_mem = ref2mem(clist_cam, Z, Y, X)
    st_mem = ref2mem(sampled_trajs_cam.reshape(B, N * S, 3), Z, Y, X)
    st_mem = st_mem.reshape(B, N, S, 3)

    xyz_pos_ = clist_mem[:, T_PAST:].reshape(B * T_futu, 1, 3)
    xyz_neg_ = st_mem[:, :, T_PAST:].transpose(0, 2, 1, 3).reshape(B * T_futu, N, 3)
    xz_pos_ = jnp.stack([xyz_pos_[:, :, 0], xyz_pos_[:, :, 2]], axis=2)
    xz_neg_ = jnp.stack([xyz_neg_[:, :, 0], xyz_neg_[:, :, 2]], axis=2)
    xz_ = jnp.concatenate([xz_pos_, xz_neg_], axis=1)    # (BT, 1+N, 2)

    # clamp_xz: the original does `x = x.clamp(0, X); z = x.clamp(0, Z)`
    # (z is derived from x) — reproduced verbatim to keep forward semantics.
    xc = jnp.clip(xz_[:, :, 0], 0.0, float(X))
    zc = jnp.clip(xc, 0.0, float(Z))

    Wx = _bilinear_weights(xc, X)                        # (BT, P, X)
    Wz = _bilinear_weights(zc, Z)                        # (BT, P, Z)

    # fused tail: upsample + clamp + smoothness + trajectory sampling
    cost_maps_bt, smooth_spatial, smooth_time, cost_ = pallas_cost_tail(
        cost_small_bt, Uz, UxT, Wz, Wx, B, T_futu)
    cost_maps = cost_maps_bt.reshape(B, T_futu, Z, X)
    smooth_loss = smooth_spatial + smooth_time

    cost_pos = cost_[:, 0:1][:, :, None]                 # (BT,1,1)
    cost_neg = cost_[:, 1:][:, None, :]                  # (BT,1,N)
    xz_pos = xz_pos_[:, :, None, :]                      # (BT,1,1,2)
    xz_neg = xz_neg_[:, None, :, :]                      # (BT,1,N,2)
    dist = jnp.linalg.norm(xz_pos - xz_neg, axis=3) / float(Z) * 5.0
    margin = jax.nn.relu(cost_pos - cost_neg + dist)
    margin = margin.reshape(B, T_futu, N)
    margin = jnp.mean(margin, axis=1)
    maxmargin = jnp.max(margin, axis=1)
    maxmargin_loss = jnp.mean(maxmargin)

    # TODO(synk): summ_writer visualisations / zero-coeff diagnostic losses
    # (mean_cost_pos/neg, xyz_dist_n) omitted — they do not affect total_loss.
    total_loss = SMOOTH_COEFF * smooth_loss + MAXMARGIN_COEFF * maxmargin_loss
    return total_loss, cost_maps


if __name__ == "__main__":
    key = jax.random.PRNGKey(0)
    B, S, C, Z, Y, X = 2, 8, 1, 16, 8, 16
    kp, ko, kc, kt = jax.random.split(key, 4)

    params = init_params(kp, in_chan=C * Y, S=S)
    occs = (jax.random.uniform(ko, (B, S, C, Z, Y, X)) < 0.2).astype(jnp.float32)
    t = jnp.arange(S, dtype=jnp.float32)
    cx = jax.random.uniform(kc, (B, 1)) * 2.0 - 1.0 + 0.3 * t[None, :]   # (B, S)
    cz = jnp.broadcast_to(2.0 + 1.0 * t[None, :], (B, S))                # (B, S)
    cy = jnp.zeros_like(cx)                                              # (B, S)
    clist_cam = jnp.stack([cx, cy, cz], axis=2)                          # (B, S, 3)

    fwd = jax.jit(motioncost_forward)
    total_loss, cost_maps = fwd(clist_cam, occs, params, kt)
    jax.block_until_ready(total_loss)
    assert cost_maps.shape == (B, S - T_PAST, Z, X)
    assert bool(jnp.isfinite(total_loss))
    print("KERNEL_OK")
</pallas_src>

<mosaic_0001>
module attributes {stable_mosaic.version = 11 : i64} {
  func.func @_matmul_bias_kernel(%arg0: i32, %arg1: memref<192x128xbf16, #tpu.memory_space<vmem>>, %arg2: memref<128x128xbf16, #tpu.memory_space<vmem>>, %arg3: memref<1x128xf32, #tpu.memory_space<vmem>>, %arg4: memref<192x128xf32, #tpu.memory_space<vmem>>) attributes {dimension_semantics = [#tpu.dimension_semantics<parallel>], iteration_bounds = array<i64: 2>, scalar_prefetch = 0 : i64, scratch_operands = 0 : i64, tpu.core_type = #tpu.core_type<tc>, window_params = [{transform_indices = @transform_0, window_bounds = array<i64: 192, 128>}, {pipeline_mode = #tpu.pipeline_mode<synchronous>, transform_indices = @transform_1, window_bounds = array<i64: 128, 128>}, {pipeline_mode = #tpu.pipeline_mode<synchronous>, transform_indices = @transform_2, window_bounds = array<i64: 1, 128>}, {transform_indices = @transform_3, window_bounds = array<i64: 192, 128>}]} {
    %c0 = arith.constant 0 : index
    %c0_0 = arith.constant 0 : index
    %0 = vector.load %arg1[%c0, %c0_0] : memref<192x128xbf16, #tpu.memory_space<vmem>>, vector<192x128xbf16>
    %c0_1 = arith.constant 0 : index
    %c0_2 = arith.constant 0 : index
    %1 = vector.load %arg2[%c0_1, %c0_2] : memref<128x128xbf16, #tpu.memory_space<vmem>>, vector<128x128xbf16>
    %cst = arith.constant dense<0.000000e+00> : vector<192x128xf32>
    %2 = tpu.matmul %0, %1, %cst {dimension_numbers = #tpu.dot_dimension_numbers<[1], [0], [0], [1], [0, 0, 1, 1], [], []>} : vector<192x128xbf16>, vector<128x128xbf16>, vector<192x128xf32> -> vector<192x128xf32>
    %c0_3 = arith.constant 0 : index
    %c0_4 = arith.constant 0 : index
    %3 = vector.load %arg3[%c0_3, %c0_4] : memref<1x128xf32, #tpu.memory_space<vmem>>, vector<1x128xf32>
    %4 = vector.broadcast %3 : vector<1x128xf32> to vector<192x128xf32>
    %5 = arith.addf %2, %4 : vector<192x128xf32>
    %c0_5 = arith.constant 0 : index
    %c0_6 = arith.constant 0 : index
    %6 = vector.load %arg4[%c0_5, %c0_6] : memref<192x128xf32, #tpu.memory_space<vmem>>, vector<192x128xf32>
    tpu.vector_store %arg4[%c0_5, %c0_6], %5 {strides = array<i32>} : memref<192x128xf32, #tpu.memory_space<vmem>>, vector<192x128xf32>,
    return
  }
  func.func @transform_0(%arg0: i32) -> (i32, i32) {
    %c0_i32 = arith.constant 0 : i32
    %c0_i32_0 = arith.constant 0 : i32
    return %arg0, %c0_i32 : i32, i32
  }
  func.func @transform_1(%arg0: i32) -> (i32, i32) {
    %c0_i32 = arith.constant 0 : i32
    %c0_i32_0 = arith.constant 0 : i32
    %c0_i32_1 = arith.constant 0 : i32
    return %c0_i32, %c0_i32_0 : i32, i32
  }
  func.func @transform_2(%arg0: i32) -> (i32, i32) {
    %c0_i32 = arith.constant 0 : i32
    %c0_i32_0 = arith.constant 0 : i32
    %c0_i32_1 = arith.constant 0 : i32
    return %c0_i32, %c0_i32_0 : i32, i32
  }
  func.func @transform_3(%arg0: i32) -> (i32, i32) {
    %c0_i32 = arith.constant 0 : i32
    %c0_i32_0 = arith.constant 0 : i32
    return %arg0, %c0_i32 : i32, i32
  }
}

module attributes {stable_mosaic.version = 11 : i64} {
  func.func @_matmul_bias_relu_kernel(%arg0: i32, %arg1: memref<192x384xbf16, #tpu.memory_space<vmem>>, %arg2: memref<384x128xbf16, #tpu.memory_space<vmem>>, %arg3: memref<1x128xf32, #tpu.memory_space<vmem>>, %arg4: memref<192x128xf32, #tpu.memory_space<vmem>>) attributes {dimension_semantics = [#tpu.dimension_semantics<parallel>], iteration_bounds = array<i64: 2>, scalar_prefetch = 0 : i64, scratch_operands = 0 : i64, tpu.core_type = #tpu.core_type<tc>, window_params = [{transform_indices = @transform_0, window_bounds = array<i64: 192, 384>}, {pipeline_mode = #tpu.pipeline_mode<synchronous>, transform_indices = @transform_1, window_bounds = array<i64: 384, 128>}, {pipeline_mode = #tpu.pipeline_mode<synchronous>, transform_indices = @transform_2, window_bounds = array<i64: 1, 128>}, {transform_indices = @transform_3, window_bounds = array<i64: 192, 128>}]} {
    %c0 = arith.constant 0 : index
    %c0_0 = arith.constant 0 : index
    %0 = vector.load %arg1[%c0, %c0_0] : memref<192x384xbf16, #tpu.memory_space<vmem>>, vector<192x384xbf16>
    %c0_1 = arith.constant 0 : index
    %c0_2 = arith.constant 0 : index
    %1 = vector.load %arg2[%c0_1, %c0_2] : memref<384x128xbf16, #tpu.memory_space<vmem>>, vector<384x128xbf16>
    %cst = arith.constant dense<0.000000e+00> : vector<192x128xf32>
    %2 = tpu.matmul %0, %1, %cst {dimension_numbers = #tpu.dot_dimension_numbers<[1], [0], [0], [1], [0, 0, 1, 1], [], []>} : vector<192x384xbf16>, vector<384x128xbf16>, vector<192x128xf32> -> vector<192x128xf32>
    %c0_3 = arith.constant 0 : index
    %c0_4 = arith.constant 0 : index
    %3 = vector.load %arg3[%c0_3, %c0_4] : memref<1x128xf32, #tpu.memory_space<vmem>>, vector<1x128xf32>
    %4 = vector.broadcast %3 : vector<1x128xf32> to vector<192x128xf32>
    %5 = arith.addf %2, %4 : vector<192x128xf32>
    %cst_5 = arith.constant 0.000000e+00 : f32
    %6 = vector.broadcast %cst_5 : f32 to vector<192x128xf32>
    %7 = arith.maximumf %5, %6 : vector<192x128xf32>
    %c0_6 = arith.constant 0 : index
    %c0_7 = arith.constant 0 : index
    %8 = vector.load %arg4[%c0_6, %c0_7] : memref<192x128xf32, #tpu.memory_space<vmem>>, vector<192x128xf32>
    tpu.vector_store %arg4[%c0_6, %c0_7], %7 {strides = array<i32>} : memref<192x128xf32, #tpu.memory_space<vmem>>, vector<192x128xf32>,
    return
  }
  func.func @transform_0(%arg0: i32) -> (i32, i32) {
    %c0_i32 = arith.constant 0 : i32
    %c0_i32_0 = arith.constant 0 : i32
    return %arg0, %c0_i32 : i32, i32
  }
  func.func @transform_1(%arg0: i32) -> (i32, i32) {
    %c0_i32 = arith.constant 0 : i32
    %c0_i32_0 = arith.constant 0 : i32
    %c0_i32_1 = arith.constant 0 : i32
    return %c0_i32, %c0_i32_0 : i32, i32
  }
  func.func @transform_2(%arg0: i32) -> (i32, i32) {
    %c0_i32 = arith.constant 0 : i32
    %c0_i32_0 = arith.constant 0 : i32
    %c0_i32_1 = arith.constant 0 : i32
    return %c0_i32, %c0_i32_0 : i32, i32
  }
  func.func @transform_3(%arg0: i32) -> (i32, i32) {
    %c0_i32 = arith.constant 0 : i32
    %c0_i32_0 = arith.constant 0 : i32
    return %arg0, %c0_i32 : i32, i32
  }
}

module attributes {stable_mosaic.version = 11 : i64} {
  func.func @_matmul_bias_relu_kernel(%arg0: i32, %arg1: memref<32x896xbf16, #tpu.memory_space<vmem>>, %arg2: memref<896x128xbf16, #tpu.memory_space<vmem>>, %arg3: memref<1x128xf32, #tpu.memory_space<vmem>>, %arg4: memref<32x128xf32, #tpu.memory_space<vmem>>) attributes {dimension_semantics = [#tpu.dimension_semantics<parallel>], iteration_bounds = array<i64: 1>, scalar_prefetch = 0 : i64, scratch_operands = 0 : i64, tpu.core_type = #tpu.core_type<tc>, window_params = [{transform_indices = @transform_0, window_bounds = array<i64: 32, 896>}, {pipeline_mode = #tpu.pipeline_mode<synchronous>, transform_indices = @transform_1, window_bounds = array<i64: 896, 128>}, {pipeline_mode = #tpu.pipeline_mode<synchronous>, transform_indices = @transform_2, window_bounds = array<i64: 1, 128>}, {transform_indices = @transform_3, window_bounds = array<i64: 32, 128>}]} {
    %c0 = arith.constant 0 : index
    %c0_0 = arith.constant 0 : index
    %0 = vector.load %arg1[%c0, %c0_0] : memref<32x896xbf16, #tpu.memory_space<vmem>>, vector<32x896xbf16>
    %c0_1 = arith.constant 0 : index
    %c0_2 = arith.constant 0 : index
    %1 = vector.load %arg2[%c0_1, %c0_2] : memref<896x128xbf16, #tpu.memory_space<vmem>>, vector<896x128xbf16>
    %cst = arith.constant dense<0.000000e+00> : vector<32x128xf32>
    %2 = tpu.matmul %0, %1, %cst {dimension_numbers = #tpu.dot_dimension_numbers<[1], [0], [0], [1], [0, 0, 1, 1], [], []>} : vector<32x896xbf16>, vector<896x128xbf16>, vector<32x128xf32> -> vector<32x128xf32>
    %c0_3 = arith.constant 0 : index
    %c0_4 = arith.constant 0 : index
    %3 = vector.load %arg3[%c0_3, %c0_4] : memref<1x128xf32, #tpu.memory_space<vmem>>, vector<1x128xf32>
    %4 = vector.broadcast %3 : vector<1x128xf32> to vector<32x128xf32>
    %5 = arith.addf %2, %4 : vector<32x128xf32>
    %cst_5 = arith.constant 0.000000e+00 : f32
    %6 = vector.broadcast %cst_5 : f32 to vector<32x128xf32>
    %7 = arith.maximumf %5, %6 : vector<32x128xf32>
    %c0_6 = arith.constant 0 : index
    %c0_7 = arith.constant 0 : index
    %8 = vector.load %arg4[%c0_6, %c0_7] : memref<32x128xf32, #tpu.memory_space<vmem>>, vector<32x128xf32>
    tpu.vector_store %arg4[%c0_6, %c0_7], %7 {strides = array<i32>} : memref<32x128xf32, #tpu.memory_space<vmem>>, vector<32x128xf32>,
    return
  }
  func.func @transform_0(%arg0: i32) -> (i32, i32) {
    %c0_i32 = arith.constant 0 : i32
    %c0_i32_0 = arith.constant 0 : i32
    return %arg0, %c0_i32 : i32, i32
  }
  func.func @transform_1(%arg0: i32) -> (i32, i32) {
    %c0_i32 = arith.constant 0 : i32
    %c0_i32_0 = arith.constant 0 : i32
    %c0_i32_1 = arith.constant 0 : i32
    return %c0_i32, %c0_i32_0 : i32, i32
  }
  func.func @transform_2(%arg0: i32) -> (i32, i32) {
    %c0_i32 = arith.constant 0 : i32
    %c0_i32_0 = arith.constant 0 : i32
    %c0_i32_1 = arith.constant 0 : i32
    return %c0_i32, %c0_i32_0 : i32, i32
  }
  func.func @transform_3(%arg0: i32) -> (i32, i32) {
    %c0_i32 = arith.constant 0 : i32
    %c0_i32_0 = arith.constant 0 : i32
    return %arg0, %c0_i32 : i32, i32
  }
}

module attributes {stable_mosaic.version = 11 : i64} {
  func.func @_matmul_bias_relu_kernel(%arg0: i32, %arg1: memref<32x640xbf16, #tpu.memory_space<vmem>>, %arg2: memref<640x128xbf16, #tpu.memory_space<vmem>>, %arg3: memref<1x128xf32, #tpu.memory_space<vmem>>, %arg4: memref<32x128xf32, #tpu.memory_space<vmem>>) attributes {dimension_semantics = [#tpu.dimension_semantics<parallel>], iteration_bounds = array<i64: 1>, scalar_prefetch = 0 : i64, scratch_operands = 0 : i64, tpu.core_type = #tpu.core_type<tc>, window_params = [{transform_indices = @transform_0, window_bounds = array<i64: 32, 640>}, {pipeline_mode = #tpu.pipeline_mode<synchronous>, transform_indices = @transform_1, window_bounds = array<i64: 640, 128>}, {pipeline_mode = #tpu.pipeline_mode<synchronous>, transform_indices = @transform_2, window_bounds = array<i64: 1, 128>}, {transform_indices = @transform_3, window_bounds = array<i64: 32, 128>}]} {
    %c0 = arith.constant 0 : index
    %c0_0 = arith.constant 0 : index
    %0 = vector.load %arg1[%c0, %c0_0] : memref<32x640xbf16, #tpu.memory_space<vmem>>, vector<32x640xbf16>
    %c0_1 = arith.constant 0 : index
    %c0_2 = arith.constant 0 : index
    %1 = vector.load %arg2[%c0_1, %c0_2] : memref<640x128xbf16, #tpu.memory_space<vmem>>, vector<640x128xbf16>
    %cst = arith.constant dense<0.000000e+00> : vector<32x128xf32>
    %2 = tpu.matmul %0, %1, %cst {dimension_numbers = #tpu.dot_dimension_numbers<[1], [0], [0], [1], [0, 0, 1, 1], [], []>} : vector<32x640xbf16>, vector<640x128xbf16>, vector<32x128xf32> -> vector<32x128xf32>
    %c0_3 = arith.constant 0 : index
    %c0_4 = arith.constant 0 : index
    %3 = vector.load %arg3[%c0_3, %c0_4] : memref<1x128xf32, #tpu.memory_space<vmem>>, vector<1x128xf32>
    %4 = vector.broadcast %3 : vector<1x128xf32> to vector<32x128xf32>
    %5 = arith.addf %2, %4 : vector<32x128xf32>
    %cst_5 = arith.constant 0.000000e+00 : f32
    %6 = vector.broadcast %cst_5 : f32 to vector<32x128xf32>
    %7 = arith.maximumf %5, %6 : vector<32x128xf32>
    %c0_6 = arith.constant 0 : index
    %c0_7 = arith.constant 0 : index
    %8 = vector.load %arg4[%c0_6, %c0_7] : memref<32x128xf32, #tpu.memory_space<vmem>>, vector<32x128xf32>
    tpu.vector_store %arg4[%c0_6, %c0_7], %7 {strides = array<i32>} : memref<32x128xf32, #tpu.memory_space<vmem>>, vector<32x128xf32>,
    return
  }
  func.func @transform_0(%arg0: i32) -> (i32, i32) {
    %c0_i32 = arith.constant 0 : i32
    %c0_i32_0 = arith.constant 0 : i32
    return %arg0, %c0_i32 : i32, i32
  }
  func.func @transform_1(%arg0: i32) -> (i32, i32) {
    %c0_i32 = arith.constant 0 : i32
    %c0_i32_0 = arith.constant 0 : i32
    %c0_i32_1 = arith.constant 0 : i32
    return %c0_i32, %c0_i32_0 : i32, i32
  }
  func.func @transform_2(%arg0: i32) -> (i32, i32) {
    %c0_i32 = arith.constant 0 : i32
    %c0_i32_0 = arith.constant 0 : i32
    %c0_i32_1 = arith.constant 0 : i32
    return %c0_i32, %c0_i32_0 : i32, i32
  }
  func.func @transform_3(%arg0: i32) -> (i32, i32) {
    %c0_i32 = arith.constant 0 : i32
    %c0_i32_0 = arith.constant 0 : i32
    return %arg0, %c0_i32 : i32, i32
  }
}

module attributes {stable_mosaic.version = 11 : i64} {
  func.func @_matmul_bias_kernel(%arg0: i32, %arg1: memref<32x128xbf16, #tpu.memory_space<vmem>>, %arg2: memref<128x128xbf16, #tpu.memory_space<vmem>>, %arg3: memref<1x128xf32, #tpu.memory_space<vmem>>, %arg4: memref<32x128xf32, #tpu.memory_space<vmem>>) attributes {dimension_semantics = [#tpu.dimension_semantics<parallel>], iteration_bounds = array<i64: 1>, scalar_prefetch = 0 : i64, scratch_operands = 0 : i64, tpu.core_type = #tpu.core_type<tc>, window_params = [{transform_indices = @transform_0, window_bounds = array<i64: 32, 128>}, {pipeline_mode = #tpu.pipeline_mode<synchronous>, transform_indices = @transform_1, window_bounds = array<i64: 128, 128>}, {pipeline_mode = #tpu.pipeline_mode<synchronous>, transform_indices = @transform_2, window_bounds = array<i64: 1, 128>}, {transform_indices = @transform_3, window_bounds = array<i64: 32, 128>}]} {
    %c0 = arith.constant 0 : index
    %c0_0 = arith.constant 0 : index
    %0 = vector.load %arg1[%c0, %c0_0] : memref<32x128xbf16, #tpu.memory_space<vmem>>, vector<32x128xbf16>
    %c0_1 = arith.constant 0 : index
    %c0_2 = arith.constant 0 : index
    %1 = vector.load %arg2[%c0_1, %c0_2] : memref<128x128xbf16, #tpu.memory_space<vmem>>, vector<128x128xbf16>
    %cst = arith.constant dense<0.000000e+00> : vector<32x128xf32>
    %2 = tpu.matmul %0, %1, %cst {dimension_numbers = #tpu.dot_dimension_numbers<[1], [0], [0], [1], [0, 0, 1, 1], [], []>} : vector<32x128xbf16>, vector<128x128xbf16>, vector<32x128xf32> -> vector<32x128xf32>
    %c0_3 = arith.constant 0 : index
    %c0_4 = arith.constant 0 : index
    %3 = vector.load %arg3[%c0_3, %c0_4] : memref<1x128xf32, #tpu.memory_space<vmem>>, vector<1x128xf32>
    %4 = vector.broadcast %3 : vector<1x128xf32> to vector<32x128xf32>
    %5 = arith.addf %2, %4 : vector<32x128xf32>
    %c0_5 = arith.constant 0 : index
    %c0_6 = arith.constant 0 : index
    %6 = vector.load %arg4[%c0_5, %c0_6] : memref<32x128xf32, #tpu.memory_space<vmem>>, vector<32x128xf32>
    tpu.vector_store %arg4[%c0_5, %c0_6], %5 {strides = array<i32>} : memref<32x128xf32, #tpu.memory_space<vmem>>, vector<32x128xf32>,
    return
  }
  func.func @transform_0(%arg0: i32) -> (i32, i32) {
    %c0_i32 = arith.constant 0 : i32
    %c0_i32_0 = arith.constant 0 : i32
    return %arg0, %c0_i32 : i32, i32
  }
  func.func @transform_1(%arg0: i32) -> (i32, i32) {
    %c0_i32 = arith.constant 0 : i32
    %c0_i32_0 = arith.constant 0 : i32
    %c0_i32_1 = arith.constant 0 : i32
    return %c0_i32, %c0_i32_0 : i32, i32
  }
  func.func @transform_2(%arg0: i32) -> (i32, i32) {
    %c0_i32 = arith.constant 0 : i32
    %c0_i32_0 = arith.constant 0 : i32
    %c0_i32_1 = arith.constant 0 : i32
    return %c0_i32, %c0_i32_0 : i32, i32
  }
  func.func @transform_3(%arg0: i32) -> (i32, i32) {
    %c0_i32 = arith.constant 0 : i32
    %c0_i32_0 = arith.constant 0 : i32
    return %arg0, %c0_i32 : i32, i32
  }
}

module attributes {stable_mosaic.version = 11 : i64} {
  func.func @_cost_tail_kernel(%arg0: memref<10x4x4xf32, #tpu.memory_space<vmem>>, %arg1: memref<16x4xf32, #tpu.memory_space<vmem>>, %arg2: memref<4x16xf32, #tpu.memory_space<vmem>>, %arg3: memref<10x9x16xf32, #tpu.memory_space<vmem>>, %arg4: memref<10x9x16xf32, #tpu.memory_space<vmem>>, %arg5: memref<10x16x16xf32, #tpu.memory_space<vmem>>, %arg6: memref<1x1xf32, #tpu.memory_space<vmem>>, %arg7: memref<1x1xf32, #tpu.memory_space<vmem>>, %arg8: memref<10x9xf32, #tpu.memory_space<vmem>>) attributes {dimension_semantics = [], scalar_prefetch = 0 : i64, scratch_operands = 0 : i64, tpu.core_type = #tpu.core_type<tc>} {
    %c0 = arith.constant 0 : index
    %c0_0 = arith.constant 0 : index
    %c0_1 = arith.constant 0 : index
    %0 = vector.load %arg0[%c0, %c0_0, %c0_1] : memref<10x4x4xf32, #tpu.memory_space<vmem>>, vector<10x4x4xf32>
    %c0_2 = arith.constant 0 : index
    %c0_3 = arith.constant 0 : index
    %1 = vector.load %arg1[%c0_2, %c0_3] : memref<16x4xf32, #tpu.memory_space<vmem>>, vector<16x4xf32>
    %c0_4 = arith.constant 0 : index
    %c0_5 = arith.constant 0 : index
    %2 = vector.load %arg2[%c0_4, %c0_5] : memref<4x16xf32, #tpu.memory_space<vmem>>, vector<4x16xf32>
    %3 = vector.shape_cast %2 : vector<4x16xf32> to vector<1x4x16xf32>
    %4 = vector.shape_cast %3 : vector<1x4x16xf32> to vector<1x4x16xf32>
    %5 = vector.broadcast %4 : vector<1x4x16xf32> to vector<10x4x16xf32>
    "tpu.trace_start"() <{level = 10 : i32, message = "bhw,bwx->bhx"}> : () -> ()
    %cst = arith.constant dense<0.000000e+00> : vector<10x4x16xf32>
    %6 = tpu.matmul %0, %5, %cst {dimension_numbers = #tpu.dot_dimension_numbers<[2], [1], [1], [2], [0, 0, 0, 1, 1, 2], [0], [0]>} : vector<10x4x4xf32>, vector<10x4x16xf32>, vector<10x4x16xf32> -> vector<10x4x16xf32>
    "tpu.trace_stop"() : () -> ()
    %7 = vector.shape_cast %1 : vector<16x4xf32> to vector<1x16x4xf32>
    %8 = vector.shape_cast %7 : vector<1x16x4xf32> to vector<1x16x4xf32>
    %9 = vector.broadcast %8 : vector<1x16x4xf32> to vector<10x16x4xf32>
    "tpu.trace_start"() <{level = 10 : i32, message = "bzh,bhx->bzx"}> : () -> ()
    %cst_6 = arith.constant dense<0.000000e+00> : vector<10x16x16xf32>
    %10 = tpu.matmul %9, %6, %cst_6 {dimension_numbers = #tpu.dot_dimension_numbers<[2], [1], [1], [2], [0, 0, 0, 1, 1, 2], [0], [0]>} : vector<10x16x4xf32>, vector<10x4x16xf32>, vector<10x16x16xf32> -> vector<10x16x16xf32>
    %cst_7 = arith.constant -1.000000e+03 : f32
    %cst_8 = arith.constant 1.000000e+03 : f32
    "tpu.trace_stop"() : () -> ()
    %11 = vector.broadcast %cst_7 : f32 to vector<10x16x16xf32>
    %12 = arith.maximumf %11, %10 : vector<10x16x16xf32>
    %13 = vector.broadcast %cst_8 : f32 to vector<10x16x16xf32>
    %14 = arith.minimumf %13, %12 : vector<10x16x16xf32>
    %c0_9 = arith.constant 0 : index
    %c0_10 = arith.constant 0 : index
    %c0_11 = arith.constant 0 : index
    %15 = vector.load %arg5[%c0_9, %c0_10, %c0_11] : memref<10x16x16xf32, #tpu.memory_space<vmem>>, vector<10x16x16xf32>
    tpu.vector_store %arg5[%c0_9, %c0_10, %c0_11], %14 {strides = array<i32>} : memref<10x16x16xf32, #tpu.memory_space<vmem>>, vector<10x16x16xf32>,
    %16 = vector.extract_strided_slice %14 {offsets = [0, 1, 0], sizes = [10, 15, 16], strides = [1, 1, 1]} : vector<10x16x16xf32> to vector<10x15x16xf32>
    %17 = vector.extract_strided_slice %14 {offsets = [0, 0, 0], sizes = [10, 15, 16], strides = [1, 1, 1]} : vector<10x16x16xf32> to vector<10x15x16xf32>
    %18 = arith.subf %16, %17 : vector<10x15x16xf32>
    %19 = math.absf %18 : vector<10x15x16xf32>
    %20 = vector.extract_strided_slice %14 {offsets = [0, 0, 1], sizes = [10, 16, 15], strides = [1, 1, 1]} : vector<10x16x16xf32> to vector<10x16x15xf32>
    %21 = vector.extract_strided_slice %14 {offsets = [0, 0, 0], sizes = [10, 16, 15], strides = [1, 1, 1]} : vector<10x16x16xf32> to vector<10x16x15xf32>
    %22 = arith.subf %20, %21 : vector<10x16x15xf32>
    %23 = math.absf %22 : vector<10x16x15xf32>
    %24 = vector.shape_cast %14 : vector<10x16x16xf32> to vector<2x5x16x16xf32>
    %25 = vector.extract_strided_slice %24 {offsets = [0, 1, 0, 0], sizes = [2, 4, 16, 16], strides = [1, 1, 1, 1]} : vector<2x5x16x16xf32> to vector<2x4x16x16xf32>
    %26 = vector.extract_strided_slice %24 {offsets = [0, 0, 0, 0], sizes = [2, 4, 16, 16], strides = [1, 1, 1, 1]} : vector<2x5x16x16xf32> to vector<2x4x16x16xf32>
    %27 = arith.subf %25, %26 : vector<2x4x16x16xf32>
    %28 = math.absf %27 : vector<2x4x16x16xf32>
    %29 = vector.shape_cast %19 : vector<10x15x16xf32> to vector<1x10x15x16xf32>
    %cst_12 = arith.constant dense<0.000000e+00> : vector<1xf32>
    %30 = vector.multi_reduction <add>, %29, %cst_12 [1, 2, 3] : vector<1x10x15x16xf32> to vector<1xf32>
    %31 = vector.shape_cast %30 : vector<1xf32> to vector<1x1x1x1xf32>
    %32 = vector.extract %31[0, 0, 0, 0] : f32 from vector<1x1x1x1xf32>
    %33 = vector.shape_cast %23 : vector<10x16x15xf32> to vector<1x10x16x15xf32>
    %cst_13 = arith.constant dense<0.000000e+00> : vector<1xf32>
    %34 = vector.multi_reduction <add>, %33, %cst_13 [1, 2, 3] : vector<1x10x16x15xf32> to vector<1xf32>
    %35 = vector.shape_cast %34 : vector<1xf32> to vector<1x1x1x1xf32>
    %36 = vector.extract %35[0, 0, 0, 0] : f32 from vector<1x1x1x1xf32>
    %37 = arith.addf %32, %36 : f32
    %cst_14 = arith.constant 2.560000e+03 : f32
    %38 = arith.divf %37, %cst_14 : f32
    %39 = vector.shape_cast %28 : vector<2x4x16x16xf32> to vector<1x2x4x16x16xf32>
    %cst_15 = arith.constant dense<0.000000e+00> : vector<1xf32>
    %40 = vector.multi_reduction <add>, %39, %cst_15 [1, 2, 3, 4] : vector<1x2x4x16x16xf32> to vector<1xf32>
    %41 = vector.shape_cast %40 : vector<1xf32> to vector<1x1x1x1x1xf32>
    %42 = vector.extract %41[0, 0, 0, 0, 0] : f32 from vector<1x1x1x1x1xf32>
    %cst_16 = arith.constant 2.048000e+03 : f32
    %43 = arith.divf %42, %cst_16 : f32
    %44 = vector.broadcast %38 : f32 to vector<1x1xf32>
    %c0_17 = arith.constant 0 : index
    %c0_18 = arith.constant 0 : index
    %45 = vector.load %arg6[%c0_17, %c0_18] : memref<1x1xf32, #tpu.memory_space<vmem>>, vector<1x1xf32>
    tpu.vector_store %arg6[%c0_17, %c0_18], %44 {strides = array<i32>} : memref<1x1xf32, #tpu.memory_space<vmem>>, vector<1x1xf32>,
    %46 = vector.broadcast %43 : f32 to vector<1x1xf32>
    %c0_19 = arith.constant 0 : index
    %c0_20 = arith.constant 0 : index
    %47 = vector.load %arg7[%c0_19, %c0_20] : memref<1x1xf32, #tpu.memory_space<vmem>>, vector<1x1xf32>
    tpu.vector_store %arg7[%c0_19, %c0_20], %46 {strides = array<i32>} : memref<1x1xf32, #tpu.memory_space<vmem>>, vector<1x1xf32>,
    %c0_21 = arith.constant 0 : index
    %c0_22 = arith.constant 0 : index
    %c0_23 = arith.constant 0 : index
    %48 = vector.load %arg3[%c0_21, %c0_22, %c0_23] : memref<10x9x16xf32, #tpu.memory_space<vmem>>, vector<10x9x16xf32>
    %c0_24 = arith.constant 0 : index
    %c0_25 = arith.constant 0 : index
    %c0_26 = arith.constant 0 : index
    %49 = vector.load %arg4[%c0_24, %c0_25, %c0_26] : memref<10x9x16xf32, #tpu.memory_space<vmem>>, vector<10x9x16xf32>
    "tpu.trace_start"() <{level = 10 : i32, message = "bpz,bzx->bpx"}> : () -> ()
    %cst_27 = arith.constant dense<0.000000e+00> : vector<10x9x16xf32>
    %50 = tpu.matmul %48, %14, %cst_27 {dimension_numbers = #tpu.dot_dimension_numbers<[2], [1], [1], [2], [0, 0, 0, 1, 1, 2], [0], [0]>} : vector<10x9x16xf32>, vector<10x16x16xf32>, vector<10x9x16xf32> -> vector<10x9x16xf32>
    "tpu.trace_stop"() : () -> ()
    %51 = arith.mulf %50, %49 : vector<10x9x16xf32>
    %cst_28 = arith.constant dense<0.000000e+00> : vector<10x9xf32>
    %52 = vector.multi_reduction <add>, %51, %cst_28 [2] : vector<10x9x16xf32> to vector<10x9xf32>
    %c0_29 = arith.constant 0 : index
    %c0_30 = arith.constant 0 : index
    %53 = vector.load %arg8[%c0_29, %c0_30] : memref<10x9xf32, #tpu.memory_space<vmem>>, vector<10x9xf32>
    tpu.vector_store %arg8[%c0_29, %c0_30], %52 {strides = array<i32>} : memref<10x9xf32, #tpu.memory_space<vmem>>, vector<10x9xf32>,
    return
  }
}

</mosaic_0001>

<bundles_post_ra>
// kernel: motioncost_forward.6
= control target key start
LH: loop header
LB: loop body
LE: loop exit
PB: predicated region body
PF: predicated region fallthrough
CT: control target
= control target key end

     0   :  { %s713_s12 = smov 0   ;;  %s827_s0 = inlined_call_operand.vmem [shape: bf16[384,128], index: 0, kind: input, shape index: {}]   ;;  %s828_s1 = inlined_call_operand.vmem [shape: bf16[128,128], index: 1, kind: input, shape index: {}]   ;;  %s829_s2 = inlined_call_operand.vmem [shape: f32[1,128], index: 2, kind: input, shape index: {}]   ;;  %s830_s3 = inlined_call_operand.vmem [shape: f32[384,128], index: 3, kind: output, shape index: {}]  }
   0x1 LB: > { %s551_s13 = sadd.s32 4294967295, %s691_s12   ;;  %p555_p0 = scmp.ge.s32.totalorder %s691_s12, 1  ;;  %s691_s12 = sphi %s713_s12, %s13_s12  }
   0x2   : > { %p138_p1 = scmp.lt.s32.totalorder %s691_s12, 3 }
   0x4   : > { %p139_p2 = pnand %p555_p0, %p138_p1 }
   0x5   : > { %v665_v0 = vld [vmem:[%s828_s1] sm:$0xff] (!%p139_p2)   ;;  %s162_s16 = smul.u32 (!%p139_p2), 24, %s551_s13  ;;  %v666_v1 = vld [vmem:[%s828_s1 + $0x8] sm:$0xff] (!%p139_p2)   ;;  %v667_v2 = vld [vmem:[%s828_s1 + $0x10] sm:$0xff] (!%p139_p2)  }
   0x6   : > { %142 = sbr.rel (%p139_p2) target bundleno = 272 (0x110), region = 32  ;;  %601 = vmatprep.subr.bf16.mxu0 (!%p139_p2), %v665_v0  ;;  %641 = vmatprep.subr.bf16.mxu1 (!%p139_p2), %v665_v0  ;;  %v668_v3 = vld [vmem:[%s828_s1 + $0x18] sm:$0xff] (!%p139_p2)   ;;  %v669_v6 = vld [vmem:[%s828_s1 + $0x20] sm:$0xff] (!%p139_p2)   ;;  %v670_v7 = vld [vmem:[%s828_s1 + $0x28] sm:$0xff] (!%p139_p2)  }
   0x7   : > { %p163_p3 = scmp.lt.s32.totalorder (!%p139_p2), %s162_s16, 47  ;;  %602 = vmatpush3.bf16.msra.mxu0 (!%p139_p2), %v665_v0  ;;  %649 = vmatpush3.bf16.msra.mxu1 (!%p139_p2), %v665_v0  ;;  %v671_v8 = vld [vmem:[%s828_s1 + $0x30] sm:$0xff] (!%p139_p2)   ;;  %v672_v9 = vld [vmem:[%s828_s1 + $0x38] sm:$0xff] (!%p139_p2)   ;;  %v769_v20 = vld [vmem:[%s829_s2] ss:$0 sm:$0xff] (!%p139_p2) }
   0x8   : > { %603 = vmatprep.subr.bf16.mxu0 (!%p139_p2), %v666_v1  ;;  %642 = vmatprep.subr.bf16.mxu1 (!%p139_p2), %v666_v1 }
   0xb   : > { %604 = vmatpush3.bf16.msra.mxu0 (!%p139_p2), %v666_v1  ;;  %650 = vmatpush3.bf16.msra.mxu1 (!%p139_p2), %v666_v1 }
   0xc   : > { %605 = vmatprep.subr.bf16.mxu0 (!%p139_p2), %v667_v2  ;;  %643 = vmatprep.subr.bf16.mxu1 (!%p139_p2), %v667_v2 }
   0xd   : > { %s832_s16 = smov (!%p163_p3, %s162_s16), 47 }
   0xe   : > { %s556_s21 = sshll.u32 %s832_s16, 2  ;;  %s557_s8 = sshll.u32 %s832_s16, 3 }
   0xf   : > { %s739_s26 = scalar_lea.vmem %s827_s0, %s556_s21  ;;  %606 = vmatpush3.bf16.msra.mxu0 %v667_v2  ;;  %651 = vmatpush3.bf16.msra.mxu1 %v667_v2  ;;  %s774_s14 = scalar_lea.vmem %s830_s3, %s557_s8 }
  0x10   : > { %v673_v4 = vld [vmem:[%s739_s26] sm:$0xff]   ;;  %v674_v5 = vld [vmem:[%s739_s26 + $0x30] sm:$0xff]   ;;  %607 = vmatprep.subr.bf16.mxu0 %v668_v3  ;;  %644 = vmatprep.subr.bf16.mxu1 %v668_v3  ;;  %v675_v10 = vld [vmem:[%s739_s26 + $0x8] sm:$0xff]  }
  0x11   : > { %617 = vmatprep.mubr.bf16.mxu0 %v673_v4  ;;  %629 = vmatprep.mubr.bf16.mxu1 %v674_v5  ;;  %v676_v11 = vld [vmem:[%s739_s26 + $0x38] sm:$0xff]   ;;  %v677_v12 = vld [vmem:[%s739_s26 + $0x10] sm:$0xff]   ;;  %v678_v13 = vld [vmem:[%s739_s26 + $0x40] sm:$0xff]  }
  0x12   : > { %v679_v14 = vld [vmem:[%s739_s26 + $0x18] sm:$0xff]   ;;  %v680_v15 = vld [vmem:[%s739_s26 + $0x48] sm:$0xff]   ;;  %v681_v16 = vld [vmem:[%s739_s26 + $0x20] sm:$0xff]  }
  0x13   : > { %608 = vmatpush3.bf16.msra.mxu0 %v668_v3  ;;  %652 = vmatpush3.bf16.msra.mxu1 %v668_v3  ;;  %v682_v17 = vld [vmem:[%s739_s26 + $0x50] sm:$0xff]   ;;  %v683_v18 = vld [vmem:[%s739_s26 + $0x28] sm:$0xff]   ;;  %v684_v19 = vld [vmem:[%s739_s26 + $0x58] sm:$0xff]  }
  0x14   : > { %609 = vmatprep.subr.bf16.mxu0 %v669_v6  ;;  %645 = vmatprep.subr.bf16.mxu1 %v669_v6 }
  0x17   : > { %610 = vmatpush3.bf16.msra.mxu0 %v669_v6  ;;  %653 = vmatpush3.bf16.msra.mxu1 %v669_v6 }
  0x18   : > { %611 = vmatprep.subr.bf16.mxu0 %v670_v7  ;;  %646 = vmatprep.subr.bf16.mxu1 %v670_v7 }
  0x1b   : > { %612 = vmatpush3.bf16.msra.mxu0 %v670_v7  ;;  %654 = vmatpush3.bf16.msra.mxu1 %v670_v7 }
  0x1c   : > { %613 = vmatprep.subr.bf16.mxu0 %v671_v8  ;;  %647 = vmatprep.subr.bf16.mxu1 %v671_v8 }
  0x1f   : > { %614 = vmatpush3.bf16.msra.mxu0 %v671_v8  ;;  %655 = vmatpush3.bf16.msra.mxu1 %v671_v8 }
  0x20   : > { %615 = vmatprep.subr.bf16.mxu0 %v672_v9  ;;  %648 = vmatprep.subr.bf16.mxu1 %v672_v9 }
  0x23   : > { %616 = vmatpush3.bf16.msra.mxu0 %v672_v9  ;;  %656 = vmatpush3.bf16.msra.mxu1 %v672_v9 }
  0x26   : > { %618 = vmatmul.mubr.bf16.vlgmr.msra.gmra.mrb[0].mxu0 %v675_v10  ;;  %630 = vmatmul.mubr.bf16.vlgmr.msra.gmra.mrb[0].mxu1 %v676_v11 }
  0x27   : > { %621 = vmatprep.mubr.bf16.mxu0 %v677_v12  ;;  %633 = vmatprep.mubr.bf16.mxu1 %v678_v13 }
  0x2e   : > { %622 = vmatmul.mubr.bf16.gmra.mrb[4].mxu0 %v679_v14  ;;  %634 = vmatmul.mubr.bf16.gmra.mrb[4].mxu1 %v680_v15 }
  0x2f   : > { %625 = vmatprep.mubr.bf16.mxu0 %v681_v16  ;;  %637 = vmatprep.mubr.bf16.mxu1 %v682_v17 }
  0x36   : > { %626 = vmatmul.mubr.bf16.gmra.mrb[8].mxu0 %v683_v18  ;;  %638 = vmatmul.mubr.bf16.gmra.mrb[8].mxu1 %v684_v19 }
  0xf9   : > { %v619_v21 = vpop.f32.mrb[0].mxu0  ;;  %v631_v22 = vpop.f32.mrb[0].mxu1 }
  0xfa   : > { %v385_v23 = vadd.f32 %v619_v21, %v769_v20  ;;  %v433_v24 = vadd.f32 %v631_v22, %v769_v20  ;;  %v376_v25 = vpop.f32.mrb[1].mxu0  ;;  %v424_v26 = vpop.f32.mrb[1].mxu1 }
  0xfb   : > { %v377_v27 = vadd.f32 %v769_v20, %v376_v25  ;;  %v425_v28 = vadd.f32 %v769_v20, %v424_v26  ;;  %v620_v29 = vpop.f32.mrb[2].mxu0  ;;  %v632_v30 = vpop.f32.mrb[2].mxu1 }
  0xfc   : > { %473 = vst [vmem:[%s774_s14 + $0x10] sm:$0xff] %v385_v23  ;;  %485 = vst [vmem:[%s774_s14 + $0x70] sm:$0xff] %v433_v24  ;;  %v388_v31 = vadd.f32 %v620_v29, %v769_v20  ;;  %v436_v32 = vadd.f32 %v632_v30, %v769_v20  ;;  %v379_v33 = vpop.f32.mrb[3].mxu0  ;;  %v427_v34 = vpop.f32.mrb[3].mxu1 }
  0xfd   : > { %471 = vst [vmem:[%s774_s14] sm:$0xff] %v377_v27  ;;  %483 = vst [vmem:[%s774_s14 + $0x60] sm:$0xff] %v425_v28  ;;  %v380_v35 = vadd.f32 %v769_v20, %v379_v33  ;;  %v428_v36 = vadd.f32 %v769_v20, %v427_v34 }
  0xfe   : > { %474 = vst [vmem:[%s774_s14 + $0x18] sm:$0xff] %v388_v31  ;;  %486 = vst [vmem:[%s774_s14 + $0x78] sm:$0xff] %v436_v32 }
  0xff   : > { %472 = vst [vmem:[%s774_s14 + $0x8] sm:$0xff] %v380_v35  ;;  %484 = vst [vmem:[%s774_s14 + $0x68] sm:$0xff] %v428_v36 }
 0x101   : > { %v623_v37 = vpop.f32.mrb[4].mxu0  ;;  %v635_v38 = vpop.f32.mrb[4].mxu1 }
 0x102   : > { %v401_v39 = vadd.f32 %v623_v37, %v769_v20  ;;  %v449_v40 = vadd.f32 %v635_v38, %v769_v20  ;;  %v392_v41 = vpop.f32.mrb[5].mxu0  ;;  %v440_v42 = vpop.f32.mrb[5].mxu1 }
 0x103   : > { %v393_v43 = vadd.f32 %v769_v20, %v392_v41  ;;  %v441_v44 = vadd.f32 %v769_v20, %v440_v42  ;;  %v624_v45 = vpop.f32.mrb[6].mxu0  ;;  %v636_v46 = vpop.f32.mrb[6].mxu1 }
 0x104   : > { %477 = vst [vmem:[%s774_s14 + $0x30] sm:$0xff] %v401_v39  ;;  %489 = vst [vmem:[%s774_s14 + $0x90] sm:$0xff] %v449_v40  ;;  %v404_v47 = vadd.f32 %v624_v45, %v769_v20  ;;  %v452_v48 = vadd.f32 %v636_v46, %v769_v20  ;;  %v395_v49 = vpop.f32.mrb[7].mxu0  ;;  %v443_v50 = vpop.f32.mrb[7].mxu1 }
 0x105   : > { %475 = vst [vmem:[%s774_s14 + $0x20] sm:$0xff] %v393_v43  ;;  %487 = vst [vmem:[%s774_s14 + $0x80] sm:$0xff] %v441_v44  ;;  %v396_v51 = vadd.f32 %v769_v20, %v395_v49  ;;  %v444_v52 = vadd.f32 %v769_v20, %v443_v50 }
 0x106   : > { %478 = vst [vmem:[%s774_s14 + $0x38] sm:$0xff] %v404_v47  ;;  %490 = vst [vmem:[%s774_s14 + $0x98] sm:$0xff] %v452_v48 }
 0x107   : > { %476 = vst [vmem:[%s774_s14 + $0x28] sm:$0xff] %v396_v51  ;;  %488 = vst [vmem:[%s774_s14 + $0x88] sm:$0xff] %v444_v52 }
 0x109   : > { %v627_v53 = vpop.f32.mrb[8].mxu0  ;;  %v639_v54 = vpop.f32.mrb[8].mxu1 }
 0x10a   : > { %v417_v55 = vadd.f32 %v627_v53, %v769_v20  ;;  %v465_v56 = vadd.f32 %v639_v54, %v769_v20  ;;  %v408_v57 = vpop.f32.mrb[9].mxu0  ;;  %v456_v58 = vpop.f32.mrb[9].mxu1 }
 0x10b   : > { %v409_v59 = vadd.f32 %v769_v20, %v408_v57  ;;  %v457_v60 = vadd.f32 %v769_v20, %v456_v58  ;;  %v628_v61 = vpop.f32.mrb[10].mxu0  ;;  %v640_v62 = vpop.f32.mrb[10].mxu1 }
 0x10c   : > { %481 = vst [vmem:[%s774_s14 + $0x50] sm:$0xff] %v417_v55  ;;  %493 = vst [vmem:[%s774_s14 + $0xb0] sm:$0xff] %v465_v56  ;;  %v420_v63 = vadd.f32 %v628_v61, %v769_v20  ;;  %v468_v0 = vadd.f32 %v640_v62, %v769_v20  ;;  %v411_v1 = vpop.f32.mrb[11].mxu0  ;;  %v459_v2 = vpop.f32.mrb[11].mxu1 }
 0x10d   : > { %479 = vst [vmem:[%s774_s14 + $0x40] sm:$0xff] %v409_v59  ;;  %491 = vst [vmem:[%s774_s14 + $0xa0] sm:$0xff] %v457_v60  ;;  %v412_v3 = vadd.f32 %v769_v20, %v411_v1  ;;  %v460_v4 = vadd.f32 %v769_v20, %v459_v2 }
 0x10e   : > { %482 = vst [vmem:[%s774_s14 + $0x58] sm:$0xff] %v420_v63  ;;  %494 = vst [vmem:[%s774_s14 + $0xb8] sm:$0xff] %v468_v0 }
 0x10f   : > { %480 = vst [vmem:[%s774_s14 + $0x48] sm:$0xff] %v412_v3  ;;  %492 = vst [vmem:[%s774_s14 + $0xa8] sm:$0xff] %v460_v4 }
 0x110 PF: > { %s13_s12 = sadd.s32 1, %s691_s12  }
 0x111   : > { %p10_p4 = scmp.ge.s32.totalorder %s13_s12, 4  }
 0x113   :  { %12 = sbr.rel (!%p10_p4) target bundleno = 1 (0x1), region = 62 }

// kernel: motioncost_forward.7
= control target key start
LH: loop header
LB: loop body
LE: loop exit
PB: predicated region body
PF: predicated region fallthrough
CT: control target
= control target key end

     0   :  { %s1306_s12 = smov 0   ;;  %s1519_s0 = inlined_call_operand.vmem [shape: bf16[384,384], index: 0, kind: input, shape index: {}]   ;;  %s1520_s1 = inlined_call_operand.vmem [shape: bf16[384,128], index: 1, kind: input, shape index: {}]   ;;  %s1521_s2 = inlined_call_operand.vmem [shape: f32[1,128], index: 2, kind: input, shape index: {}]   ;;  %s1522_s3 = inlined_call_operand.vmem [shape: f32[384,128], index: 3, kind: output, shape index: {}]  }
   0x1 LB: > { %s979_s13 = sadd.s32 4294967295, %s1284_s12   ;;  %p983_p0 = scmp.ge.s32.totalorder %s1284_s12, 1  ;;  %s1284_s12 = sphi %s1306_s12, %s13_s12  }
   0x2   : > { %p139_p1 = scmp.lt.s32.totalorder %s1284_s12, 3 }
   0x4   : > { %p140_p2 = pnand %p983_p0, %p139_p1 }
   0x5   : > { %v1206_v0 = vld [vmem:[%s1520_s1 + $0x40] sm:$0xff] (!%p140_p2)   ;;  %v1208_v2 = vld [vmem:[%s1520_s1 + $0x48] sm:$0xff] (!%p140_p2)   ;;  %v1211_v5 = vld [vmem:[%s1520_s1 + $0x50] sm:$0xff] (!%p140_p2)   ;;  %s164_s26 = smul.u32 (!%p140_p2), 24, %s979_s13 }
   0x6   : > { %143 = sbr.rel (%p140_p2) target bundleno = 350 (0x15e), region = 32  ;;  %v1207_v1 = vld [vmem:[%s1520_s1] sm:$0xff] (!%p140_p2)   ;;  %1049 = vmatprep.subr.bf16.mxu0 (!%p140_p2), %v1206_v0  ;;  %v1210_v4 = vld [vmem:[%s1520_s1 + $0x8] sm:$0xff] (!%p140_p2)   ;;  %v1213_v7 = vld [vmem:[%s1520_s1 + $0x10] sm:$0xff] (!%p140_p2)  }
   0x7   : > { %1050 = vmatpush3.bf16.msra.mxu0 (!%p140_p2), %v1207_v1  ;;  %v1209_v3 = vld [vmem:[%s1520_s1 + $0x80] sm:$0xff] (!%p140_p2)   ;;  %v1212_v6 = vld [vmem:[%s1520_s1 + $0x88] sm:$0xff] (!%p140_p2)   ;;  %v1214_v8 = vld [vmem:[%s1520_s1 + $0x58] sm:$0xff] (!%p140_p2)   ;;  %p165_p3 = scmp.lt.s32.totalorder (!%p140_p2), %s164_s26, 47 }
   0x8   : > { %1051 = vmatprep.subr.bf16.mxu0 (!%p140_p2), %v1208_v2  ;;  %1157 = vmatprep.subr.bf16.mxu1 (!%p140_p2), %v1209_v3  ;;  %v1215_v9 = vld [vmem:[%s1520_s1 + $0x90] sm:$0xff] (!%p140_p2)   ;;  %v1216_v10 = vld [vmem:[%s1520_s1 + $0x18] sm:$0xff] (!%p140_p2)   ;;  %v1217_v11 = vld [vmem:[%s1520_s1 + $0x60] sm:$0xff] (!%p140_p2)  }
   0x9   : > { %1158 = vmatpush3.bf16.msra.mxu1 (!%p140_p2), %v1209_v3  ;;  %v1218_v12 = vld [vmem:[%s1520_s1 + $0x98] sm:$0xff] (!%p140_p2)   ;;  %v1219_v13 = vld [vmem:[%s1520_s1 + $0x20] sm:$0xff] (!%p140_p2)   ;;  %v1220_v15 = vld [vmem:[%s1520_s1 + $0x68] sm:$0xff] (!%p140_p2)  }
   0xa   : > { %1159 = vmatprep.subr.bf16.mxu1 (!%p140_p2), %v1212_v6  ;;  %v1221_v14 = vld [vmem:[%s1520_s1 + $0xa0] sm:$0xff] (!%p140_p2)   ;;  %v1222_v16 = vld [vmem:[%s1520_s1 + $0x28] sm:$0xff] (!%p140_p2)   ;;  %v1223_v18 = vld [vmem:[%s1520_s1 + $0x70] sm:$0xff] (!%p140_p2)  }
   0xb   : > { %1052 = vmatpush3.bf16.msra.mxu0 (!%p140_p2), %v1210_v4  ;;  %v1224_v17 = vld [vmem:[%s1520_s1 + $0xa8] sm:$0xff] (!%p140_p2)   ;;  %v1225_v19 = vld [vmem:[%s1520_s1 + $0x30] sm:$0xff] (!%p140_p2)   ;;  %v1226_v20 = vld [vmem:[%s1520_s1 + $0x78] sm:$0xff] (!%p140_p2)  }
   0xc   : > { %1053 = vmatprep.subr.bf16.mxu0 (!%p140_p2), %v1211_v5  ;;  %v1227_v21 = vld [vmem:[%s1520_s1 + $0xb0] sm:$0xff] (!%p140_p2)   ;;  %v1228_v23 = vld [vmem:[%s1520_s1 + $0x38] sm:$0xff] (!%p140_p2)   ;;  %v1433_v62 = vld [vmem:[%s1521_s2] ss:$0 sm:$0xff] (!%p140_p2) }
   0xd   : > { %1160 = vmatpush3.bf16.msra.mxu1 %v1212_v6  ;;  %s1524_s26 = smov (!%p165_p3, %s164_s26), 47  ;;  %v1232_v25 = vld [vmem:[%s1520_s1 + $0xb8] sm:$0xff]  }
   0xe   : > { %1161 = vmatprep.subr.bf16.mxu1 %v1215_v9  ;;  %s1197_s21 = smul.u32 12, %s1524_s26  ;;  %s985_s18 = sshll.u32 %s1524_s26, 3 }
   0xf   : > { %1054 = vmatpush3.bf16.msra.mxu0 %v1213_v7 }
  0x10   : > { %1055 = vmatprep.subr.bf16.mxu0 %v1214_v8  ;;  %s1380_s6 = scalar_lea.vmem %s1519_s0, %s1197_s21  ;;  %s1441_s21 = scalar_lea.vmem %s1522_s3, %s985_s18 }
  0x11   : > { %1162 = vmatpush3.bf16.msra.mxu1 %v1215_v9  ;;  %v1231_v22 = vld [vmem:[%s1380_s6 + $0x4] ss:$12 sps:$4 sm:$0xff]   ;;  %v1233_v24 = vld [vmem:[%s1380_s6 + $0x8] ss:$12 sps:$4 sm:$0xff]   ;;  %v1229_v26 = vld [vmem:[%s1380_s6] ss:$12 sps:$4 sm:$0xff]  }
  0x12   : > { %1163 = vmatprep.subr.bf16.mxu1 %v1218_v12  ;;  %649 = vmatprep.mubr.bf16.mxu0 %v1231_v22  ;;  %v1235_v27 = vld [vmem:[%s1380_s6 + $0x1c] ss:$12 sps:$4 sm:$0xff]   ;;  %v1234_v28 = vld [vmem:[%s1380_s6 + $0x20] ss:$12 sps:$4 sm:$0xff]   ;;  %v1241_v29 = vld [vmem:[%s1380_s6 + $0x38] ss:$12 sps:$4 sm:$0xff]  }
  0x13   : > { %1056 = vmatpush3.bf16.msra.mxu0 %v1216_v10  ;;  %1173 = vmatprep.mubr.bf16.mxu1 %v1233_v24  ;;  %v1237_v30 = vld [vmem:[%s1380_s6 + $0x18] ss:$12 sps:$4 sm:$0xff]   ;;  %v1238_v31 = vld [vmem:[%s1380_s6 + $0x34] ss:$12 sps:$4 sm:$0xff]   ;;  %v1242_v32 = vld [vmem:[%s1380_s6 + $0x50] ss:$12 sps:$4 sm:$0xff]  }
  0x14   : > { %1057 = vmatprep.subr.bf16.mxu0 %v1217_v11  ;;  %v1249_v33 = vld [vmem:[%s1380_s6 + $0x68] ss:$12 sps:$4 sm:$0xff]   ;;  %v1240_v34 = vld [vmem:[%s1380_s6 + $0x30] ss:$12 sps:$4 sm:$0xff]   ;;  %v1243_v35 = vld [vmem:[%s1380_s6 + $0x4c] ss:$12 sps:$4 sm:$0xff]  }
  0x15   : > { %1164 = vmatpush3.bf16.msra.mxu1 %v1218_v12  ;;  %v1250_v36 = vld [vmem:[%s1380_s6 + $0x80] ss:$12 sps:$4 sm:$0xff]   ;;  %v1257_v37 = vld [vmem:[%s1380_s6 + $0x98] ss:$12 sps:$4 sm:$0xff]   ;;  %v1245_v38 = vld [vmem:[%s1380_s6 + $0x48] ss:$12 sps:$4 sm:$0xff]  }
  0x16   : > { %1165 = vmatprep.subr.bf16.mxu1 %v1221_v14  ;;  %v1246_v39 = vld [vmem:[%s1380_s6 + $0x64] ss:$12 sps:$4 sm:$0xff]   ;;  %v1265_v41 = vld [vmem:[%s1380_s6 + $0xc8] ss:$12 sps:$4 sm:$0xff]   ;;  %v1248_v42 = vld [vmem:[%s1380_s6 + $0x60] ss:$12 sps:$4 sm:$0xff]  }
  0x17   : > { %1058 = vmatpush3.bf16.msra.mxu0 %v1219_v13  ;;  %v1258_v40 = vld [vmem:[%s1380_s6 + $0xb0] ss:$12 sps:$4 sm:$0xff]   ;;  %v1266_v44 = vld [vmem:[%s1380_s6 + $0xe0] ss:$12 sps:$4 sm:$0xff]   ;;  %v1273_v45 = vld [vmem:[%s1380_s6 + $0xf8] ss:$12 sps:$4 sm:$0xff]  }
  0x18   : > { %1059 = vmatprep.subr.bf16.mxu0 %v1220_v15  ;;  %v1251_v43 = vld [vmem:[%s1380_s6 + $0x7c] ss:$12 sps:$4 sm:$0xff]   ;;  %v1253_v46 = vld [vmem:[%s1380_s6 + $0x78] ss:$12 sps:$4 sm:$0xff]   ;;  %v1254_v47 = vld [vmem:[%s1380_s6 + $0x94] ss:$12 sps:$4 sm:$0xff]  }
  0x19   : > { %1166 = vmatpush3.bf16.msra.mxu1 %v1221_v14  ;;  %v1274_v48 = vld [vmem:[%s1380_s6 + $0x110] ss:$12 sps:$4 sm:$0xff]   ;;  %v1259_v50 = vld [vmem:[%s1380_s6 + $0xac] ss:$12 sps:$4 sm:$0xff]   ;;  %v1261_v51 = vld [vmem:[%s1380_s6 + $0xa8] ss:$12 sps:$4 sm:$0xff]  }
  0x1a   : > { %1167 = vmatprep.subr.bf16.mxu1 %v1224_v17  ;;  %v1256_v49 = vld [vmem:[%s1380_s6 + $0x90] ss:$12 sps:$4 sm:$0xff]   ;;  %v1264_v53 = vld [vmem:[%s1380_s6 + $0xc0] ss:$12 sps:$4 sm:$0xff]   ;;  %v1269_v55 = vld [vmem:[%s1380_s6 + $0xd8] ss:$12 sps:$4 sm:$0xff]  }
  0x1b   : > { %1060 = vmatpush3.bf16.msra.mxu0 %v1222_v16  ;;  %v1262_v52 = vld [vmem:[%s1380_s6 + $0xc4] ss:$12 sps:$4 sm:$0xff]   ;;  %v1267_v54 = vld [vmem:[%s1380_s6 + $0xdc] ss:$12 sps:$4 sm:$0xff]   ;;  %v1270_v56 = vld [vmem:[%s1380_s6 + $0xf4] ss:$12 sps:$4 sm:$0xff]  }
  0x1c   : > { %1061 = vmatprep.subr.bf16.mxu0 %v1223_v18  ;;  %v1272_v57 = vld [vmem:[%s1380_s6 + $0xf0] ss:$12 sps:$4 sm:$0xff]   ;;  %v1275_v58 = vld [vmem:[%s1380_s6 + $0x10c] ss:$12 sps:$4 sm:$0xff]   ;;  %v1277_v59 = vld [vmem:[%s1380_s6 + $0x108] ss:$12 sps:$4 sm:$0xff]  }
  0x1d   : > { %1168 = vmatpush3.bf16.msra.mxu1 %v1224_v17 }
  0x1e   : > { %1169 = vmatprep.subr.bf16.mxu1 %v1227_v21 }
  0x1f   : > { %1062 = vmatpush3.bf16.msra.mxu0 %v1225_v19 }
  0x20   : > { %1063 = vmatprep.subr.bf16.mxu0 %v1226_v20 }
  0x21   : > { %1170 = vmatpush3.bf16.msra.mxu1 %v1227_v21 }
  0x22   : > { %1171 = vmatprep.subr.bf16.mxu1 %v1232_v25 }
  0x23   : > { %1064 = vmatpush3.bf16.msra.mxu0 %v1228_v23 }
  0x25   : > { %1172 = vmatpush3.bf16.msra.mxu1 %v1232_v25 }
  0x26   : > { %650 = vmatmul.mubr.bf16.vlgmr.msra.gmra.mrb[0].mxu0 %v1229_v26 }
  0x27   : > { %657 = vmatprep.mubr.bf16.mxu0 %v1235_v27 }
  0x28   : > { %1174 = vmatmul.mubr.bf16.vlgmr.msra.gmra.mrb[0].mxu1 %v1234_v28 }
  0x29   : > { %1177 = vmatprep.mubr.bf16.mxu1 %v1241_v29 }
  0x2e   : > { %658 = vmatmul.mubr.bf16.gmra.mrb[4].mxu0 %v1237_v30 }
  0x2f   : > { %665 = vmatprep.mubr.bf16.mxu0 %v1238_v31 }
  0x30   : > { %1178 = vmatmul.mubr.bf16.gmra.mrb[4].mxu1 %v1242_v32 }
  0x31   : > { %1181 = vmatprep.mubr.bf16.mxu1 %v1249_v33 }
  0x36   : > { %666 = vmatmul.mubr.bf16.gmra.mrb[8].mxu0 %v1240_v34 }
  0x37   : > { %673 = vmatprep.mubr.bf16.mxu0 %v1243_v35 }
  0x38   : > { %1182 = vmatmul.mubr.bf16.gmra.mrb[8].mxu1 %v1250_v36 }
  0x39   : > { %1185 = vmatprep.mubr.bf16.mxu1 %v1257_v37 }
  0x3e   : > { %674 = vmatmul.mubr.bf16.gmra.mrb[12].mxu0 %v1245_v38 }
  0x3f   : > { %681 = vmatprep.mubr.bf16.mxu0 %v1246_v39 }
  0x40   : > { %1186 = vmatmul.mubr.bf16.gmra.mrb[12].mxu1 %v1258_v40 }
  0x41   : > { %1189 = vmatprep.mubr.bf16.mxu1 %v1265_v41 }
  0x46   : > { %682 = vmatmul.mubr.bf16.gmra.mrb[16].mxu0 %v1248_v42 }
  0x47   : > { %689 = vmatprep.mubr.bf16.mxu0 %v1251_v43 }
  0x48   : > { %1190 = vmatmul.mubr.bf16.gmra.mrb[16].mxu1 %v1266_v44 }
  0x49   : > { %1193 = vmatprep.mubr.bf16.mxu1 %v1273_v45 }
  0x4e   : > { %690 = vmatmul.mubr.bf16.gmra.mrb[20].mxu0 %v1253_v46 }
  0x4f   : > { %697 = vmatprep.mubr.bf16.mxu0 %v1254_v47 }
  0x50   : > { %1194 = vmatmul.mubr.bf16.gmra.mrb[20].mxu1 %v1274_v48 }
  0x56   : > { %698 = vmatmul.mubr.bf16.gmra.mrb[24].mxu0 %v1256_v49 }
  0x57   : > { %705 = vmatprep.mubr.bf16.mxu0 %v1259_v50 }
  0x5e   : > { %706 = vmatmul.mubr.bf16.gmra.mrb[28].mxu0 %v1261_v51 }
  0x5f   : > { %713 = vmatprep.mubr.bf16.mxu0 %v1262_v52 }
  0x66   : > { %714 = vmatmul.mubr.bf16.gmra.mrb[32].mxu0 %v1264_v53 }
  0x67   : > { %721 = vmatprep.mubr.bf16.mxu0 %v1267_v54 }
  0x6e   : > { %722 = vmatmul.mubr.bf16.gmra.mrb[36].mxu0 %v1269_v55 }
  0x6f   : > { %729 = vmatprep.mubr.bf16.mxu0 %v1270_v56 }
  0x76   : > { %730 = vmatmul.mubr.bf16.gmra.mrb[40].mxu0 %v1272_v57 }
  0x77   : > { %737 = vmatprep.mubr.bf16.mxu0 %v1275_v58 }
  0x7e   : > { %738 = vmatmul.mubr.bf16.gmra.mrb[44].mxu0 %v1277_v59 }
  0xf9   : > { %v1065_v60 = vpop.f32.mrb[0].mxu0 }
  0xfa   : > { %v1066_v61 = vpop.f32.mrb[1].mxu0 }
  0xfb   : > { %v1067_v63 = vadd.f32 %v1066_v61, %v1065_v60  ;;  %v1068_v0 = vpop.f32.mrb[2].mxu0  ;;  %v1175_v2 = vpop.f32.mrb[0].mxu1 }
  0xfc   : > { %v1069_v1 = vpop.f32.mrb[3].mxu0  ;;  %v780_v5 = vpop.f32.mrb[1].mxu1 }
  0xfd   : > { %v1070_v3 = vadd.f32 %v1069_v1, %v1068_v0  ;;  %v652_v4 = vadd.f32 %v1067_v63, %v1433_v62  ;;  %v1176_v6 = vpop.f32.mrb[2].mxu1 }
  0xfe   : > { %v783_v9 = vpop.f32.mrb[3].mxu1 }
  0xff   : > { %v781_v7 = vadd.f32 %v780_v5, %v652_v4  ;;  %v655_v8 = vadd.f32 %v1070_v3, %v1433_v62 }
 0x101   : > { %v875_v10 = vmax.f32 %v781_v7, 0.0  ;;  %v784_v11 = vadd.f32 %v783_v9, %v655_v8  ;;  %v1071_v12 = vpop.f32.mrb[4].mxu0 }
 0x102   : > { %v1072_v13 = vpop.f32.mrb[5].mxu0 }
 0x103   : > { %899 = vst [vmem:[%s1441_s21] sm:$0xff] %v875_v10  ;;  %v876_v14 = vmax.f32 %v784_v11, 0.0  ;;  %v1073_v15 = vadd.f32 %v1072_v13, %v1071_v12  ;;  %v1074_v16 = vpop.f32.mrb[6].mxu0  ;;  %v1179_v18 = vpop.f32.mrb[4].mxu1 }
 0x104   : > { %v1075_v17 = vpop.f32.mrb[7].mxu0  ;;  %v796_v21 = vpop.f32.mrb[5].mxu1 }
 0x105   : > { %900 = vst [vmem:[%s1441_s21 + $0x8] sm:$0xff] %v876_v14  ;;  %v660_v19 = vadd.f32 %v1073_v15, %v1433_v62  ;;  %v1076_v20 = vadd.f32 %v1075_v17, %v1074_v16  ;;  %v1180_v22 = vpop.f32.mrb[6].mxu1 }
 0x106   : > { %v799_v25 = vpop.f32.mrb[7].mxu1 }
 0x107   : > { %v789_v23 = vadd.f32 %v1175_v2, %v660_v19  ;;  %v663_v24 = vadd.f32 %v1076_v20, %v1433_v62 }
 0x109   : > { %v877_v26 = vmax.f32 %v789_v23, 0.0  ;;  %v792_v27 = vadd.f32 %v1176_v6, %v663_v24  ;;  %v1077_v28 = vpop.f32.mrb[8].mxu0 }
 0x10a   : > { %v1078_v29 = vpop.f32.mrb[9].mxu0 }
 0x10b   : > { %901 = vst [vmem:[%s1441_s21 + $0x10] sm:$0xff] %v877_v26  ;;  %v878_v30 = vmax.f32 %v792_v27, 0.0  ;;  %v1079_v31 = vadd.f32 %v1078_v29, %v1077_v28  ;;  %v1080_v32 = vpop.f32.mrb[10].mxu0  ;;  %v1183_v34 = vpop.f32.mrb[8].mxu1 }
 0x10c   : > { %v1081_v33 = vpop.f32.mrb[11].mxu0  ;;  %v812_v37 = vpop.f32.mrb[9].mxu1 }
 0x10d   : > { %902 = vst [vmem:[%s1441_s21 + $0x18] sm:$0xff] %v878_v30  ;;  %v1082_v35 = vadd.f32 %v1081_v33, %v1080_v32  ;;  %v668_v36 = vadd.f32 %v1079_v31, %v1433_v62  ;;  %v1184_v38 = vpop.f32.mrb[10].mxu1 }
 0x10e   : > { %v815_v41 = vpop.f32.mrb[11].mxu1 }
 0x10f   : > { %v797_v39 = vadd.f32 %v796_v21, %v668_v36  ;;  %v671_v40 = vadd.f32 %v1082_v35, %v1433_v62 }
 0x111   : > { %v879_v42 = vmax.f32 %v797_v39, 0.0  ;;  %v800_v43 = vadd.f32 %v799_v25, %v671_v40  ;;  %v1083_v44 = vpop.f32.mrb[12].mxu0 }
 0x112   : > { %v1084_v45 = vpop.f32.mrb[13].mxu0 }
 0x113   : > { %903 = vst [vmem:[%s1441_s21 + $0x20] sm:$0xff] %v879_v42  ;;  %v880_v46 = vmax.f32 %v800_v43, 0.0  ;;  %v1085_v47 = vadd.f32 %v1084_v45, %v1083_v44  ;;  %v1086_v48 = vpop.f32.mrb[14].mxu0  ;;  %v1452_v50 = vpop.f32.mrb[12].mxu1 }
 0x114   : > { %v1087_v49 = vpop.f32.mrb[15].mxu0  ;;  %v828_v53 = vpop.f32.mrb[13].mxu1 }
 0x115   : > { %904 = vst [vmem:[%s1441_s21 + $0x28] sm:$0xff] %v880_v46  ;;  %v676_v51 = vadd.f32 %v1085_v47, %v1433_v62  ;;  %v1088_v52 = vadd.f32 %v1087_v49, %v1086_v48  ;;  %v1456_v54 = vpop.f32.mrb[14].mxu1 }
 0x116   : > { %v831_v57 = vpop.f32.mrb[15].mxu1 }
 0x117   : > { %v805_v55 = vadd.f32 %v1179_v18, %v676_v51  ;;  %v679_v56 = vadd.f32 %v1088_v52, %v1433_v62 }
 0x119   : > { %v881_v58 = vmax.f32 %v805_v55, 0.0  ;;  %v808_v59 = vadd.f32 %v1180_v22, %v679_v56  ;;  %v1089_v60 = vpop.f32.mrb[16].mxu0 }
 0x11a   : > { %v1090_v61 = vpop.f32.mrb[17].mxu0 }
 0x11b   : > { %905 = vst [vmem:[%s1441_s21 + $0x30] sm:$0xff] %v881_v58  ;;  %v882_v63 = vmax.f32 %v808_v59, 0.0  ;;  %v1091_v0 = vadd.f32 %v1090_v61, %v1089_v60  ;;  %v1092_v1 = vpop.f32.mrb[18].mxu0  ;;  %v1460_v3 = vpop.f32.mrb[16].mxu1 }
 0x11c   : > { %v1093_v2 = vpop.f32.mrb[19].mxu0  ;;  %v1464_v6 = vpop.f32.mrb[17].mxu1 }
 0x11d   : > { %906 = vst [vmem:[%s1441_s21 + $0x38] sm:$0xff] %v882_v63  ;;  %v1094_v4 = vadd.f32 %v1093_v2, %v1092_v1  ;;  %v684_v5 = vadd.f32 %v1091_v0, %v1433_v62  ;;  %v1466_v7 = vpop.f32.mrb[18].mxu1 }
 0x11e   : > { %v847_v10 = vpop.f32.mrb[19].mxu1 }
 0x11f   : > { %v813_v8 = vadd.f32 %v812_v37, %v684_v5  ;;  %v687_v9 = vadd.f32 %v1094_v4, %v1433_v62 }
 0x121   : > { %v883_v11 = vmax.f32 %v813_v8, 0.0  ;;  %v816_v12 = vadd.f32 %v815_v41, %v687_v9  ;;  %v1095_v13 = vpop.f32.mrb[20].mxu0 }
 0x122   : > { %v1096_v14 = vpop.f32.mrb[21].mxu0 }
 0x123   : > { %907 = vst [vmem:[%s1441_s21 + $0x40] sm:$0xff] %v883_v11  ;;  %v884_v15 = vmax.f32 %v816_v12, 0.0  ;;  %v1097_v16 = vadd.f32 %v1096_v14, %v1095_v13  ;;  %v1098_v17 = vpop.f32.mrb[22].mxu0  ;;  %v1470_v19 = vpop.f32.mrb[20].mxu1 }
 0x124   : > { %v1099_v18 = vpop.f32.mrb[23].mxu0  ;;  %v1474_v22 = vpop.f32.mrb[21].mxu1 }
 0x125   : > { %908 = vst [vmem:[%s1441_s21 + $0x48] sm:$0xff] %v884_v15  ;;  %v692_v20 = vadd.f32 %v1097_v16, %v1433_v62  ;;  %v1100_v21 = vadd.f32 %v1099_v18, %v1098_v17  ;;  %v1476_v23 = vpop.f32.mrb[22].mxu1 }
 0x126   : > { %v1479_v26 = vpop.f32.mrb[23].mxu1 }
 0x127   : > { %v821_v24 = vadd.f32 %v1183_v34, %v692_v20  ;;  %v695_v25 = vadd.f32 %v1100_v21, %v1433_v62 }
 0x129   : > { %v885_v27 = vmax.f32 %v821_v24, 0.0  ;;  %v824_v28 = vadd.f32 %v1184_v38, %v695_v25  ;;  %v1101_v29 = vpop.f32.mrb[24].mxu0 }
 0x12a   : > { %v1102_v30 = vpop.f32.mrb[25].mxu0 }
 0x12b   : > { %909 = vst [vmem:[%s1441_s21 + $0x50] sm:$0xff] %v885_v27  ;;  %v886_v31 = vmax.f32 %v824_v28, 0.0  ;;  %v1103_v32 = vadd.f32 %v1102_v30, %v1101_v29  ;;  %v1104_v33 = vpop.f32.mrb[26].mxu0 }
 0x12c   : > { %v1105_v35 = vpop.f32.mrb[27].mxu0 }
 0x12d   : > { %910 = vst [vmem:[%s1441_s21 + $0x58] sm:$0xff] %v886_v31  ;;  %v1106_v36 = vadd.f32 %v1105_v35, %v1104_v33  ;;  %v700_v37 = vadd.f32 %v1103_v32, %v1433_v62 }
 0x12f   : > { %v829_v34 = vadd.f32 %v828_v53, %v700_v37  ;;  %v703_v39 = vadd.f32 %v1106_v36, %v1433_v62 }
 0x131   : > { %v887_v40 = vmax.f32 %v829_v34, 0.0  ;;  %v832_v41 = vadd.f32 %v831_v57, %v703_v39  ;;  %v1107_v42 = vpop.f32.mrb[28].mxu0 }
 0x132   : > { %v1108_v38 = vpop.f32.mrb[29].mxu0 }
 0x133   : > { %911 = vst [vmem:[%s1441_s21 + $0x60] sm:$0xff] %v887_v40  ;;  %v888_v43 = vmax.f32 %v832_v41, 0.0  ;;  %v1109_v44 = vadd.f32 %v1108_v38, %v1107_v42  ;;  %v1110_v45 = vpop.f32.mrb[30].mxu0 }
 0x134   : > { %v1111_v46 = vpop.f32.mrb[31].mxu0 }
 0x135   : > { %912 = vst [vmem:[%s1441_s21 + $0x68] sm:$0xff] %v888_v43  ;;  %v708_v47 = vadd.f32 %v1109_v44, %v1433_v62  ;;  %v1112_v48 = vadd.f32 %v1111_v46, %v1110_v45 }
 0x137   : > { %v837_v49 = vadd.f32 %v1452_v50, %v708_v47  ;;  %v711_v51 = vadd.f32 %v1112_v48, %v1433_v62 }
 0x139   : > { %v889_v52 = vmax.f32 %v837_v49, 0.0  ;;  %v840_v53 = vadd.f32 %v1456_v54, %v711_v51  ;;  %v1113_v55 = vpop.f32.mrb[32].mxu0 }
 0x13a   : > { %v1114_v56 = vpop.f32.mrb[33].mxu0 }
 0x13b   : > { %913 = vst [vmem:[%s1441_s21 + $0x70] sm:$0xff] %v889_v52  ;;  %v890_v57 = vmax.f32 %v840_v53, 0.0  ;;  %v1115_v58 = vadd.f32 %v1114_v56, %v1113_v55  ;;  %v1116_v59 = vpop.f32.mrb[34].mxu0 }
 0x13c   : > { %v1117_v60 = vpop.f32.mrb[35].mxu0 }
 0x13d   : > { %914 = vst [vmem:[%s1441_s21 + $0x78] sm:$0xff] %v890_v57  ;;  %v1118_v61 = vadd.f32 %v1117_v60, %v1116_v59  ;;  %v716_v63 = vadd.f32 %v1115_v58, %v1433_v62 }
 0x13f   : > { %v845_v50 = vadd.f32 %v1464_v6, %v716_v63  ;;  %v719_v0 = vadd.f32 %v1118_v61, %v1433_v62 }
 0x141   : > { %v891_v1 = vmax.f32 %v845_v50, 0.0  ;;  %v848_v2 = vadd.f32 %v847_v10, %v719_v0  ;;  %v1119_v54 = vpop.f32.mrb[36].mxu0 }
 0x142   : > { %v1120_v4 = vpop.f32.mrb[37].mxu0 }
 0x143   : > { %915 = vst [vmem:[%s1441_s21 + $0x80] sm:$0xff] %v891_v1  ;;  %v892_v5 = vmax.f32 %v848_v2, 0.0  ;;  %v1121_v8 = vadd.f32 %v1120_v4, %v1119_v54  ;;  %v1122_v9 = vpop.f32.mrb[38].mxu0 }
 0x144   : > { %v1123_v11 = vpop.f32.mrb[39].mxu0 }
 0x145   : > { %916 = vst [vmem:[%s1441_s21 + $0x88] sm:$0xff] %v892_v5  ;;  %v724_v12 = vadd.f32 %v1121_v8, %v1433_v62  ;;  %v1124_v13 = vadd.f32 %v1123_v11, %v1122_v9 }
 0x147   : > { %v853_v14 = vadd.f32 %v1460_v3, %v724_v12  ;;  %v727_v6 = vadd.f32 %v1124_v13, %v1433_v62 }
 0x149   : > { %v893_v15 = vmax.f32 %v853_v14, 0.0  ;;  %v856_v10 = vadd.f32 %v1466_v7, %v727_v6  ;;  %v1125_v16 = vpop.f32.mrb[40].mxu0 }
 0x14a   : > { %v1126_v17 = vpop.f32.mrb[41].mxu0 }
 0x14b   : > { %917 = vst [vmem:[%s1441_s21 + $0x90] sm:$0xff] %v893_v15  ;;  %v894_v18 = vmax.f32 %v856_v10, 0.0  ;;  %v1127_v20 = vadd.f32 %v1126_v17, %v1125_v16  ;;  %v1128_v21 = vpop.f32.mrb[42].mxu0 }
 0x14c   : > { %v1129_v24 = vpop.f32.mrb[43].mxu0 }
 0x14d   : > { %918 = vst [vmem:[%s1441_s21 + $0x98] sm:$0xff] %v894_v18  ;;  %v1130_v25 = vadd.f32 %v1129_v24, %v1128_v21  ;;  %v732_v27 = vadd.f32 %v1127_v20, %v1433_v62 }
 0x14f   : > { %v861_v3 = vadd.f32 %v1474_v22, %v732_v27  ;;  %v735_v28 = vadd.f32 %v1130_v25, %v1433_v62 }
 0x151   : > { %v895_v29 = vmax.f32 %v861_v3, 0.0  ;;  %v864_v7 = vadd.f32 %v1479_v26, %v735_v28  ;;  %v1131_v30 = vpop.f32.mrb[44].mxu0 }
 0x152   : > { %v1132_v31 = vpop.f32.mrb[45].mxu0 }
 0x153   : > { %919 = vst [vmem:[%s1441_s21 + $0xa0] sm:$0xff] %v895_v29  ;;  %v896_v32 = vmax.f32 %v864_v7, 0.0  ;;  %v1133_v33 = vadd.f32 %v1132_v31, %v1131_v30  ;;  %v1134_v35 = vpop.f32.mrb[46].mxu0 }
 0x154   : > { %v1135_v36 = vpop.f32.mrb[47].mxu0 }
 0x155   : > { %920 = vst [vmem:[%s1441_s21 + $0xa8] sm:$0xff] %v896_v32  ;;  %v740_v37 = vadd.f32 %v1133_v33, %v1433_v62  ;;  %v1136_v34 = vadd.f32 %v1135_v36, %v1134_v35 }
 0x157   : > { %v869_v22 = vadd.f32 %v1470_v19, %v740_v37  ;;  %v743_v39 = vadd.f32 %v1136_v34, %v1433_v62 }
 0x159   : > { %v897_v40 = vmax.f32 %v869_v22, 0.0  ;;  %v872_v41 = vadd.f32 %v1476_v23, %v743_v39 }
 0x15b   : > { %921 = vst [vmem:[%s1441_s21 + $0xb0] sm:$0xff] %v897_v40  ;;  %v898_v26 = vmax.f32 %v872_v41, 0.0 }
 0x15d   : > { %922 = vst [vmem:[%s1441_s21 + $0xb8] sm:$0xff] %v898_v26 }
 0x15e PF: > { %s13_s12 = sadd.s32 1, %s1284_s12  }
 0x15f   : > { %p10_p4 = scmp.ge.s32.totalorder %s13_s12, 4  }
 0x161   :  { %12 = sbr.rel (!%p10_p4) target bundleno = 1 (0x1), region = 62 }

// kernel: motioncost_forward.8
= control target key start
LH: loop header
LB: loop body
LE: loop exit
PB: predicated region body
PF: predicated region fallthrough
CT: control target
= control target key end

     0   :  { %s1272_s1 = inlined_call_operand.vmem [shape: bf16[896,128], index: 1, kind: input, shape index: {}]   ;;  %s1273_s0 = inlined_call_operand.vmem [shape: bf16[32,896], index: 0, kind: input, shape index: {}]   ;;  %s1274_s2 = inlined_call_operand.vmem [shape: f32[1,128], index: 2, kind: input, shape index: {}]   ;;  %s1275_s3 = inlined_call_operand.vmem [shape: f32[32,128], index: 3, kind: output, shape index: {}]  }
   0x1   :  { %v951_v0 = vld [vmem:[%s1272_s1 + $0x40] sm:$0xff]   ;;  %v955_v4 = vld [vmem:[%s1272_s1 + $0x48] sm:$0xff]   ;;  %v959_v8 = vld [vmem:[%s1272_s1 + $0x50] sm:$0xff]  }
   0x2   :  { %v952_v1 = vld [vmem:[%s1272_s1] sm:$0xff]   ;;  %837 = vmatprep.subr.bf16.mxu0 %v951_v0  ;;  %v956_v5 = vld [vmem:[%s1272_s1 + $0x8] sm:$0xff]   ;;  %v960_v9 = vld [vmem:[%s1272_s1 + $0x10] sm:$0xff]  }
   0x3   :  { %v953_v2 = vld [vmem:[%s1272_s1 + $0xc0] sm:$0xff]   ;;  %838 = vmatpush3.bf16.msra.mxu0 %v952_v1  ;;  %v957_v6 = vld [vmem:[%s1272_s1 + $0xc8] sm:$0xff]   ;;  %v961_v10 = vld [vmem:[%s1272_s1 + $0xd0] sm:$0xff]  }
   0x4   :  { %v954_v3 = vld [vmem:[%s1272_s1 + $0x80] sm:$0xff]   ;;  %865 = vmatprep.subr.bf16.mxu1 %v953_v2  ;;  %839 = vmatprep.subr.bf16.mxu0 %v955_v4  ;;  %v958_v7 = vld [vmem:[%s1272_s1 + $0x88] sm:$0xff]   ;;  %v962_v11 = vld [vmem:[%s1272_s1 + $0x90] sm:$0xff]  }
   0x5   :  { %866 = vmatpush3.bf16.msra.mxu1 %v954_v3  ;;  %v963_v12 = vld [vmem:[%s1272_s1 + $0x58] sm:$0xff]   ;;  %v967_v16 = vld [vmem:[%s1272_s1 + $0x60] sm:$0xff]   ;;  %v971_v20 = vld [vmem:[%s1272_s1 + $0x68] sm:$0xff]  }
   0x6   :  { %867 = vmatprep.subr.bf16.mxu1 %v957_v6  ;;  %v964_v13 = vld [vmem:[%s1272_s1 + $0x18] sm:$0xff]   ;;  %v968_v17 = vld [vmem:[%s1272_s1 + $0x20] sm:$0xff]   ;;  %v972_v21 = vld [vmem:[%s1272_s1 + $0x28] sm:$0xff]  }
   0x7   :  { %840 = vmatpush3.bf16.msra.mxu0 %v956_v5  ;;  %v965_v14 = vld [vmem:[%s1272_s1 + $0xd8] sm:$0xff]   ;;  %v969_v18 = vld [vmem:[%s1272_s1 + $0xe0] sm:$0xff]   ;;  %v973_v22 = vld [vmem:[%s1272_s1 + $0xe8] sm:$0xff]  }
   0x8   :  { %841 = vmatprep.subr.bf16.mxu0 %v959_v8  ;;  %v966_v15 = vld [vmem:[%s1272_s1 + $0x98] sm:$0xff]   ;;  %v970_v19 = vld [vmem:[%s1272_s1 + $0xa0] sm:$0xff]   ;;  %v974_v23 = vld [vmem:[%s1272_s1 + $0xa8] sm:$0xff]  }
   0x9   :  { %868 = vmatpush3.bf16.msra.mxu1 %v958_v7  ;;  %v975_v24 = vld [vmem:[%s1272_s1 + $0x70] sm:$0xff]   ;;  %v979_v28 = vld [vmem:[%s1272_s1 + $0x78] sm:$0xff]   ;;  %v984_v32 = vld [vmem:[%s1273_s0 + $0x4] ss:$28 sps:$4 sm:$0xff]  }
   0xa   :  { %869 = vmatprep.subr.bf16.mxu1 %v961_v10  ;;  %v976_v25 = vld [vmem:[%s1272_s1 + $0x30] sm:$0xff]   ;;  %v980_v29 = vld [vmem:[%s1272_s1 + $0x38] sm:$0xff]   ;;  %590 = vmatprep.mubr.bf16.mxu0 %v984_v32  ;;  %v986_v34 = vld [vmem:[%s1272_s1 + $0x140] sm:$0xff]  }
   0xb   :  { %842 = vmatpush3.bf16.msra.mxu0 %v960_v9  ;;  %v977_v26 = vld [vmem:[%s1272_s1 + $0xf0] sm:$0xff]   ;;  %v981_v30 = vld [vmem:[%s1272_s1 + $0xf8] sm:$0xff]   ;;  %v987_v35 = vld [vmem:[%s1273_s0 + $0x8] ss:$28 sps:$4 sm:$0xff]  }
   0xc   :  { %843 = vmatprep.subr.bf16.mxu0 %v963_v12  ;;  %v978_v27 = vld [vmem:[%s1272_s1 + $0xb0] sm:$0xff]   ;;  %v982_v31 = vld [vmem:[%s1273_s0] ss:$28 sps:$4 sm:$0xff]   ;;  %v989_v36 = vld [vmem:[%s1273_s0 + $0xc] ss:$28 sps:$4 sm:$0xff]  }
   0xd   :  { %870 = vmatpush3.bf16.msra.mxu1 %v962_v11  ;;  %v985_v33 = vld [vmem:[%s1272_s1 + $0xb8] sm:$0xff]   ;;  %v990_v37 = vld [vmem:[%s1272_s1 + $0x100] sm:$0xff]   ;;  %639 = vmatprep.mubr.bf16.mxu1 %v989_v36  ;;  %v991_v38 = vld [vmem:[%s1272_s1 + $0x148] sm:$0xff]  }
   0xe   :  { %871 = vmatprep.subr.bf16.mxu1 %v965_v14  ;;  %v992_v39 = vld [vmem:[%s1272_s1 + $0x180] sm:$0xff]   ;;  %v993_v40 = vld [vmem:[%s1272_s1 + $0x108] sm:$0xff]   ;;  %v994_v41 = vld [vmem:[%s1272_s1 + $0x150] sm:$0xff]  }
   0xf   :  { %844 = vmatpush3.bf16.msra.mxu0 %v964_v13  ;;  %v995_v42 = vld [vmem:[%s1272_s1 + $0x188] sm:$0xff]   ;;  %v996_v43 = vld [vmem:[%s1272_s1 + $0x110] sm:$0xff]   ;;  %v997_v44 = vld [vmem:[%s1272_s1 + $0x158] sm:$0xff]  }
  0x10   :  { %845 = vmatprep.subr.bf16.mxu0 %v967_v16  ;;  %v998_v45 = vld [vmem:[%s1272_s1 + $0x190] sm:$0xff]   ;;  %v999_v46 = vld [vmem:[%s1272_s1 + $0x118] sm:$0xff]   ;;  %v1000_v47 = vld [vmem:[%s1272_s1 + $0x160] sm:$0xff]  }
  0x11   :  { %872 = vmatpush3.bf16.msra.mxu1 %v966_v15  ;;  %v1001_v48 = vld [vmem:[%s1272_s1 + $0x198] sm:$0xff]   ;;  %v1002_v49 = vld [vmem:[%s1272_s1 + $0x120] sm:$0xff]   ;;  %v1005_v51 = vld [vmem:[%s1272_s1 + $0x168] sm:$0xff]  }
  0x12   :  { %873 = vmatprep.subr.bf16.mxu1 %v969_v18  ;;  %v1003_v50 = vld [vmem:[%s1273_s0 + $0x3c] ss:$28 sps:$4 sm:$0xff]   ;;  %v1006_v52 = vld [vmem:[%s1272_s1 + $0x1a0] sm:$0xff]   ;;  %v1008_v54 = vld [vmem:[%s1272_s1 + $0x128] sm:$0xff]  }
  0x13   :  { %846 = vmatpush3.bf16.msra.mxu0 %v968_v17  ;;  %v1007_v53 = vld [vmem:[%s1273_s0 + $0x38] ss:$28 sps:$4 sm:$0xff]   ;;  %v1009_v55 = vld [vmem:[%s1273_s0 + $0x44] ss:$28 sps:$4 sm:$0xff]   ;;  %v1013_v58 = vld [vmem:[%s1272_s1 + $0x1a8] sm:$0xff]  }
  0x14   :  { %847 = vmatprep.subr.bf16.mxu0 %v971_v20  ;;  %v1011_v56 = vld [vmem:[%s1273_s0 + $0x40] ss:$28 sps:$4 sm:$0xff]   ;;  %v1012_v57 = vld [vmem:[%s1272_s1 + $0x170] sm:$0xff]   ;;  %v1024_v3 = vld [vmem:[%s1273_s0 + $0x4c] ss:$28 sps:$4 sm:$0xff]  }
  0x15   :  { %874 = vmatpush3.bf16.msra.mxu1 %v970_v19  ;;  %v1014_v59 = vld [vmem:[%s1272_s1 + $0x130] sm:$0xff]   ;;  %v1015_v60 = vld [vmem:[%s1272_s1 + $0x178] sm:$0xff]   ;;  %v1026_v5 = vld [vmem:[%s1273_s0 + $0x48] ss:$28 sps:$4 sm:$0xff]  }
  0x16   :  { %875 = vmatprep.subr.bf16.mxu1 %v973_v22  ;;  %v1016_v61 = vld [vmem:[%s1272_s1 + $0x1b0] sm:$0xff]   ;;  %v1017_v62 = vld [vmem:[%s1272_s1 + $0x138] sm:$0xff]   ;;  %v766_v7 = vld [vmem:[%s1274_s2] ss:$0 sm:$0xff] }
  0x17   :  { %848 = vmatpush3.bf16.msra.mxu0 %v972_v21  ;;  %v1020_v63 = vld [vmem:[%s1273_s0 + $0x14] ss:$28 sps:$4 sm:$0xff]   ;;  %v1021_v0 = vld [vmem:[%s1272_s1 + $0x1b8] sm:$0xff]  }
  0x18   :  { %849 = vmatprep.subr.bf16.mxu0 %v975_v24  ;;  %v1022_v1 = vld [vmem:[%s1273_s0 + $0x18] ss:$28 sps:$4 sm:$0xff]   ;;  %v1018_v2 = vld [vmem:[%s1273_s0 + $0x10] ss:$28 sps:$4 sm:$0xff]  }
  0x19   :  { %876 = vmatpush3.bf16.msra.mxu1 %v974_v23  ;;  %v1023_v4 = vld [vmem:[%s1273_s0 + $0x50] ss:$28 sps:$4 sm:$0xff]  }
  0x1a   :  { %877 = vmatprep.subr.bf16.mxu1 %v977_v26 }
  0x1b   :  { %850 = vmatpush3.bf16.msra.mxu0 %v976_v25 }
  0x1c   :  { %851 = vmatprep.subr.bf16.mxu0 %v979_v28 }
  0x1d   :  { %878 = vmatpush3.bf16.msra.mxu1 %v978_v27 }
  0x1e   :  { %879 = vmatprep.subr.bf16.mxu1 %v981_v30 }
  0x1f   :  { %852 = vmatpush3.bf16.msra.mxu0 %v980_v29 }
  0x20   :  { %893 = vmatprep.subr.bf16.mxu0 %v986_v34 }
  0x21   :  { %880 = vmatpush3.bf16.msra.mxu1 %v985_v33 }
  0x22   :  { %591 = vmatmul.mubr.bf16.vlgmr.msra.gmra.mrb[0].mxu0 %v982_v31  ;;  %931 = vmatprep.subr.bf16.mxu1 %v992_v39 }
  0x23   :  { %894 = vmatpush3.bf16.msra.mxu0 %v990_v37  ;;  %598 = vmatprep.mubr.bf16.mxu0 %v1003_v50 }
  0x24   :  { %640 = vmatmul.mubr.bf16.vlgmr.msra.gmra.mrb[0].mxu1 %v987_v35  ;;  %895 = vmatprep.subr.bf16.mxu0 %v991_v38 }
  0x25   :  { %932 = vmatpush3.bf16.msra.mxu1 %v992_v39  ;;  %647 = vmatprep.mubr.bf16.mxu1 %v1009_v55 }
  0x26   :  { %933 = vmatprep.subr.bf16.mxu1 %v995_v42 }
  0x27   :  { %896 = vmatpush3.bf16.msra.mxu0 %v993_v40 }
  0x28   :  { %897 = vmatprep.subr.bf16.mxu0 %v994_v41 }
  0x29   :  { %934 = vmatpush3.bf16.msra.mxu1 %v995_v42 }
  0x2a   :  { %935 = vmatprep.subr.bf16.mxu1 %v998_v45  ;;  %599 = vmatmul.mubr.bf16.gmra.mrb[4].mxu0 %v1007_v53 }
  0x2b   :  { %898 = vmatpush3.bf16.msra.mxu0 %v996_v43  ;;  %688 = vmatprep.mubr.bf16.mxu0 %v1020_v63 }
  0x2c   :  { %899 = vmatprep.subr.bf16.mxu0 %v997_v44  ;;  %648 = vmatmul.mubr.bf16.gmra.mrb[4].mxu1 %v1011_v56 }
  0x2d   :  { %936 = vmatpush3.bf16.msra.mxu1 %v998_v45  ;;  %947 = vmatprep.mubr.bf16.mxu1 %v1022_v1 }
  0x2e   :  { %937 = vmatprep.subr.bf16.mxu1 %v1001_v48 }
  0x2f   :  { %900 = vmatpush3.bf16.msra.mxu0 %v999_v46 }
  0x30   :  { %901 = vmatprep.subr.bf16.mxu0 %v1000_v47 }
  0x31   :  { %938 = vmatpush3.bf16.msra.mxu1 %v1001_v48 }
  0x32   :  { %939 = vmatprep.subr.bf16.mxu1 %v1006_v52 }
  0x33   :  { %902 = vmatpush3.bf16.msra.mxu0 %v1002_v49 }
  0x34   :  { %903 = vmatprep.subr.bf16.mxu0 %v1005_v51 }
  0x35   :  { %940 = vmatpush3.bf16.msra.mxu1 %v1006_v52 }
  0x36   :  { %941 = vmatprep.subr.bf16.mxu1 %v1013_v58 }
  0x37   :  { %904 = vmatpush3.bf16.msra.mxu0 %v1008_v54 }
  0x38   :  { %905 = vmatprep.subr.bf16.mxu0 %v1012_v57 }
  0x39   :  { %942 = vmatpush3.bf16.msra.mxu1 %v1013_v58 }
  0x3a   :  { %943 = vmatprep.subr.bf16.mxu1 %v1016_v61 }
  0x3b   :  { %906 = vmatpush3.bf16.msra.mxu0 %v1014_v59 }
  0x3c   :  { %907 = vmatprep.subr.bf16.mxu0 %v1015_v60 }
  0x3d   :  { %944 = vmatpush3.bf16.msra.mxu1 %v1016_v61 }
  0x3e   :  { %945 = vmatprep.subr.bf16.mxu1 %v1021_v0 }
  0x3f   :  { %908 = vmatpush3.bf16.msra.mxu0 %v1017_v62 }
  0x41   :  { %946 = vmatpush3.bf16.msra.mxu1 %v1021_v0 }
  0x42   :  { %689 = vmatmul.mubr.bf16.vlgmr.msra.gmra.mrb[8].mxu0 %v1018_v2 }
  0x43   :  { %696 = vmatprep.mubr.bf16.mxu0 %v1024_v3 }
  0x44   :  { %948 = vmatmul.mubr.bf16.vlgmr.msra.gmra.mrb[8].mxu1 %v1023_v4 }
  0x4a   :  { %697 = vmatmul.mubr.bf16.gmra.mrb[12].mxu0 %v1026_v5 }
  0xf5   :  { %v853_v6 = vpop.f32.mrb[0].mxu0 }
  0xf6   :  { %v854_v8 = vpop.f32.mrb[1].mxu0 }
  0xf7   :  { %v855_v9 = vadd.f32 %v854_v8, %v853_v6  ;;  %v856_v10 = vpop.f32.mrb[2].mxu0  ;;  %v881_v11 = vpop.f32.mrb[0].mxu1 }
  0xf8   :  { %v857_v12 = vpop.f32.mrb[3].mxu0  ;;  %v882_v15 = vpop.f32.mrb[1].mxu1 }
  0xf9   :  { %v593_v13 = vadd.f32 %v855_v9, %v766_v7  ;;  %v858_v14 = vadd.f32 %v857_v12, %v856_v10  ;;  %v883_v16 = vadd.f32 %v882_v15, %v881_v11  ;;  %v884_v17 = vpop.f32.mrb[2].mxu1 }
  0xfa   :  { %v885_v19 = vpop.f32.mrb[3].mxu1 }
  0xfb   :  { %v596_v18 = vadd.f32 %v858_v14, %v766_v7  ;;  %v642_v20 = vadd.f32 %v883_v16, %v593_v13  ;;  %v886_v21 = vadd.f32 %v885_v19, %v884_v17 }
  0xfd   :  { %v645_v22 = vadd.f32 %v886_v21, %v596_v18  ;;  %v859_v23 = vpop.f32.mrb[4].mxu0 }
  0xfe   :  { %v860_v24 = vpop.f32.mrb[5].mxu0 }
  0xff   :  { %v861_v25 = vadd.f32 %v860_v24, %v859_v23  ;;  %v862_v26 = vpop.f32.mrb[6].mxu0  ;;  %v887_v27 = vpop.f32.mrb[4].mxu1 }
 0x100   :  { %v863_v28 = vpop.f32.mrb[7].mxu0  ;;  %v888_v31 = vpop.f32.mrb[5].mxu1 }
 0x101   :  { %v601_v29 = vadd.f32 %v861_v25, %v766_v7  ;;  %v864_v30 = vadd.f32 %v863_v28, %v862_v26  ;;  %v889_v32 = vadd.f32 %v888_v31, %v887_v27  ;;  %v890_v33 = vpop.f32.mrb[6].mxu1 }
 0x102   :  { %v891_v35 = vpop.f32.mrb[7].mxu1 }
 0x103   :  { %v604_v34 = vadd.f32 %v864_v30, %v766_v7  ;;  %v650_v36 = vadd.f32 %v889_v32, %v601_v29  ;;  %v892_v37 = vadd.f32 %v891_v35, %v890_v33 }
 0x105   :  { %v653_v38 = vadd.f32 %v892_v37, %v604_v34 }
 0x115   :  { %v909_v39 = vpop.f32.mrb[8].mxu0 }
 0x116   :  { %v910_v40 = vpop.f32.mrb[9].mxu0 }
 0x117   :  { %v911_v41 = vadd.f32 %v910_v40, %v909_v39  ;;  %v912_v42 = vpop.f32.mrb[10].mxu0  ;;  %v949_v44 = vpop.f32.mrb[8].mxu1 }
 0x118   :  { %v913_v43 = vpop.f32.mrb[11].mxu0  ;;  %v739_v47 = vpop.f32.mrb[9].mxu1 }
 0x119   :  { %v914_v45 = vadd.f32 %v913_v43, %v912_v42  ;;  %v691_v46 = vadd.f32 %v911_v41, %v642_v20  ;;  %v950_v48 = vpop.f32.mrb[10].mxu1 }
 0x11a   :  { %v742_v51 = vpop.f32.mrb[11].mxu1 }
 0x11b   :  { %v740_v49 = vadd.f32 %v739_v47, %v691_v46  ;;  %v694_v50 = vadd.f32 %v914_v45, %v645_v22 }
 0x11d   :  { %v754_v52 = vmax.f32 %v740_v49, 0.0  ;;  %v743_v53 = vadd.f32 %v742_v51, %v694_v50  ;;  %v915_v54 = vpop.f32.mrb[12].mxu0 }
 0x11e   :  { %v916_v55 = vpop.f32.mrb[13].mxu0 }
 0x11f   :  { %758 = vst [vmem:[%s1275_s3] sm:$0xff] %v754_v52  ;;  %v755_v56 = vmax.f32 %v743_v53, 0.0  ;;  %v917_v57 = vadd.f32 %v916_v55, %v915_v54  ;;  %v918_v58 = vpop.f32.mrb[14].mxu0 }
 0x120   :  { %v919_v59 = vpop.f32.mrb[15].mxu0 }
 0x121   :  { %759 = vst [vmem:[%s1275_s3 + $0x8] sm:$0xff] %v755_v56  ;;  %v699_v60 = vadd.f32 %v917_v57, %v650_v36  ;;  %v920_v61 = vadd.f32 %v919_v59, %v918_v58 }
 0x123   :  { %v748_v62 = vadd.f32 %v949_v44, %v699_v60  ;;  %v702_v63 = vadd.f32 %v920_v61, %v653_v38 }
 0x125   :  { %v756_v0 = vmax.f32 %v748_v62, 0.0  ;;  %v751_v1 = vadd.f32 %v950_v48, %v702_v63 }
 0x127   :  { %760 = vst [vmem:[%s1275_s3 + $0x10] sm:$0xff] %v756_v0  ;;  %v757_v2 = vmax.f32 %v751_v1, 0.0 }
 0x129   :  { %761 = vst [vmem:[%s1275_s3 + $0x18] sm:$0xff] %v757_v2 }

// kernel: motioncost_forward.9
= control target key start
LH: loop header
LB: loop body
LE: loop exit
PB: predicated region body
PF: predicated region fallthrough
CT: control target
= control target key end

     0   :  { %s941_s1 = inlined_call_operand.vmem [shape: bf16[640,128], index: 1, kind: input, shape index: {}]   ;;  %s942_s0 = inlined_call_operand.vmem [shape: bf16[32,640], index: 0, kind: input, shape index: {}]   ;;  %s943_s2 = inlined_call_operand.vmem [shape: f32[1,128], index: 2, kind: input, shape index: {}]   ;;  %s944_s3 = inlined_call_operand.vmem [shape: f32[32,128], index: 3, kind: output, shape index: {}]  }
   0x1   :  { %v702_v0 = vld [vmem:[%s941_s1 + $0x40] sm:$0xff]   ;;  %v706_v4 = vld [vmem:[%s941_s1 + $0x48] sm:$0xff]   ;;  %v710_v8 = vld [vmem:[%s941_s1 + $0x50] sm:$0xff]  }
   0x2   :  { %v703_v1 = vld [vmem:[%s941_s1] sm:$0xff]   ;;  %616 = vmatprep.subr.bf16.mxu0 %v702_v0  ;;  %v707_v5 = vld [vmem:[%s941_s1 + $0x8] sm:$0xff]   ;;  %v711_v9 = vld [vmem:[%s941_s1 + $0x10] sm:$0xff]  }
   0x3   :  { %v704_v2 = vld [vmem:[%s941_s1 + $0xc0] sm:$0xff]   ;;  %617 = vmatpush3.bf16.msra.mxu0 %v703_v1  ;;  %v708_v6 = vld [vmem:[%s941_s1 + $0xc8] sm:$0xff]   ;;  %v712_v10 = vld [vmem:[%s941_s1 + $0xd0] sm:$0xff]  }
   0x4   :  { %v705_v3 = vld [vmem:[%s941_s1 + $0x80] sm:$0xff]   ;;  %644 = vmatprep.subr.bf16.mxu1 %v704_v2  ;;  %618 = vmatprep.subr.bf16.mxu0 %v706_v4  ;;  %v709_v7 = vld [vmem:[%s941_s1 + $0x88] sm:$0xff]   ;;  %v713_v11 = vld [vmem:[%s941_s1 + $0x90] sm:$0xff]  }
   0x5   :  { %645 = vmatpush3.bf16.msra.mxu1 %v705_v3  ;;  %v714_v12 = vld [vmem:[%s941_s1 + $0x58] sm:$0xff]   ;;  %v718_v16 = vld [vmem:[%s941_s1 + $0x60] sm:$0xff]   ;;  %v722_v20 = vld [vmem:[%s941_s1 + $0x68] sm:$0xff]  }
   0x6   :  { %646 = vmatprep.subr.bf16.mxu1 %v708_v6  ;;  %v715_v13 = vld [vmem:[%s941_s1 + $0x18] sm:$0xff]   ;;  %v719_v17 = vld [vmem:[%s941_s1 + $0x20] sm:$0xff]   ;;  %v723_v21 = vld [vmem:[%s941_s1 + $0x28] sm:$0xff]  }
   0x7   :  { %619 = vmatpush3.bf16.msra.mxu0 %v707_v5  ;;  %v716_v14 = vld [vmem:[%s941_s1 + $0xd8] sm:$0xff]   ;;  %v720_v18 = vld [vmem:[%s941_s1 + $0xe0] sm:$0xff]   ;;  %v724_v22 = vld [vmem:[%s941_s1 + $0xe8] sm:$0xff]  }
   0x8   :  { %620 = vmatprep.subr.bf16.mxu0 %v710_v8  ;;  %v717_v15 = vld [vmem:[%s941_s1 + $0x98] sm:$0xff]   ;;  %v721_v19 = vld [vmem:[%s941_s1 + $0xa0] sm:$0xff]   ;;  %v725_v23 = vld [vmem:[%s941_s1 + $0xa8] sm:$0xff]  }
   0x9   :  { %647 = vmatpush3.bf16.msra.mxu1 %v709_v7  ;;  %v726_v24 = vld [vmem:[%s941_s1 + $0x70] sm:$0xff]   ;;  %v730_v28 = vld [vmem:[%s941_s1 + $0x78] sm:$0xff]   ;;  %v737_v34 = vld [vmem:[%s941_s1 + $0x100] sm:$0xff]  }
   0xa   :  { %648 = vmatprep.subr.bf16.mxu1 %v712_v10  ;;  %v727_v25 = vld [vmem:[%s941_s1 + $0x30] sm:$0xff]   ;;  %v731_v29 = vld [vmem:[%s941_s1 + $0x38] sm:$0xff]   ;;  %v740_v36 = vld [vmem:[%s942_s0 + $0xc] ss:$20 sps:$4 sm:$0xff]  }
   0xb   :  { %621 = vmatpush3.bf16.msra.mxu0 %v711_v9  ;;  %v728_v26 = vld [vmem:[%s941_s1 + $0xf0] sm:$0xff]   ;;  %v732_v30 = vld [vmem:[%s941_s1 + $0xf8] sm:$0xff]   ;;  %v741_v37 = vld [vmem:[%s941_s1 + $0x108] sm:$0xff]   ;;  %487 = vmatprep.mubr.bf16.mxu1 %v740_v36 }
   0xc   :  { %622 = vmatprep.subr.bf16.mxu0 %v714_v12  ;;  %v729_v27 = vld [vmem:[%s941_s1 + $0xb0] sm:$0xff]   ;;  %v735_v32 = vld [vmem:[%s942_s0 + $0x4] ss:$20 sps:$4 sm:$0xff]   ;;  %v738_v35 = vld [vmem:[%s942_s0 + $0x8] ss:$20 sps:$4 sm:$0xff]  }
   0xd   :  { %649 = vmatpush3.bf16.msra.mxu1 %v713_v11  ;;  %v733_v31 = vld [vmem:[%s942_s0] ss:$20 sps:$4 sm:$0xff]   ;;  %v736_v33 = vld [vmem:[%s941_s1 + $0xb8] sm:$0xff]   ;;  %438 = vmatprep.mubr.bf16.mxu0 %v735_v32  ;;  %v751_v43 = vld [vmem:[%s942_s0 + $0x30] ss:$20 sps:$4 sm:$0xff]  }
   0xe   :  { %650 = vmatprep.subr.bf16.mxu1 %v716_v14  ;;  %v742_v38 = vld [vmem:[%s941_s1 + $0x110] sm:$0xff]   ;;  %v745_v39 = vld [vmem:[%s942_s0 + $0x2c] ss:$20 sps:$4 sm:$0xff]   ;;  %v743_v40 = vld [vmem:[%s941_s1 + $0x118] sm:$0xff]  }
   0xf   :  { %623 = vmatpush3.bf16.msra.mxu0 %v715_v13  ;;  %v748_v41 = vld [vmem:[%s942_s0 + $0x28] ss:$20 sps:$4 sm:$0xff]   ;;  %v744_v44 = vld [vmem:[%s941_s1 + $0x120] sm:$0xff]   ;;  %v752_v47 = vld [vmem:[%s941_s1 + $0x130] sm:$0xff]  }
  0x10   :  { %624 = vmatprep.subr.bf16.mxu0 %v718_v16  ;;  %v749_v42 = vld [vmem:[%s942_s0 + $0x34] ss:$20 sps:$4 sm:$0xff]   ;;  %v754_v45 = vld [vmem:[%s942_s0 + $0x10] ss:$20 sps:$4 sm:$0xff]   ;;  %v753_v48 = vld [vmem:[%s941_s1 + $0x138] sm:$0xff]  }
  0x11   :  { %651 = vmatpush3.bf16.msra.mxu1 %v717_v15  ;;  %v747_v46 = vld [vmem:[%s941_s1 + $0x128] sm:$0xff]   ;;  %v565_v51 = vld [vmem:[%s943_s2] ss:$0 sm:$0xff] }
  0x12   :  { %652 = vmatprep.subr.bf16.mxu1 %v720_v18  ;;  %v755_v49 = vld [vmem:[%s942_s0 + $0x38] ss:$20 sps:$4 sm:$0xff]  }
  0x13   :  { %625 = vmatpush3.bf16.msra.mxu0 %v719_v17 }
  0x14   :  { %626 = vmatprep.subr.bf16.mxu0 %v722_v20 }
  0x15   :  { %653 = vmatpush3.bf16.msra.mxu1 %v721_v19 }
  0x16   :  { %654 = vmatprep.subr.bf16.mxu1 %v724_v22 }
  0x17   :  { %627 = vmatpush3.bf16.msra.mxu0 %v723_v21 }
  0x18   :  { %628 = vmatprep.subr.bf16.mxu0 %v726_v24 }
  0x19   :  { %655 = vmatpush3.bf16.msra.mxu1 %v725_v23 }
  0x1a   :  { %656 = vmatprep.subr.bf16.mxu1 %v728_v26 }
  0x1b   :  { %629 = vmatpush3.bf16.msra.mxu0 %v727_v25 }
  0x1c   :  { %630 = vmatprep.subr.bf16.mxu0 %v730_v28 }
  0x1d   :  { %657 = vmatpush3.bf16.msra.mxu1 %v729_v27 }
  0x1e   :  { %658 = vmatprep.subr.bf16.mxu1 %v732_v30 }
  0x1f   :  { %631 = vmatpush3.bf16.msra.mxu0 %v731_v29 }
  0x20   :  { %682 = vmatprep.subr.bf16.mxu0 %v737_v34 }
  0x21   :  { %659 = vmatpush3.bf16.msra.mxu1 %v736_v33 }
  0x22   :  { %439 = vmatmul.mubr.bf16.vlgmr.msra.gmra.mrb[0].mxu0 %v733_v31 }
  0x23   :  { %683 = vmatpush3.bf16.msra.mxu0 %v737_v34  ;;  %446 = vmatprep.mubr.bf16.mxu0 %v745_v39 }
  0x24   :  { %488 = vmatmul.mubr.bf16.vlgmr.msra.gmra.mrb[0].mxu1 %v738_v35  ;;  %684 = vmatprep.subr.bf16.mxu0 %v741_v37 }
  0x25   :  { %495 = vmatprep.mubr.bf16.mxu1 %v749_v42 }
  0x27   :  { %685 = vmatpush3.bf16.msra.mxu0 %v741_v37 }
  0x28   :  { %686 = vmatprep.subr.bf16.mxu0 %v742_v38 }
  0x2a   :  { %447 = vmatmul.mubr.bf16.gmra.mrb[4].mxu0 %v748_v41 }
  0x2b   :  { %687 = vmatpush3.bf16.msra.mxu0 %v742_v38  ;;  %698 = vmatprep.mubr.bf16.mxu0 %v754_v45 }
  0x2c   :  { %688 = vmatprep.subr.bf16.mxu0 %v743_v40  ;;  %496 = vmatmul.mubr.bf16.gmra.mrb[4].mxu1 %v751_v43 }
  0x2f   :  { %689 = vmatpush3.bf16.msra.mxu0 %v743_v40 }
  0x30   :  { %690 = vmatprep.subr.bf16.mxu0 %v744_v44 }
  0x33   :  { %691 = vmatpush3.bf16.msra.mxu0 %v744_v44 }
  0x34   :  { %692 = vmatprep.subr.bf16.mxu0 %v747_v46 }
  0x37   :  { %693 = vmatpush3.bf16.msra.mxu0 %v747_v46 }
  0x38   :  { %694 = vmatprep.subr.bf16.mxu0 %v752_v47 }
  0x3b   :  { %695 = vmatpush3.bf16.msra.mxu0 %v752_v47 }
  0x3c   :  { %696 = vmatprep.subr.bf16.mxu0 %v753_v48 }
  0x3f   :  { %697 = vmatpush3.bf16.msra.mxu0 %v753_v48 }
  0x42   :  { %699 = vmatmul.mubr.bf16.vlgmr.msra.gmra.mrb[8].mxu0 %v755_v49 }
  0xf5   :  { %v632_v50 = vpop.f32.mrb[0].mxu0 }
  0xf6   :  { %v633_v52 = vpop.f32.mrb[1].mxu0 }
  0xf7   :  { %v634_v53 = vadd.f32 %v633_v52, %v632_v50  ;;  %v635_v54 = vpop.f32.mrb[2].mxu0  ;;  %v660_v55 = vpop.f32.mrb[0].mxu1 }
  0xf8   :  { %v636_v56 = vpop.f32.mrb[3].mxu0  ;;  %v661_v59 = vpop.f32.mrb[1].mxu1 }
  0xf9   :  { %v441_v57 = vadd.f32 %v634_v53, %v565_v51  ;;  %v637_v58 = vadd.f32 %v636_v56, %v635_v54  ;;  %v662_v60 = vadd.f32 %v661_v59, %v660_v55  ;;  %v663_v61 = vpop.f32.mrb[2].mxu1 }
  0xfa   :  { %v664_v63 = vpop.f32.mrb[3].mxu1 }
  0xfb   :  { %v444_v62 = vadd.f32 %v637_v58, %v565_v51  ;;  %v665_v0 = vadd.f32 %v664_v63, %v663_v61  ;;  %v490_v1 = vadd.f32 %v662_v60, %v441_v57 }
  0xfd   :  { %v638_v2 = vpop.f32.mrb[4].mxu0  ;;  %v493_v4 = vadd.f32 %v665_v0, %v444_v62 }
  0xfe   :  { %v639_v3 = vpop.f32.mrb[5].mxu0 }
  0xff   :  { %v640_v5 = vadd.f32 %v639_v3, %v638_v2  ;;  %v641_v6 = vpop.f32.mrb[6].mxu0  ;;  %v666_v7 = vpop.f32.mrb[4].mxu1 }
 0x100   :  { %v642_v8 = vpop.f32.mrb[7].mxu0  ;;  %v667_v11 = vpop.f32.mrb[5].mxu1 }
 0x101   :  { %v449_v9 = vadd.f32 %v640_v5, %v565_v51  ;;  %v643_v10 = vadd.f32 %v642_v8, %v641_v6  ;;  %v668_v12 = vadd.f32 %v667_v11, %v666_v7  ;;  %v669_v13 = vpop.f32.mrb[6].mxu1 }
 0x102   :  { %v670_v15 = vpop.f32.mrb[7].mxu1 }
 0x103   :  { %v452_v14 = vadd.f32 %v643_v10, %v565_v51  ;;  %v671_v16 = vadd.f32 %v670_v15, %v669_v13  ;;  %v498_v17 = vadd.f32 %v668_v12, %v449_v9 }
 0x105   :  { %v501_v18 = vadd.f32 %v671_v16, %v452_v14 }
 0x115   :  { %v700_v19 = vpop.f32.mrb[8].mxu0 }
 0x116   :  { %v547_v20 = vadd.f32 %v700_v19, %v498_v17  ;;  %v538_v21 = vpop.f32.mrb[9].mxu0 }
 0x117   :  { %v539_v22 = vadd.f32 %v538_v21, %v490_v1  ;;  %v701_v23 = vpop.f32.mrb[10].mxu0 }
 0x118   :  { %v555_v24 = vmax.f32 %v547_v20, 0.0  ;;  %v550_v25 = vadd.f32 %v701_v23, %v501_v18  ;;  %v541_v26 = vpop.f32.mrb[11].mxu0 }
 0x119   :  { %v553_v27 = vmax.f32 %v539_v22, 0.0  ;;  %v542_v28 = vadd.f32 %v541_v26, %v493_v4 }
 0x11a   :  { %559 = vst [vmem:[%s944_s3 + $0x10] sm:$0xff] %v555_v24  ;;  %v556_v29 = vmax.f32 %v550_v25, 0.0 }
 0x11b   :  { %557 = vst [vmem:[%s944_s3] sm:$0xff] %v553_v27  ;;  %v554_v30 = vmax.f32 %v542_v28, 0.0 }
 0x11c   :  { %560 = vst [vmem:[%s944_s3 + $0x18] sm:$0xff] %v556_v29 }
 0x11d   :  { %558 = vst [vmem:[%s944_s3 + $0x8] sm:$0xff] %v554_v30 }

// kernel: motioncost_forward.10
= control target key start
LH: loop header
LB: loop body
LE: loop exit
PB: predicated region body
PF: predicated region fallthrough
CT: control target
= control target key end

     0   :  { %s275_s1 = inlined_call_operand.vmem [shape: bf16[128,128], index: 1, kind: input, shape index: {}]   ;;  %s276_s0 = inlined_call_operand.vmem [shape: bf16[32,128], index: 0, kind: input, shape index: {}]   ;;  %s277_s2 = inlined_call_operand.vmem [shape: f32[1,128], index: 2, kind: input, shape index: {}]   ;;  %s278_s3 = inlined_call_operand.vmem [shape: f32[32,128], index: 3, kind: output, shape index: {}]  }
   0x1   :  { %v200_v0 = vld [vmem:[%s275_s1] sm:$0xff]   ;;  %v201_v1 = vld [vmem:[%s275_s1 + $0x8] sm:$0xff]   ;;  %v202_v2 = vld [vmem:[%s275_s1 + $0x10] sm:$0xff]  }
   0x2   :  { %180 = vmatprep.subr.bf16.mxu0 %v200_v0  ;;  %v203_v3 = vld [vmem:[%s275_s1 + $0x18] sm:$0xff]   ;;  %v208_v4 = vld [vmem:[%s276_s0] sm:$0xff]   ;;  %v205_v6 = vld [vmem:[%s275_s1 + $0x28] sm:$0xff]  }
   0x3   :  { %181 = vmatpush3.bf16.msra.mxu0 %v200_v0  ;;  %196 = vmatprep.mubr.bf16.mxu0 %v208_v4  ;;  %v204_v5 = vld [vmem:[%s275_s1 + $0x20] sm:$0xff]   ;;  %v206_v7 = vld [vmem:[%s275_s1 + $0x30] sm:$0xff]   ;;  %v207_v8 = vld [vmem:[%s275_s1 + $0x38] sm:$0xff]  }
   0x4   :  { %182 = vmatprep.subr.bf16.mxu0 %v201_v1  ;;  %v209_v9 = vld [vmem:[%s276_s0 + $0x8] sm:$0xff]   ;;  %v159_v10 = vld [vmem:[%s277_s2] ss:$0 sm:$0xff] }
   0x7   :  { %183 = vmatpush3.bf16.msra.mxu0 %v201_v1 }
   0x8   :  { %184 = vmatprep.subr.bf16.mxu0 %v202_v2 }
   0xb   :  { %185 = vmatpush3.bf16.msra.mxu0 %v202_v2 }
   0xc   :  { %186 = vmatprep.subr.bf16.mxu0 %v203_v3 }
   0xf   :  { %187 = vmatpush3.bf16.msra.mxu0 %v203_v3 }
  0x10   :  { %188 = vmatprep.subr.bf16.mxu0 %v204_v5 }
  0x13   :  { %189 = vmatpush3.bf16.msra.mxu0 %v204_v5 }
  0x14   :  { %190 = vmatprep.subr.bf16.mxu0 %v205_v6 }
  0x17   :  { %191 = vmatpush3.bf16.msra.mxu0 %v205_v6 }
  0x18   :  { %192 = vmatprep.subr.bf16.mxu0 %v206_v7 }
  0x1b   :  { %193 = vmatpush3.bf16.msra.mxu0 %v206_v7 }
  0x1c   :  { %194 = vmatprep.subr.bf16.mxu0 %v207_v8 }
  0x1f   :  { %195 = vmatpush3.bf16.msra.mxu0 %v207_v8 }
  0x22   :  { %197 = vmatmul.mubr.bf16.vlgmr.msra.gmra.mrb[0].mxu0 %v209_v9 }
  0xf5   :  { %v198_v11 = vpop.f32.mrb[0].mxu0 }
  0xf6   :  { %v145_v12 = vadd.f32 %v198_v11, %v159_v10  ;;  %v136_v13 = vpop.f32.mrb[1].mxu0 }
  0xf7   :  { %v137_v14 = vadd.f32 %v159_v10, %v136_v13  ;;  %v199_v15 = vpop.f32.mrb[2].mxu0 }
  0xf8   :  { %153 = vst [vmem:[%s278_s3 + $0x10] sm:$0xff] %v145_v12  ;;  %v148_v16 = vadd.f32 %v199_v15, %v159_v10  ;;  %v139_v17 = vpop.f32.mrb[3].mxu0 }
  0xf9   :  { %151 = vst [vmem:[%s278_s3] sm:$0xff] %v137_v14  ;;  %v140_v18 = vadd.f32 %v159_v10, %v139_v17 }
  0xfa   :  { %154 = vst [vmem:[%s278_s3 + $0x18] sm:$0xff] %v148_v16 }
  0xfb   :  { %152 = vst [vmem:[%s278_s3 + $0x8] sm:$0xff] %v140_v18 }

// kernel: motioncost_forward.11
= control target key start
LH: loop header
LB: loop body
LE: loop exit
PB: predicated region body
PF: predicated region fallthrough
CT: control target
= control target key end

     0   :  { %14 = vsyncpa [#allocation3], 0  ;;  %vm43_vm0 = vcmask 1043456   ;;  %v3753_v1 = vmov 0.0   ;;  %vm39_vm1 = vcmask 31744   ;;  %vm3754_vm2 = vmmov 0   ;;  %s4551_s0 = inlined_call_operand.vmem [shape: f32[10,4,4], index: 0, kind: input, shape index: {}]   ;;  %s4552_s1 = inlined_call_operand.vmem [shape: f32[16,4], index: 1, kind: input, shape index: {}]   ;;  %s4553_s2 = inlined_call_operand.vmem [shape: f32[4,16], index: 2, kind: input, shape index: {}]   ;;  %s4554_s3 = inlined_call_operand.vmem [shape: f32[10,9,16], index: 3, kind: input, shape index: {}]   ;;  %s4555_s4 = inlined_call_operand.vmem [shape: f32[10,9,16], index: 4, kind: input, shape index: {}]   ;;  %s4556_s5 = inlined_call_operand.hbm [shape: f32[10,16,16], index: 5, kind: output, shape index: {0}]   ;;  %s4557_s6 = inlined_call_operand.hbm [shape: f32[1,1], index: 6, kind: output, shape index: {1}]   ;;  %s4558_s7 = inlined_call_operand.hbm [shape: f32[1,1], index: 7, kind: output, shape index: {2}]   ;;  %s4559_s8 = inlined_call_operand.vmem [shape: f32[10,9], index: 8, kind: output, shape index: {3}]  }
   0x1   :  { %v38_v0 = vld [vmem:[%s4553_s2] sm:$0xf]  ;;  %3458 = vmatprep.subr.mxu0 %v3753_v1  ;;  %3463 = vmatprep.subr.mxu1 %v3753_v1  ;;  %v27_v3 = vld [vmem:[%s4551_s0 + $0x4] sm:$0xf] }
   0x2   :  { %v26_v2 = vld [vmem:[%s4551_s0] sm:$0xf]  ;;  %3459 = vmatpush3.msk.msra.mxu0 %vm43_vm0, %v38_v0  ;;  %3460 = vmatprep.mubr.msk.f32.mxu0 %vm3754_vm2, %v3753_v1 }
   0x3   :  { %3464 = vmatpush3.msk.msra.mxu1 %vm43_vm0, %v38_v0  ;;  %3465 = vmatprep.mubr.msk.f32.mxu1 %vm3754_vm2, %v3753_v1 }
   0x4   :  { %3461 = vmatmul.mubr.msk.f32.vlgmr.msra.gmra.mrb[0].mxu0 %vm39_vm1, %v26_v2  ;;  %3466 = vmatmul.mubr.msk.f32.vlgmr.msra.gmra.mrb[0].mxu1 %vm39_vm1, %v27_v3 }
   0x5   :  { %15 = vsyncpa [#allocation5], 0  ;;  %3468 = vmatprep.subr.mxu0 %v3753_v1  ;;  %3470 = vmatprep.mubr.msk.f32.mxu0 %vm3754_vm2, %v3753_v1  ;;  %v28_v4 = vld [vmem:[%s4551_s0 + $0x8] sm:$0xf]  ;;  %v29_v5 = vld [vmem:[%s4551_s0 + $0xc] sm:$0xf] }
   0x6   :  { %3469 = vmatpush3.msk.msra.mxu0 %vm43_vm0, %v38_v0  ;;  %3473 = vmatprep.subr.mxu1 %v3753_v1  ;;  %v30_v6 = vld [vmem:[%s4551_s0 + $0x10] sm:$0xf]  ;;  %v31_v7 = vld [vmem:[%s4551_s0 + $0x14] sm:$0xf]  ;;  %v32_v8 = vld [vmem:[%s4551_s0 + $0x18] sm:$0xf] }
   0x7   :  { %3474 = vmatpush3.msk.msra.mxu1 %vm43_vm0, %v38_v0  ;;  %3475 = vmatprep.mubr.msk.f32.mxu1 %vm3754_vm2, %v3753_v1  ;;  %v33_v9 = vld [vmem:[%s4551_s0 + $0x1c] sm:$0xf]  ;;  %v34_v10 = vld [vmem:[%s4551_s0 + $0x20] sm:$0xf]  ;;  %v35_v11 = vld [vmem:[%s4551_s0 + $0x24] sm:$0xf] }
   0x8   :  { %3471 = vmatmul.mubr.msk.f32.vlgmr.msra.gmra.mrb[2].mxu0 %vm39_vm1, %v28_v4  ;;  %3476 = vmatmul.mubr.msk.f32.vlgmr.msra.gmra.mrb[2].mxu1 %vm39_vm1, %v29_v5  ;;  %v36_v12 = vld [vmem:[%s4552_s1] sm:$0xff]  ;;  %v37_v15 = vld [vmem:[%s4552_s1 + $0x8] sm:$0xff]  ;;  %vm1600_vm3 = vcmask 130048   ;;  %v2167_v35 = vld [vmem:[%s4554_s3 + $0x10] sm:$0xff]  ;;  %s3755_s10 = smov 1   ;;  %vm1641_vm4 = vcmask 1040384  }
   0x9   :  { %3478 = vmatprep.subr.mxu0 %v3753_v1  ;;  %3480 = vmatprep.mubr.msk.f32.mxu0 %vm3754_vm2, %v3753_v1  ;;  %v2165_v34 = vld [vmem:[%s4554_s3] sm:$0xff]  ;;  %v2166_v53 = vld [vmem:[%s4554_s3 + $0x8] sm:$0x1]  ;;  %v2168_v62 = vld [vmem:[%s4554_s3 + $0x18] sm:$0x1]  ;;  %vm1884_vm5 = vcmask 1046528  }
   0xa   :  { %3479 = vmatpush3.msk.msra.mxu0 %vm43_vm0, %v38_v0  ;;  %3483 = vmatprep.subr.mxu1 %v3753_v1  ;;  %v2169_v56 = vld [vmem:[%s4554_s3 + $0x20] sm:$0xff]  ;;  %vm1936_vm6 = vcmask 129024   ;;  %vm2064_vm7 = vcmask 121856   ;;  %vm3038_vm8 = vcmask 122880   ;;  %s3757_s11 = smov [#allocation2]  }
   0xb   :  { %3488 = vmatprep.subr.mxu0 %v3753_v1  ;;  %3484 = vmatpush3.msk.msra.mxu1 %vm43_vm0, %v38_v0  ;;  %s3236_s12 = sshll.u32 %s3757_s11, 4  ;;  %s3237_s12 = int_to_ptr.vmem [resolvable:$true] %s3236_s12 }
   0xc   :  { %3481 = vmatmul.mubr.msk.f32.vlgmr.msra.gmra.mrb[4].mxu0 %vm39_vm1, %v30_v6  ;;  %3485 = vmatprep.mubr.msk.f32.mxu1 %vm3754_vm2, %v3753_v1  ;;  %p3688_p1 = scmp.lt.s32.totalorder %s3237_s12, %s3237_s12 }
   0xd   :  { %3489 = vmatpush3.msk.msra.mxu0 %vm43_vm0, %v38_v0  ;;  %3490 = vmatprep.mubr.msk.f32.mxu0 %vm3754_vm2, %v3753_v1 }
   0xe   :  { %3486 = vmatmul.mubr.msk.f32.vlgmr.msra.gmra.mrb[4].mxu1 %vm39_vm1, %v31_v7  ;;  %3493 = vmatprep.subr.mxu1 %v3753_v1 }
   0xf   :  { %3494 = vmatpush3.msk.msra.mxu1 %vm43_vm0, %v38_v0  ;;  %3495 = vmatprep.mubr.msk.f32.mxu1 %vm3754_vm2, %v3753_v1 }
  0x10   :  { %3491 = vmatmul.mubr.msk.f32.vlgmr.msra.gmra.mrb[6].mxu0 %vm39_vm1, %v32_v8  ;;  %3498 = vmatprep.subr.mxu0 %v3753_v1  ;;  %v2170_v8 = vld [vmem:[%s4554_s3 + $0x28] sm:$0x1] }
  0x11   :  { %3499 = vmatpush3.msk.msra.mxu0 %vm43_vm0, %v38_v0  ;;  %3500 = vmatprep.mubr.msk.f32.mxu0 %vm3754_vm2, %v3753_v1 }
  0x12   :  { %3496 = vmatmul.mubr.msk.f32.vlgmr.msra.gmra.mrb[6].mxu1 %vm39_vm1, %v33_v9  ;;  %3503 = vmatprep.subr.mxu1 %v3753_v1 }
  0x13   :  { %3504 = vmatpush3.msk.msra.mxu1 %vm43_vm0, %v38_v0  ;;  %3505 = vmatprep.mubr.msk.f32.mxu1 %vm3754_vm2, %v3753_v1  ;;  %v2171_v1 = vld [vmem:[%s4554_s3 + $0x30] sm:$0xff] }
  0x14   :  { %3501 = vmatmul.mubr.msk.f32.vlgmr.msra.gmra.mrb[8].mxu0 %vm39_vm1, %v34_v10 }
  0x15   :  { %3510 = vmatprep.mubr.msk.f32.mxu0 %vm39_vm1, %v36_v12 }
  0x16   :  { %3506 = vmatmul.mubr.msk.f32.vlgmr.msra.gmra.mrb[8].mxu1 %vm39_vm1, %v35_v11 }
  0x17   :  { %3515 = vmatprep.mubr.msk.f32.mxu1 %vm39_vm1, %v36_v12 }
  0xd7   :  { %v113_v13 = vpop.f32.mrb[0].mxu0  ;;  %v186_v14 = vpop.f32.mrb[0].mxu1 }
  0xd8   :  { %v3462_v16 = vpop.f32.mrb[1].mxu0  ;;  %3508 = vmatprep.subr.msk.mxu0 %vm43_vm0, %v113_v13  ;;  %3513 = vmatprep.subr.msk.mxu1 %vm43_vm0, %v186_v14  ;;  %v3467_v17 = vpop.f32.mrb[1].mxu1 }
  0xd9   :  { %3509 = vmatpush3.msk.msra.mxu0 %vm43_vm0, %v113_v13  ;;  %3514 = vmatpush3.msk.msra.mxu1 %vm43_vm0, %v186_v14  ;;  %v2172_v13 = vld [vmem:[%s4554_s3 + $0x38] sm:$0x1]  ;;  %v2173_v16 = vld [vmem:[%s4554_s3 + $0x40] sm:$0xff] }
  0xda   :  { %3511 = vmatmul.mubr.msk.f32.vlgmr.msra.gmra.mrb[10].mxu0 %vm39_vm1, %v37_v15  ;;  %3516 = vmatmul.mubr.msk.f32.vlgmr.msra.gmra.mrb[10].mxu1 %vm39_vm1, %v37_v15 }
  0xdb   :  { %v259_v18 = vpop.f32.mrb[2].mxu0  ;;  %3520 = vmatprep.mubr.msk.f32.mxu0 %vm39_vm1, %v36_v12  ;;  %v332_v19 = vpop.f32.mrb[2].mxu1  ;;  %3525 = vmatprep.mubr.msk.f32.mxu1 %vm39_vm1, %v36_v12 }
  0xdc   :  { %3518 = vmatprep.subr.msk.mxu0 %vm43_vm0, %v259_v18  ;;  %3523 = vmatprep.subr.msk.mxu1 %vm43_vm0, %v332_v19  ;;  %v3472_v20 = vpop.f32.mrb[3].mxu0  ;;  %v3477_v21 = vpop.f32.mrb[3].mxu1 }
  0xdd   :  { %3519 = vmatpush3.msk.msra.mxu0 %vm43_vm0, %v259_v18  ;;  %3524 = vmatpush3.msk.msra.mxu1 %vm43_vm0, %v332_v19 }
  0xde   :  { %3521 = vmatmul.mubr.msk.f32.vlgmr.msra.gmra.mrb[12].mxu0 %vm39_vm1, %v37_v15  ;;  %3526 = vmatmul.mubr.msk.f32.vlgmr.msra.gmra.mrb[12].mxu1 %vm39_vm1, %v37_v15 }
  0xdf   :  { %v405_v22 = vpop.f32.mrb[4].mxu0  ;;  %3530 = vmatprep.mubr.msk.f32.mxu0 %vm39_vm1, %v36_v12  ;;  %3535 = vmatprep.mubr.msk.f32.mxu1 %vm39_vm1, %v36_v12 }
  0xe0   :  { %3528 = vmatprep.subr.msk.mxu0 %vm43_vm0, %v405_v22  ;;  %v3482_v23 = vpop.f32.mrb[5].mxu0 }
  0xe1   :  { %3529 = vmatpush3.msk.msra.mxu0 %vm43_vm0, %v405_v22  ;;  %v478_v24 = vpop.f32.mrb[4].mxu1 }
  0xe2   :  { %3531 = vmatmul.mubr.msk.f32.vlgmr.msra.gmra.mrb[14].mxu0 %vm39_vm1, %v37_v15  ;;  %3533 = vmatprep.subr.msk.mxu1 %vm43_vm0, %v478_v24  ;;  %v3487_v25 = vpop.f32.mrb[5].mxu1 }
  0xe3   :  { %v551_v26 = vpop.f32.mrb[6].mxu0  ;;  %3534 = vmatpush3.msk.msra.mxu1 %vm43_vm0, %v478_v24  ;;  %3540 = vmatprep.mubr.msk.f32.mxu0 %vm39_vm1, %v36_v12  ;;  %v2174_v25 = vld [vmem:[%s4554_s3 + $0x48] sm:$0x1] }
  0xe4   :  { %3538 = vmatprep.subr.msk.mxu0 %vm43_vm0, %v551_v26  ;;  %3536 = vmatmul.mubr.msk.f32.vlgmr.msra.gmra.mrb[14].mxu1 %vm39_vm1, %v37_v15  ;;  %v3492_v27 = vpop.f32.mrb[7].mxu0 }
  0xe5   :  { %3539 = vmatpush3.msk.msra.mxu0 %vm43_vm0, %v551_v26  ;;  %v624_v28 = vpop.f32.mrb[6].mxu1  ;;  %3545 = vmatprep.mubr.msk.f32.mxu1 %vm39_vm1, %v36_v12  ;;  %v2175_v26 = vld [vmem:[%s4554_s3 + $0x50] sm:$0xff] }
  0xe6   :  { %3541 = vmatmul.mubr.msk.f32.vlgmr.msra.gmra.mrb[16].mxu0 %vm39_vm1, %v37_v15  ;;  %3543 = vmatprep.subr.msk.mxu1 %vm43_vm0, %v624_v28  ;;  %v3497_v29 = vpop.f32.mrb[7].mxu1 }
  0xe7   :  { %3544 = vmatpush3.msk.msra.mxu1 %vm43_vm0, %v624_v28  ;;  %v697_v30 = vpop.f32.mrb[8].mxu0  ;;  %3550 = vmatprep.mubr.msk.f32.mxu0 %vm39_vm1, %v36_v12  ;;  %v2176_v29 = vld [vmem:[%s4554_s3 + $0x58] sm:$0x1] }
  0xe8   :  { %3546 = vmatmul.mubr.msk.f32.vlgmr.msra.gmra.mrb[16].mxu1 %vm39_vm1, %v37_v15  ;;  %3548 = vmatprep.subr.msk.mxu0 %vm43_vm0, %v697_v30  ;;  %v3502_v31 = vpop.f32.mrb[9].mxu0 }
  0xe9   :  { %3549 = vmatpush3.msk.msra.mxu0 %vm43_vm0, %v697_v30  ;;  %v770_v32 = vpop.f32.mrb[8].mxu1  ;;  %3555 = vmatprep.mubr.msk.f32.mxu1 %vm39_vm1, %v36_v12  ;;  %v2177_v30 = vld [vmem:[%s4554_s3 + $0x60] sm:$0xff] }
  0xea   :  { %3551 = vmatmul.mubr.msk.f32.vlgmr.msra.gmra.mrb[18].mxu0 %vm39_vm1, %v37_v15  ;;  %3553 = vmatprep.subr.msk.mxu1 %vm43_vm0, %v770_v32  ;;  %v3507_v33 = vpop.f32.mrb[9].mxu1 }
  0xeb   :  { %3554 = vmatpush3.msk.msra.mxu1 %vm43_vm0, %v770_v32  ;;  %3562 = vmatprep.mubr.msk.f32.mxu0 %vm1600_vm3, %v2165_v34  ;;  %v2178_v32 = vld [vmem:[%s4554_s3 + $0x68] sm:$0x1]  ;;  %v2179_v33 = vld [vmem:[%s4554_s3 + $0x70] sm:$0xff] }
  0xec   :  { %3556 = vmatmul.mubr.msk.f32.vlgmr.msra.gmra.mrb[18].mxu1 %vm39_vm1, %v37_v15 }
  0xed   :  { %3569 = vmatprep.mubr.msk.f32.mxu1 %vm1600_vm3, %v2167_v35  ;;  %v2180_v35 = vld [vmem:[%s4554_s3 + $0x78] sm:$0x1] }
 0x1ad   :  { %v3512_v36 = vpop.f32.mrb[10].mxu0  ;;  %v3517_v37 = vpop.f32.mrb[10].mxu1 }
 0x1ae   :  { %v3924_v38 = vclamps-f32 %v3512_v36, 1000.0  ;;  %v3926_v39 = vclamps-f32 %v3517_v37, 1000.0  ;;  %v849_v40 = vpop.f32.mrb[11].mxu0  ;;  %v927_v41 = vpop.f32.mrb[11].mxu1  ;;  %v2181_v36 = vld [vmem:[%s4554_s3 + $0x80] sm:$0xff]  ;;  %v2183_v37 = vld [vmem:[%s4554_s3 + $0x90] sm:$0xff] }
 0x1af   :  { %v3928_v42 = vclamps-f32 %v849_v40, 1000.0  ;;  %v3930_v43 = vclamps-f32 %v927_v41, 1000.0  ;;  %v2182_v40 = vld [vmem:[%s4554_s3 + $0x88] sm:$0x1]  ;;  %v2184_v41 = vld [vmem:[%s4554_s3 + $0x98] sm:$0x1] }
 0x1b0   :  { %1602 = vst.msk [vmem:[#allocation2 + $0x8] sm:$0xff] %vm1600_vm3, %v3924_v38  ;;  %1604 = vst.msk [vmem:[#allocation2 + $0x18] sm:$0xff] %vm1600_vm3, %v3926_v39  ;;  %s3756_s3 = smov 127  }
 0x1b1   :  { %1601 = vst.msk [vmem:[#allocation2] sm:$0xff] %vm1600_vm3, %v3928_v42  ;;  %1603 = vst.msk [vmem:[#allocation2 + $0x10] sm:$0xff] %vm1600_vm3, %v3930_v43  ;;  %1736 = vrot.lane.b32.xlu1 %v3930_v43, %s3755_s10  ;;  %1732 = vrot.lane.b32.xlu0 %v3928_v42, %s3755_s10  ;;  %v3522_v44 = vpop.f32.mrb[12].mxu0  ;;  %v3628_v45 = vpack.c.bf16 %v3924_v38, %v3928_v42  ;;  %v3527_v46 = vpop.f32.mrb[12].mxu1  ;;  %v3632_v51 = vpack.c.bf16 %v3926_v39, %v3930_v43 }
 0x1b2   :  { %v3946_v47 = vclamps-f32 %v3522_v44, 1000.0  ;;  %v1005_v48 = vpop.f32.mrb[13].mxu0  ;;  %v3948_v49 = vclamps-f32 %v3527_v46, 1000.0  ;;  %v1083_v50 = vpop.f32.mrb[13].mxu1  ;;  %v1643_v44 = vrot.slane %v3924_v38, 7 }
 0x1b3   :  { %3629 = vmatprep.subr.bf16.mxu0 %v3628_v45  ;;  %v3954_v52 = vclamps-f32 %v1005_v48, 1000.0  ;;  %3633 = vmatprep.subr.bf16.mxu1 %v3632_v51  ;;  %v3965_v54 = vclamps-f32 %v1083_v50, 1000.0  ;;  %v1646_v48 = vrot.slane %v3926_v39, 7  ;;  %v1645_v50 = vrot.slane %v3930_v43, 7 }
 0x1b4   :  { %1606 = vst.msk [vmem:[#allocation2 + $0x28] sm:$0xff] %vm1600_vm3, %v3946_v47  ;;  %1608 = vst.msk [vmem:[#allocation2 + $0x38] sm:$0xff] %vm1600_vm3, %v3948_v49  ;;  %3631 = vmatpush3.bf16.msra.mxu0 %v3628_v45  ;;  %3635 = vmatpush3.bf16.msra.mxu1 %v3632_v51  ;;  %v1642_v45 = vrot.slane %v3928_v42, 7 }
 0x1b5   :  { %1738 = vrot.lane.b32.xlu1 %v3926_v39, %s3755_s10  ;;  %1734 = vrot.lane.b32.xlu0 %v3924_v38, %s3755_s10  ;;  %v3532_v55 = vpop.f32.mrb[14].mxu0  ;;  %1605 = vst.msk [vmem:[#allocation2 + $0x20] sm:$0xff] %vm1600_vm3, %v3954_v52  ;;  %v3636_v59 = vpack.c.bf16 %v3946_v47, %v3954_v52  ;;  %1607 = vst.msk [vmem:[#allocation2 + $0x30] sm:$0xff] %vm1600_vm3, %v3965_v54  ;;  %v3640_v4 = vpack.c.bf16 %v3948_v49, %v3965_v54 }
 0x1b6   :  { %v3972_v57 = vclamps-f32 %v3532_v55, 1000.0  ;;  %v1161_v58 = vpop.f32.mrb[15].mxu0  ;;  %v1644_v46 = vsel %vm1641_vm4, %v1642_v45, %v1643_v44  ;;  %v1692_v51 = vsub.f32 %v3928_v42, %v1642_v45  ;;  %v1647_v55 = vsel %vm1641_vm4, %v1645_v50, %v1646_v48 }
 0x1b7   :  { %v3978_v60 = vclamps-f32 %v1161_v58, 1000.0  ;;  %v3537_v61 = vpop.f32.mrb[14].mxu1  ;;  %3563 = vmatmul.mubr.msk.f32.vlgmr.msra.gmra.mrb[20].mxu0 %vm1600_vm3, %v2166_v53  ;;  %3637 = vmatprep.subr.bf16.mxu0 %v3636_v59  ;;  %v1693_v53 = vsub.f32 %v3924_v38, %v1644_v46 }
 0x1b8   :  { %1610 = vst.msk [vmem:[#allocation2 + $0x48] sm:$0xff] %vm1600_vm3, %v3972_v57  ;;  %v3986_v63 = vclamps-f32 %v3537_v61, 1000.0  ;;  %v1239_v0 = vpop.f32.mrb[15].mxu1  ;;  %3576 = vmatprep.mubr.msk.f32.mxu0 %vm1600_vm3, %v2169_v56  ;;  %3639 = vmatpush3.bf16.msra.mxu0 %v3636_v59  ;;  %v1712_v56 = vand.u32 2147483647, %v1692_v51  ;;  %v1649_v59 = vrot.slane %v3946_v47, 7 }
 0x1b9   :  { %1742 = vrot.lane.b32.xlu1 %v3946_v47, %s3755_s10  ;;  %1740 = vrot.lane.b32.xlu0 %v3954_v52, %s3755_s10  ;;  %1609 = vst.msk [vmem:[#allocation2 + $0x40] sm:$0xff] %vm1600_vm3, %v3978_v60  ;;  %v3542_v2 = vpop.f32.mrb[16].mxu0  ;;  %v3998_v3 = vclamps-f32 %v1239_v0, 1000.0  ;;  %v3644_v12 = vpack.c.bf16 %v3972_v57, %v3978_v60  ;;  %v1713_v58 = vand.u32 2147483647, %v1693_v53  ;;  %v1648_v61 = vrot.slane %v3954_v52, 7 }
 0x1ba   :  { %1612 = vst.msk [vmem:[#allocation2 + $0x58] sm:$0xff] %vm1600_vm3, %v3986_v63  ;;  %v4004_v5 = vclamps-f32 %v3542_v2, 1000.0  ;;  %v1317_v6 = vpop.f32.mrb[17].mxu0  ;;  %3570 = vmatmul.mubr.msk.f32.vlgmr.msra.gmra.mrb[20].mxu1 %vm1600_vm3, %v2168_v62  ;;  %3641 = vmatprep.subr.bf16.mxu1 %v3640_v4  ;;  %v1694_v62 = vsub.f32 %v3930_v43, %v1645_v50  ;;  %v1695_v0 = vsub.f32 %v3926_v39, %v1647_v55  ;;  %v1658_v51 = vrot.slane %v3986_v63, 7 }
 0x1bb   :  { %1611 = vst.msk [vmem:[#allocation2 + $0x50] sm:$0xff] %vm1600_vm3, %v3998_v3  ;;  %v3547_v7 = vpop.f32.mrb[16].mxu1  ;;  %3583 = vmatprep.mubr.msk.f32.mxu1 %vm1600_vm3, %v2171_v1  ;;  %v4015_v9 = vclamps-f32 %v1317_v6, 1000.0  ;;  %3643 = vmatpush3.bf16.msra.mxu1 %v3640_v4  ;;  %v3648_v19 = vpack.c.bf16 %v3986_v63, %v3998_v3  ;;  %v1885_v1 = vrot.slane %v1712_v56, 1  ;;  %v1886_v2 = vrot.slane %v1713_v58, 1 }
 0x1bc   :  { %1614 = vst.msk [vmem:[#allocation2 + $0x68] sm:$0xff] %vm1600_vm3, %v4004_v5  ;;  %v4017_v10 = vclamps-f32 %v3547_v7, 1000.0  ;;  %v1395_v11 = vpop.f32.mrb[17].mxu1  ;;  %3645 = vmatprep.subr.bf16.mxu0 %v3644_v12  ;;  %3577 = vmatmul.mubr.msk.f32.vlgmr.msra.gmra.mrb[22].mxu0 %vm1600_vm3, %v2170_v8  ;;  %v1650_v4 = vsel %vm1641_vm4, %v1648_v61, %v1649_v59  ;;  %v1714_v6 = vand.u32 2147483647, %v1694_v62  ;;  %v1652_v8 = vrot.slane %v3948_v49, 7 }
 0x1bd   :  { %1746 = vrot.lane.b32.xlu1 %v3948_v49, %s3755_s10  ;;  %1744 = vrot.lane.b32.xlu0 %v3965_v54, %s3755_s10  ;;  %v4028_v14 = vclamps-f32 %v1395_v11, 1000.0  ;;  %v3552_v15 = vpop.f32.mrb[18].mxu0  ;;  %1613 = vst.msk [vmem:[#allocation2 + $0x60] sm:$0xff] %vm1600_vm3, %v4015_v9  ;;  %v3652_v20 = vpack.c.bf16 %v4004_v5, %v4015_v9  ;;  %v1715_v7 = vand.u32 2147483647, %v1695_v0  ;;  %v1651_v11 = vrot.slane %v3965_v54, 7 }
 0x1be   :  { %1616 = vst.msk [vmem:[#allocation2 + $0x78] sm:$0xff] %vm1600_vm3, %v4017_v10  ;;  %v4037_v17 = vclamps-f32 %v3552_v15, 1000.0  ;;  %v1473_v18 = vpop.f32.mrb[19].mxu0  ;;  %3647 = vmatpush3.bf16.msra.mxu0 %v3644_v12  ;;  %3584 = vmatmul.mubr.msk.f32.vlgmr.msra.gmra.mrb[22].mxu1 %vm1600_vm3, %v2172_v13  ;;  %v1887_v12 = vsel %vm1884_vm5, %v1885_v1, %v1886_v2  ;;  %v1696_v13 = vsub.f32 %v3954_v52, %v1648_v61  ;;  %v1657_v59 = vrot.slane %v3998_v3, 7 }
 0x1bf   :  { %1615 = vst.msk [vmem:[#allocation2 + $0x70] sm:$0xff] %vm1600_vm3, %v4028_v14  ;;  %v4046_v21 = vclamps-f32 %v1473_v18, 1000.0  ;;  %v3557_v22 = vpop.f32.mrb[18].mxu1  ;;  %3649 = vmatprep.subr.bf16.mxu1 %v3648_v19  ;;  %3590 = vmatprep.mubr.msk.f32.mxu0 %vm1600_vm3, %v2173_v16  ;;  %v3656_v27 = vpack.c.bf16 %v4017_v10, %v4028_v14  ;;  %v1697_v15 = vsub.f32 %v3946_v47, %v1650_v4  ;;  %v1888_v16 = vrot.slane %v1714_v6, 1 }
 0x1c0   :  { %1618 = vst.msk [vmem:[#allocation2 + $0x88] sm:$0xff] %vm1600_vm3, %v4037_v17  ;;  %v4051_v23 = vclamps-f32 %v3557_v22, 1000.0  ;;  %v1551_v24 = vpop.f32.mrb[19].mxu1  ;;  %3651 = vmatpush3.bf16.msra.mxu1 %v3648_v19  ;;  %3653 = vmatprep.subr.bf16.mxu0 %v3652_v20  ;;  %v1889_v18 = vrot.slane %v1715_v7, 1  ;;  %v1935_v19 = vsel %vm1600_vm3, %v1887_v12, 0.0  ;;  %v1937_v22 = vsel %vm1936_vm6, %v1886_v2, 0.0 }
 0x1c1   :  { %1750 = vrot.lane.b32.xlu1 %v3972_v57, %s3755_s10  ;;  %1748 = vrot.lane.b32.xlu0 %v3978_v60, %s3755_s10  ;;  %1617 = vst.msk [vmem:[#allocation2 + $0x80] sm:$0xff] %vm1600_vm3, %v4046_v21  ;;  %v4068_v28 = vclamps-f32 %v1551_v24, 1000.0  ;;  %v3660_v31 = vpack.c.bf16 %v4037_v17, %v4046_v21  ;;  %v1716_v24 = vand.u32 2147483647, %v1696_v13  ;;  %v1833_v12 = vsub.f32 %v3926_v39, %v3924_v38 }
 0x1c2   :  { %1620 = vst.msk [vmem:[#allocation2 + $0x98] sm:$0xff] %vm1600_vm3, %v4051_v23  ;;  %3591 = vmatmul.mubr.msk.f32.vlgmr.msra.gmra.mrb[24].mxu0 %vm1600_vm3, %v2174_v25  ;;  %3597 = vmatprep.mubr.msk.f32.mxu1 %vm1600_vm3, %v2175_v26  ;;  %v4157_v25 = vand.u32 2147483647, %v1697_v15  ;;  %v1698_v26 = vsub.f32 %v3965_v54, %v1651_v11  ;;  %v1941_v62 = vsel %vm1936_vm6, %v1889_v18, 0.0 }
 0x1c3   :  { %1619 = vst.msk [vmem:[#allocation2 + $0x90] sm:$0xff] %vm1600_vm3, %v4068_v28  ;;  %3655 = vmatpush3.bf16.msra.mxu0 %v3652_v20  ;;  %3657 = vmatprep.subr.bf16.mxu1 %v3656_v27  ;;  %v3664_v34 = vpack.c.bf16 %v4051_v23, %v4068_v28  ;;  %v1653_v20 = vsel %vm1641_vm4, %v1651_v11, %v1652_v8 }
 0x1c4   :  { %3598 = vmatmul.mubr.msk.f32.vlgmr.msra.gmra.mrb[24].mxu1 %vm1600_vm3, %v2176_v29  ;;  %3604 = vmatprep.mubr.msk.f32.mxu0 %vm1600_vm3, %v2177_v30  ;;  %v1890_v29 = vsel %vm1884_vm5, %v1888_v16, %v1889_v18  ;;  %v1938_v30 = vadd.f32 %v1937_v22, %v1935_v19  ;;  %v1832_v16 = vsub.f32 %v3930_v43, %v3928_v42 }
 0x1c5   :  { %1754 = vrot.lane.b32.xlu1 %v3986_v63, %s3755_s10  ;;  %1752 = vrot.lane.b32.xlu0 %v3998_v3, %s3755_s10  ;;  %v1659_v19 = vsel %vm1641_vm4, %v1657_v59, %v1658_v51 }
 0x1c6   :  { %3659 = vmatpush3.bf16.msra.mxu1 %v3656_v27  ;;  %3661 = vmatprep.subr.bf16.mxu0 %v3660_v31  ;;  %v1699_v27 = vsub.f32 %v3948_v49, %v1653_v20 }
 0x1c7   :  { %3605 = vmatmul.mubr.msk.f32.vlgmr.msra.gmra.mrb[26].mxu0 %vm1600_vm3, %v2178_v32  ;;  %3611 = vmatprep.mubr.msk.f32.mxu1 %vm1600_vm3, %v2179_v33  ;;  %v1654_v32 = vrot.slane %v3978_v60, 7  ;;  %v1891_v33 = vrot.slane %v1716_v24, 1 }
 0x1c8   :  { %3663 = vmatpush3.bf16.msra.mxu0 %v3660_v31  ;;  %3665 = vmatprep.subr.bf16.mxu1 %v3664_v34  ;;  %v1655_v31 = vrot.slane %v3972_v57, 7  ;;  %v4167_v44 = vand.u32 2147483647, %v1699_v27 }
 0x1c9   :  { %1758 = vrot.lane.b32.xlu1 %v4004_v5, %s3755_s10  ;;  %1756 = vrot.lane.b32.xlu0 %v4015_v9, %s3755_s10  ;;  %v1700_v58 = vsub.f32 %v3978_v60, %v1654_v32 }
 0x1ca   :  { %3612 = vmatmul.mubr.msk.f32.vlgmr.msra.gmra.mrb[26].mxu1 %vm1600_vm3, %v2180_v35  ;;  %3618 = vmatprep.mubr.msk.f32.mxu0 %vm1600_vm3, %v2181_v36  ;;  %v1892_v36 = vrot.slane %v4157_v25, 1  ;;  %v1656_v50 = vsel %vm1641_vm4, %v1654_v32, %v1655_v31  ;;  %v1895_v2 = vrot.slane %v4167_v44, 1  ;;  %v1660_v32 = vrot.slane %v4015_v9, 7 }
 0x1cb   :  { %3667 = vmatpush3.bf16.msra.mxu1 %v3664_v34  ;;  %3625 = vmatprep.mubr.msk.f32.mxu1 %vm1600_vm3, %v2183_v37  ;;  %v1701_v1 = vsub.f32 %v3972_v57, %v1656_v50  ;;  %v1720_v20 = vand.u32 2147483647, %v1700_v58  ;;  %v1664_v44 = vrot.slane %v4017_v10, 7 }
 0x1cc   :  { %3619 = vmatmul.mubr.msk.f32.vlgmr.msra.gmra.mrb[28].mxu0 %vm1600_vm3, %v2182_v40  ;;  %v1939_v40 = vsel %vm1600_vm3, %v1890_v29, 0.0  ;;  %v1893_v56 = vsel %vm1884_vm5, %v1891_v33, %v1892_v36  ;;  %v1702_v29 = vsub.f32 %v3998_v3, %v1657_v59  ;;  %v1661_v33 = vrot.slane %v4004_v5, 7 }
 0x1cd   :  { %1762 = vrot.lane.b32.xlu1 %v4017_v10, %s3755_s10  ;;  %1760 = vrot.lane.b32.xlu0 %v4028_v14, %s3755_s10  ;;  %v1940_v45 = vadd.f32 %v1939_v40, %v1938_v30  ;;  %v1943_v11 = vsel %vm1600_vm3, %v1893_v56, 0.0  ;;  %v4190_v22 = vand.u32 2147483647, %v1701_v1  ;;  %v1849_v40 = vand.u32 2147483647, %v1833_v12 }
 0x1ce   :  { %3626 = vmatmul.mubr.msk.f32.vlgmr.msra.gmra.mrb[28].mxu1 %vm1600_vm3, %v2184_v41  ;;  %v1718_v41 = vand.u32 2147483647, %v1698_v26  ;;  %v1722_v56 = vand.u32 2147483647, %v1702_v29  ;;  %v1837_v29 = vsub.f32 %v3948_v49, %v3946_v47 }
 0x1cf   :  { %v1942_v4 = vadd.f32 %v1941_v62, %v1940_v45  ;;  %v1898_v45 = vrot.slane %v4190_v22, 1 }
 0x1d0   :  { %v1894_v0 = vrot.slane %v1718_v41, 1  ;;  %v1897_v41 = vrot.slane %v1720_v20, 1  ;;  %v1900_v20 = vrot.slane %v1722_v56, 1 }
 0x1d1   :  { %1766 = vrot.lane.b32.xlu1 %v4037_v17, %s3755_s10  ;;  %1764 = vrot.lane.b32.xlu0 %v4046_v21, %s3755_s10  ;;  %v1944_v24 = vadd.f32 %v1943_v11, %v1942_v4  ;;  %v2118_v4 = vsel %vm1600_vm3, %v1849_v40, 0.0 }
 0x1d5   :  { %1770 = vrot.lane.b32.xlu1 %v4051_v23, %s3755_s10  ;;  %1768 = vrot.lane.b32.xlu0 %v4068_v28, %s3755_s10 }
 0x223   :  { %v1737_v34 = vpop.permute.xlu1 %1736  ;;  %v1733_v35 = vpop.permute.xlu0 %1732 }
 0x224   :  { %v1792_v37 = vsub.f32 %v3928_v42, %v1733_v35  ;;  %v1794_v46 = vsub.f32 %v3930_v43, %v1737_v34  ;;  %v1896_v42 = vsel %vm1884_vm5, %v1894_v0, %v1895_v2  ;;  %v1703_v34 = vsub.f32 %v3986_v63, %v1659_v19 }
 0x225   :  { %v1945_v35 = vsel %vm1936_vm6, %v1892_v36, 0.0  ;;  %v1835_v0 = vsub.f32 %v3946_v47, %v3926_v39 }
 0x226   :  { %v1812_v48 = vand.u32 2147483647, %v1792_v37  ;;  %v1814_v6 = vand.u32 2147483647, %v1794_v46  ;;  %v1848_v37 = vand.u32 2147483647, %v1832_v16  ;;  %v1946_v46 = vadd.f32 %v1945_v35, %v1944_v24 }
 0x227   :  { %v1739_v53 = vpop.permute.xlu1 %1738  ;;  %v1735_v55 = vpop.permute.xlu0 %1734  ;;  %v4210_v62 = vand.u32 2147483647, %v1703_v34 }
 0x228   :  { %v1793_v61 = vsub.f32 %v3924_v38, %v1735_v55  ;;  %2004 = vrot.lane.b32.xlu0 %v1812_v48, %s3756_s3  ;;  %v1795_v7 = vsub.f32 %v3926_v39, %v1739_v53  ;;  %v1834_v38 = vsub.f32 %v3954_v52, %v3930_v43  ;;  %v1947_v48 = vsel %vm1600_vm3, %v1896_v42, 0.0 }
 0x229   :  { %v2117_v1 = vsel %vm1600_vm3, %v1848_v37, 0.0  ;;  %v1663_v37 = vrot.slane %v4028_v14, 7 }
 0x22a   :  { %v1813_v8 = vand.u32 2147483647, %v1793_v61  ;;  %v1815_v25 = vand.u32 2147483647, %v1795_v7  ;;  %v1850_v55 = vand.u32 2147483647, %v1834_v38  ;;  %v1662_v61 = vsel %vm1641_vm4, %v1660_v32, %v1661_v33 }
 0x22b   :  { %v1743_v13 = vpop.permute.xlu1 %1742  ;;  %v1741_v15 = vpop.permute.xlu0 %1740  ;;  %v1948_v7 = vadd.f32 %v1947_v48, %v1946_v46  ;;  %v1705_v19 = vsub.f32 %v4004_v5, %v1662_v61  ;;  %v2119_v24 = vadd.f32 %v2118_v4, %v2117_v1  ;;  %v1706_v22 = vsub.f32 %v4028_v14, %v1663_v37 }
 0x22c   :  { %v1796_v18 = vsub.f32 %v3954_v52, %v1741_v15  ;;  %2006 = vrot.lane.b32.xlu1 %v1813_v8, %s3756_s3  ;;  %2008 = vrot.lane.b32.xlu0 %v1814_v6, %s3756_s3  ;;  %v1797_v26 = vsub.f32 %v3946_v47, %v1743_v13  ;;  %v1899_v6 = vsel %vm1884_vm5, %v1897_v41, %v1898_v45  ;;  %v2120_v15 = vsel %vm1600_vm3, %v1850_v55, 0.0 }
 0x22d   :  { %v1836_v8 = vsub.f32 %v3965_v54, %v3954_v52  ;;  %v1901_v52 = vrot.slane %v4210_v62, 1  ;;  %v1951_v42 = vsel %vm1600_vm3, %v1899_v6, 0.0  ;;  %v4244_v47 = vand.u32 2147483647, %v1705_v19 }
 0x22e   :  { %v1816_v27 = vand.u32 2147483647, %v1796_v18  ;;  %v1817_v50 = vand.u32 2147483647, %v1797_v26  ;;  %v1704_v18 = vsub.f32 %v4015_v9, %v1660_v32  ;;  %v1851_v26 = vand.u32 2147483647, %v1835_v0 }
 0x22f   :  { %v1747_v30 = vpop.permute.xlu1 %1746  ;;  %v1745_v31 = vpop.permute.xlu0 %1744  ;;  %v1852_v34 = vand.u32 2147483647, %v1836_v8  ;;  %v1902_v41 = vsel %vm1884_vm5, %v1900_v20, %v1901_v52  ;;  %v1665_v0 = vsel %vm1641_vm4, %v1663_v37, %v1664_v44  ;;  %v1839_v8 = vsub.f32 %v3972_v57, %v3948_v49 }
 0x230   :  { %v1798_v43 = vsub.f32 %v3965_v54, %v1745_v31  ;;  %2010 = vrot.lane.b32.xlu1 %v1815_v25, %s3756_s3  ;;  %2012 = vrot.lane.b32.xlu0 %v1816_v27, %s3756_s3  ;;  %v1799_v51 = vsub.f32 %v3948_v49, %v1747_v30  ;;  %v1949_v25 = vsel %vm1936_vm6, %v1895_v2, 0.0  ;;  %v2121_v30 = vadd.f32 %v2120_v15, %v2119_v24 }
 0x231   :  { %v1950_v27 = vadd.f32 %v1949_v25, %v1948_v7  ;;  %v1724_v2 = vand.u32 2147483647, %v1704_v18  ;;  %v2122_v46 = vsel %vm1600_vm3, %v1851_v26, 0.0  ;;  %v1955_v6 = vsel %vm1600_vm3, %v1902_v41, 0.0 }
 0x232   :  { %v1818_v53 = vand.u32 2147483647, %v1798_v43  ;;  %v1819_v11 = vand.u32 2147483647, %v1799_v51  ;;  %v1853_v51 = vand.u32 2147483647, %v1837_v29  ;;  %v1840_v25 = vsub.f32 %v4015_v9, %v3998_v3 }
 0x233   :  { %v1751_v58 = vpop.permute.xlu1 %1750  ;;  %v1749_v59 = vpop.permute.xlu0 %1748  ;;  %v1952_v48 = vadd.f32 %v1951_v42, %v1950_v27  ;;  %v1903_v1 = vrot.slane %v1724_v2, 1  ;;  %v1666_v49 = vrot.slane %v4046_v21, 7  ;;  %v1855_v26 = vand.u32 2147483647, %v1839_v8 }
 0x234   :  { %v1800_v36 = vsub.f32 %v3978_v60, %v1749_v59  ;;  %2014 = vrot.lane.b32.xlu1 %v1817_v50, %s3756_s3  ;;  %2016 = vrot.lane.b32.xlu0 %v1818_v53, %s3756_s3  ;;  %v1801_v12 = vsub.f32 %v3972_v57, %v1751_v58  ;;  %v1838_v50 = vsub.f32 %v3978_v60, %v3965_v54  ;;  %v2124_v59 = vsel %vm1600_vm3, %v1852_v34, 0.0 }
 0x235   :  { %v2123_v53 = vadd.f32 %v2122_v46, %v2121_v30  ;;  %v1904_v54 = vrot.slane %v4244_v47, 1  ;;  %v1953_v60 = vsel %vm1936_vm6, %v1898_v45, 0.0  ;;  %v1707_v45 = vsub.f32 %v4017_v10, %v1665_v0 }
 0x236   :  { %v1820_v13 = vand.u32 2147483647, %v1800_v36  ;;  %v1821_v31 = vand.u32 2147483647, %v1801_v12  ;;  %v1954_v7 = vadd.f32 %v1953_v60, %v1952_v48  ;;  %v1667_v57 = vrot.slane %v4037_v17, 7 }
 0x237   :  { %v1755_v16 = vpop.permute.xlu1 %1754  ;;  %v1753_v39 = vpop.permute.xlu0 %1752  ;;  %v2125_v12 = vadd.f32 %v2124_v59, %v2123_v53  ;;  %v1905_v24 = vsel %vm1884_vm5, %v1903_v1, %v1904_v54  ;;  %v1726_v34 = vand.u32 2147483647, %v1706_v22  ;;  %v1957_v37 = vsel %vm1936_vm6, %v1901_v52, 0.0 }
 0x238   :  { %v1802_v38 = vsub.f32 %v3998_v3, %v1753_v39  ;;  %2018 = vrot.lane.b32.xlu1 %v1819_v11, %s3756_s3  ;;  %2020 = vrot.lane.b32.xlu0 %v1820_v13, %s3756_s3  ;;  %v1803_v32 = vsub.f32 %v3986_v63, %v1755_v16  ;;  %v1854_v11 = vand.u32 2147483647, %v1838_v50  ;;  %v2126_v39 = vsel %vm1600_vm3, %v1853_v51, 0.0 }
 0x239   :  { %v2127_v27 = vadd.f32 %v2126_v39, %v2125_v12  ;;  %v1668_v3 = vsel %vm1641_vm4, %v1666_v49, %v1667_v57  ;;  %v1959_v44 = vsel %vm1600_vm3, %v1905_v24, 0.0  ;;  %v1856_v41 = vand.u32 2147483647, %v1840_v25 }
 0x23a   :  { %v1822_v33 = vand.u32 2147483647, %v1802_v38  ;;  %v1823_v55 = vand.u32 2147483647, %v1803_v32  ;;  %v1956_v38 = vadd.f32 %v1955_v6, %v1954_v7  ;;  %v2130_v53 = vsel %vm1600_vm3, %v1855_v26, 0.0 }
 0x23b   :  { %v1759_v43 = vpop.permute.xlu1 %1758  ;;  %v1757_v35 = vpop.permute.xlu0 %1756  ;;  %v1709_v62 = vsub.f32 %v4037_v17, %v1668_v3  ;;  %v1842_v0 = vsub.f32 %v4028_v14, %v4015_v9 }
 0x23c   :  { %v1804_v40 = vsub.f32 %v4015_v9, %v1757_v35  ;;  %2022 = vrot.lane.b32.xlu1 %v1821_v31, %s3756_s3  ;;  %2024 = vrot.lane.b32.xlu0 %v1822_v33, %s3756_s3  ;;  %v1805_v56 = vsub.f32 %v4004_v5, %v1759_v43  ;;  %v2128_v31 = vsel %vm1600_vm3, %v1854_v11, 0.0  ;;  %v1727_v43 = vand.u32 2147483647, %v1707_v45 }
 0x23d   :  { %v1958_v2 = vadd.f32 %v1957_v37, %v1956_v38  ;;  %v2129_v46 = vadd.f32 %v2128_v31, %v2127_v27  ;;  %v1729_v6 = vand.u32 2147483647, %v1709_v62  ;;  %v1961_v11 = vsel %vm1936_vm6, %v1904_v54, 0.0 }
 0x23e   :  { %v1824_v58 = vand.u32 2147483647, %v1804_v40  ;;  %v1825_v13 = vand.u32 2147483647, %v1805_v56  ;;  %v1841_v40 = vsub.f32 %v4004_v5, %v3986_v63  ;;  %v1906_v56 = vrot.slane %v1726_v34, 1 }
 0x23f   :  { %v1763_v61 = vpop.permute.xlu1 %1762  ;;  %v1761_v36 = vpop.permute.xlu0 %1760  ;;  %v1907_v52 = vrot.slane %v1727_v43, 1  ;;  %v1669_v63 = vrot.slane %v4068_v28, 7  ;;  %v1960_v59 = vadd.f32 %v1959_v44, %v1958_v2  ;;  %v1843_v9 = vsub.f32 %v4017_v10, %v4004_v5 }
 0x240   :  { %v1806_v4 = vsub.f32 %v4028_v14, %v1761_v36  ;;  %2026 = vrot.lane.b32.xlu1 %v1823_v55, %s3756_s3  ;;  %2028 = vrot.lane.b32.xlu0 %v1824_v58, %s3756_s3  ;;  %v1807_v15 = vsub.f32 %v4017_v10, %v1763_v61  ;;  %v1708_v55 = vsub.f32 %v4046_v21, %v1666_v49  ;;  %v1670_v58 = vrot.slane %v4051_v23, 7 }
 0x241   :  { %v2131_v61 = vadd.f32 %v2130_v53, %v2129_v46  ;;  %v1857_v1 = vand.u32 2147483647, %v1841_v40  ;;  %v1908_v7 = vsel %vm1884_vm5, %v1906_v56, %v1907_v52  ;;  %v1962_v12 = vadd.f32 %v1961_v11, %v1960_v59  ;;  %v2187_v59 = vld [vmem:[%s4555_s4 + $0x10] sm:$0xff] }
 0x242   :  { %v1826_v16 = vand.u32 2147483647, %v1806_v4  ;;  %v1827_v42 = vand.u32 2147483647, %v1807_v15  ;;  %v2132_v4 = vsel %vm1600_vm3, %v1856_v41, 0.0  ;;  %v1671_v8 = vsel %vm1641_vm4, %v1669_v63, %v1670_v58 }
 0x243   :  { %v1767_v18 = vpop.permute.xlu1 %1766  ;;  %v1765_v19 = vpop.permute.xlu0 %1764  ;;  %v1728_v60 = vand.u32 2147483647, %v1708_v55  ;;  %v1963_v15 = vsel %vm1600_vm3, %v1908_v7, 0.0  ;;  %v2134_v39 = vsel %vm1600_vm3, %v1857_v1, 0.0  ;;  %v1910_v45 = vrot.slane %v1729_v6, 1  ;;  %v2191_v7 = vld [vmem:[%s4555_s4 + $0x30] sm:$0xff] }
 0x244   :  { %v1808_v20 = vsub.f32 %v4046_v21, %v1765_v19  ;;  %2030 = vrot.lane.b32.xlu1 %v1825_v13, %s3756_s3  ;;  %2032 = vrot.lane.b32.xlu0 %v1826_v16, %s3756_s3  ;;  %v1809_v29 = vsub.f32 %v4037_v17, %v1767_v18  ;;  %v2133_v13 = vadd.f32 %v2132_v4, %v2131_v61  ;;  %v1858_v16 = vand.u32 2147483647, %v1842_v0  ;;  %v2189_v4 = vld [vmem:[%s4555_s4 + $0x20] sm:$0xff] }
 0x245   :  { %v1710_v18 = vsub.f32 %v4068_v28, %v1669_v63  ;;  %v1711_v19 = vsub.f32 %v4051_v23, %v1671_v8  ;;  %v1909_v22 = vrot.slane %v1728_v60, 1  ;;  %v1844_v54 = vsub.f32 %v4046_v21, %v4028_v14 }
 0x246   :  { %v1828_v30 = vand.u32 2147483647, %v1808_v20  ;;  %v1829_v48 = vand.u32 2147483647, %v1809_v29  ;;  %v1964_v20 = vadd.f32 %v1963_v15, %v1962_v12  ;;  %v2135_v47 = vadd.f32 %v2134_v39, %v2133_v13 }
 0x247   :  { %v1771_v32 = vpop.permute.xlu1 %1770  ;;  %v1769_v33 = vpop.permute.xlu0 %1768  ;;  %v1859_v49 = vand.u32 2147483647, %v1843_v9  ;;  %v2136_v57 = vsel %vm1600_vm3, %v1858_v16, 0.0  ;;  %v1730_v24 = vand.u32 2147483647, %v1710_v18  ;;  %v1911_v5 = vsel %vm1884_vm5, %v1909_v22, %v1910_v45  ;;  %v2193_v16 = vld [vmem:[%s4555_s4 + $0x40] sm:$0xff] }
 0x248   :  { %v1810_v35 = vsub.f32 %v4068_v28, %v1769_v33  ;;  %2034 = vrot.lane.b32.xlu1 %v1827_v42, %s3756_s3  ;;  %2036 = vrot.lane.b32.xlu0 %v1828_v30, %s3756_s3  ;;  %v1811_v50 = vsub.f32 %v4051_v23, %v1771_v32  ;;  %v1731_v38 = vand.u32 2147483647, %v1711_v19  ;;  %v1965_v25 = vsel %vm1936_vm6, %v1907_v52, 0.0 }
 0x249   :  { %v1966_v26 = vadd.f32 %v1965_v25, %v1964_v20  ;;  %v2137_v27 = vadd.f32 %v2136_v57, %v2135_v47  ;;  %v1967_v42 = vsel %vm1600_vm3, %v1911_v5, 0.0  ;;  %v1845_v29 = vsub.f32 %v4037_v17, %v4017_v10  ;;  %v2195_v20 = vld [vmem:[%s4555_s4 + $0x50] sm:$0xff]  ;;  %v2197_v5 = vld [vmem:[%s4555_s4 + $0x60] sm:$0xff] }
 0x24a   :  { %v1830_v51 = vand.u32 2147483647, %v1810_v35  ;;  %v1831_v36 = vand.u32 2147483647, %v1811_v50  ;;  %v1860_v30 = vand.u32 2147483647, %v1844_v54  ;;  %v1846_v43 = vsub.f32 %v4068_v28, %v4046_v21 }
 0x24b   :  { %v2138_v31 = vsel %vm1600_vm3, %v1859_v49, 0.0  ;;  %v1912_v14 = vrot.slane %v1730_v24, 1  ;;  %v1913_v32 = vrot.slane %v1731_v38, 1  ;;  %v1968_v33 = vadd.f32 %v1967_v42, %v1966_v26 }
 0x24c   :  { %2038 = vrot.lane.b32.xlu1 %v1829_v48, %s3756_s3  ;;  %2040 = vrot.lane.b32.xlu0 %v1830_v51, %s3756_s3  ;;  %v2139_v34 = vadd.f32 %v2138_v31, %v2137_v27  ;;  %v1861_v35 = vand.u32 2147483647, %v1845_v29  ;;  %v2140_v3 = vsel %vm1600_vm3, %v1860_v30, 0.0  ;;  %v1969_v44 = vsel %vm1936_vm6, %v1910_v45, 0.0 }
 0x24d   :  { %v1914_v37 = vsel %vm1884_vm5, %v1912_v14, %v1913_v32  ;;  %v1970_v2 = vadd.f32 %v1969_v44, %v1968_v33  ;;  %v1847_v41 = vsub.f32 %v4051_v23, %v4037_v17  ;;  %v1862_v46 = vand.u32 2147483647, %v1846_v43  ;;  %v2185_v17 = vld [vmem:[%s4555_s4] sm:$0xff] }
 0x24e   :  { %v2141_v40 = vadd.f32 %v2140_v3, %v2139_v34  ;;  %v1971_v10 = vsel %vm1600_vm3, %v1914_v37, 0.0  ;;  %v2142_v48 = vsel %vm1600_vm3, %v1861_v35, 0.0  ;;  %v1973_v53 = vsel %vm1936_vm6, %v1913_v32, 0.0  ;;  %v2199_v34 = vld [vmem:[%s4555_s4 + $0x70] sm:$0xff] }
 0x24f   :  { %v1972_v50 = vadd.f32 %v1971_v10, %v1970_v2  ;;  %v1863_v21 = vand.u32 2147483647, %v1847_v41  ;;  %v2144_v28 = vsel %vm1600_vm3, %v1862_v46, 0.0 }
 0x250   :  { %2042 = vrot.lane.b32.xlu1 %v1831_v36, %s3756_s3  ;;  %v2143_v51 = vadd.f32 %v2142_v48, %v2141_v40 }
 0x251   :  { %v1974_v55 = vadd.f32 %v1973_v53, %v1972_v50  ;;  %v2146_v56 = vsel %vm1600_vm3, %v1863_v21, 0.0 }
 0x252   :  { %v2145_v62 = vadd.f32 %v2144_v28, %v2143_v51  ;;  %v2201_v51 = vld [vmem:[%s4555_s4 + $0x80] sm:$0xff] }
 0x254   :  { %v2147_v52 = vadd.f32 %v2146_v56, %v2145_v62 }
 0x26b   :  { %1975 = vadd.xlane.f32.xlu0 %v1974_v55 }
 0x26f   :  { %2148 = vadd.xlane.f32.xlu0 %v2147_v52 }
 0x28a   :  { %v4338_v23 = vpop.f32.mrb[20].mxu0 }
 0x28b   :  { %v2277_v63 = vpop.f32.mrb[21].mxu0 }
 0x28c   :  { %v3015_v58 = vmul.f32 %v2277_v63, %v2185_v17  ;;  %v2203_v63 = vld [vmem:[%s4555_s4 + $0x90] sm:$0xff] }
 0x28d   :  { %v4343_v61 = vpop.f32.mrb[20].mxu1 }
 0x28e   :  { %v2358_v36 = vpop.f32.mrb[21].mxu1  ;;  %v3035_v0 = vsel %vm1600_vm3, %v3015_v58, 0.0 }
 0x28f   :  { %v3017_v1 = vmul.f32 %v2358_v36, %v2187_v59  ;;  %3036 = vadd.xlane.f32.xlu0 %v3035_v0  ;;  %v4349_v60 = vpop.f32.mrb[22].mxu0 }
 0x290   :  { %v2439_v8 = vpop.f32.mrb[23].mxu0 }
 0x291   :  { %v3042_v6 = vsel %vm1600_vm3, %v3017_v1, 0.0  ;;  %v4355_v11 = vpop.f32.mrb[22].mxu1  ;;  %v3019_v12 = vmul.f32 %v2439_v8, %v2189_v4 }
 0x292   :  { %v2520_v13 = vpop.f32.mrb[23].mxu1 }
 0x293   :  { %3043 = vadd.xlane.f32.xlu0 %v3042_v6  ;;  %v3021_v15 = vmul.f32 %v2520_v13, %v2191_v7  ;;  %v3048_v9 = vsel %vm1600_vm3, %v3019_v12, 0.0 }
 0x295   :  { %v4361_v39 = vpop.f32.mrb[24].mxu0  ;;  %v3054_v22 = vsel %vm1600_vm3, %v3021_v15, 0.0 }
 0x296   :  { %v2601_v18 = vpop.f32.mrb[25].mxu0 }
 0x297   :  { %3049 = vadd.xlane.f32.xlu0 %v3048_v9  ;;  %v3023_v19 = vmul.f32 %v2601_v18, %v2193_v16  ;;  %v4364_v45 = vpop.f32.mrb[24].mxu1 }
 0x298   :  { %v2682_v54 = vpop.f32.mrb[25].mxu1 }
 0x299   :  { %v3025_v57 = vmul.f32 %v2682_v54, %v2195_v20  ;;  %v3060_v24 = vsel %vm1600_vm3, %v3023_v19, 0.0 }
 0x29a   :  { %v2005_v47 = vpop.permute.xlu0 %2004  ;;  %v4369_v49 = vpop.f32.mrb[26].mxu0 }
 0x29b   :  { %3055 = vadd.xlane.f32.xlu0 %v3054_v22  ;;  %v2763_v38 = vpop.f32.mrb[27].mxu0  ;;  %v2065_v27 = vsel %vm2064_vm7, %v2005_v47, 0.0  ;;  %v3066_v14 = vsel %vm1600_vm3, %v3025_v57, 0.0 }
 0x29c   :  { %v3027_v31 = vmul.f32 %v2763_v38, %v2197_v5 }
 0x29d   :  { %v4377_v29 = vpop.f32.mrb[26].mxu1 }
 0x29e   :  { %v2007_v25 = vpop.permute.xlu1 %2006  ;;  %v2009_v26 = vpop.permute.xlu0 %2008  ;;  %v3072_v46 = vsel %vm1600_vm3, %v3027_v31, 0.0 }
 0x29f   :  { %v2066_v42 = vsel %vm2064_vm7, %v2007_v25, 0.0  ;;  %3061 = vadd.xlane.f32.xlu0 %v3060_v24  ;;  %v2844_v32 = vpop.f32.mrb[27].mxu1  ;;  %v2068_v33 = vsel %vm2064_vm7, %v2009_v26, 0.0  ;;  %v4384_v43 = vpop.f32.mrb[28].mxu0 }
 0x2a0   :  { %v2067_v30 = vadd.f32 %v2066_v42, %v2065_v27  ;;  %v2925_v2 = vpop.f32.mrb[29].mxu0  ;;  %v3029_v41 = vmul.f32 %v2844_v32, %v2199_v34 }
 0x2a1   :  { %v4387_v40 = vpop.f32.mrb[28].mxu1  ;;  %v3031_v52 = vmul.f32 %v2925_v2, %v2201_v51  ;;  %v2186_v2 = vld [vmem:[%s4555_s4 + $0x8] sm:$0x1] }
 0x2a2   :  { %v2069_v35 = vadd.f32 %v2068_v33, %v2067_v30  ;;  %v2011_v3 = vpop.permute.xlu1 %2010  ;;  %v2013_v37 = vpop.permute.xlu0 %2012  ;;  %v3078_v56 = vsel %vm1600_vm3, %v3029_v41, 0.0 }
 0x2a3   :  { %v2070_v44 = vsel %vm2064_vm7, %v2011_v3, 0.0  ;;  %3067 = vadd.xlane.f32.xlu0 %v3066_v14  ;;  %v3006_v48 = vpop.f32.mrb[29].mxu1  ;;  %v2072_v50 = vsel %vm2064_vm7, %v2013_v37, 0.0  ;;  %v3084_v6 = vsel %vm1600_vm3, %v3031_v52, 0.0 }
 0x2a4   :  { %v2071_v10 = vadd.f32 %v2070_v44, %v2069_v35  ;;  %v3033_v4 = vmul.f32 %v3006_v48, %v2203_v63 }
 0x2a6   :  { %v2073_v21 = vadd.f32 %v2072_v50, %v2071_v10  ;;  %v2015_v28 = vpop.permute.xlu1 %2014  ;;  %v2017_v53 = vpop.permute.xlu0 %2016  ;;  %v3090_v16 = vsel %vm1600_vm3, %v3033_v4, 0.0  ;;  %v3016_v50 = vmul.f32 %v4338_v23, %v2186_v2 }
 0x2a7   :  { %v2074_v55 = vsel %vm2064_vm7, %v2015_v28, 0.0  ;;  %3073 = vadd.xlane.f32.xlu0 %v3072_v46  ;;  %v2076_v17 = vsel %vm2064_vm7, %v2017_v53, 0.0 }
 0x2a8   :  { %v2075_v62 = vadd.f32 %v2074_v55, %v2073_v21  ;;  %v2188_v21 = vld [vmem:[%s4555_s4 + $0x18] sm:$0x1]  ;;  %v3039_v53 = vsel %vm3038_vm8, %v3016_v50, 0.0  ;;  %v2190_v55 = vld [vmem:[%s4555_s4 + $0x28] sm:$0x1] }
 0x2a9   :  { %v3018_v28 = vmul.f32 %v4343_v61, %v2188_v21 }
 0x2aa   :  { %v2077_v58 = vadd.f32 %v2076_v17, %v2075_v62  ;;  %v2019_v59 = vpop.permute.xlu1 %2018  ;;  %v2021_v36 = vpop.permute.xlu0 %2020  ;;  %v3020_v62 = vmul.f32 %v4349_v60, %v2190_v55  ;;  %v2194_v17 = vld [vmem:[%s4555_s4 + $0x48] sm:$0x1] }
 0x2ab   :  { %v2078_v0 = vsel %vm2064_vm7, %v2019_v59, 0.0  ;;  %3079 = vadd.xlane.f32.xlu0 %v3078_v56  ;;  %v2080_v7 = vsel %vm2064_vm7, %v2021_v36, 0.0  ;;  %v3045_v23 = vsel %vm3038_vm8, %v3018_v28, 0.0  ;;  %v2192_v56 = vld [vmem:[%s4555_s4 + $0x38] sm:$0x1]  ;;  %v3024_v63 = vmul.f32 %v4361_v39, %v2194_v17 }
 0x2ac   :  { %v2079_v1 = vadd.f32 %v2078_v0, %v2077_v58  ;;  %v3022_v52 = vmul.f32 %v4355_v11, %v2192_v56  ;;  %v3051_v61 = vsel %vm3038_vm8, %v3020_v62, 0.0  ;;  %v2196_v58 = vld [vmem:[%s4555_s4 + $0x58] sm:$0x1]  ;;  %v2198_v36 = vld [vmem:[%s4555_s4 + $0x68] sm:$0x1] }
 0x2ad   :  { %v3026_v59 = vmul.f32 %v4364_v45, %v2196_v58  ;;  %v3063_v11 = vsel %vm3038_vm8, %v3024_v63, 0.0  ;;  %v3028_v0 = vmul.f32 %v4369_v49, %v2198_v36 }
 0x2ae   :  { %v2081_v8 = vadd.f32 %v2080_v7, %v2079_v1  ;;  %v2023_v12 = vpop.permute.xlu1 %2022  ;;  %v2025_v13 = vpop.permute.xlu0 %2024  ;;  %v3057_v60 = vsel %vm3038_vm8, %v3022_v52, 0.0  ;;  %v2200_v1 = vld [vmem:[%s4555_s4 + $0x78] sm:$0x1] }
 0x2af   :  { %v2082_v15 = vsel %vm2064_vm7, %v2023_v12, 0.0  ;;  %3085 = vadd.xlane.f32.xlu0 %v3084_v6  ;;  %v2084_v18 = vsel %vm2064_vm7, %v2025_v13, 0.0  ;;  %v3069_v39 = vsel %vm3038_vm8, %v3026_v59, 0.0  ;;  %v3030_v4 = vmul.f32 %v4377_v29, %v2200_v1  ;;  %v2202_v6 = vld [vmem:[%s4555_s4 + $0x88] sm:$0x1] }
 0x2b0   :  { %v2083_v9 = vadd.f32 %v2082_v15, %v2081_v8  ;;  %v3075_v45 = vsel %vm3038_vm8, %v3028_v0, 0.0  ;;  %v3032_v49 = vmul.f32 %v4384_v43, %v2202_v6  ;;  %v2204_v8 = vld [vmem:[%s4555_s4 + $0x98] sm:$0x1]  ;;  %s3683_s4 = scalar_lea.vmem %s3237_s12, 2560 }
 0x2b1   :  { %v3081_v7 = vsel %vm3038_vm8, %v3030_v4, 0.0  ;;  %v3034_v12 = vmul.f32 %v4387_v40, %v2204_v8  ;;  %p3684_p0 = scmp.ne.s32.totalorder %s3237_s12, %s3683_s4  ;;  %p3689_p2 = scmp.lt.s32.totalorder %s3683_s4, %s3683_s4 }
 0x2b2   :  { %v2085_v19 = vadd.f32 %v2084_v18, %v2083_v9  ;;  %v2027_v22 = vpop.permute.xlu1 %2026  ;;  %v2029_v20 = vpop.permute.xlu0 %2028  ;;  %v3087_v29 = vsel %vm3038_vm8, %v3032_v49, 0.0 }
 0x2b3   :  { %v2086_v47 = vsel %vm2064_vm7, %v2027_v22, 0.0  ;;  %3091 = vadd.xlane.f32.xlu0 %v3090_v16  ;;  %v2088_v57 = vsel %vm2064_vm7, %v2029_v20, 0.0  ;;  %v3093_v13 = vsel %vm3038_vm8, %v3034_v12, 0.0  ;;  %p3690_p3 = por %p3689_p2, %p3688_p1 }
 0x2b4   :  { %v2087_v54 = vadd.f32 %v2086_v47, %v2085_v19 }
 0x2b5   :  { %p3691_p4 = pnand %p3690_p3, %p3684_p0 }
 0x2b6   :  { %v2089_v24 = vadd.f32 %v2088_v57, %v2087_v54  ;;  %v2031_v38 = vpop.permute.xlu1 %2030  ;;  %v2033_v5 = vpop.permute.xlu0 %2032 }
 0x2b7   :  { %v2090_v25 = vsel %vm2064_vm7, %v2031_v38, 0.0  ;;  %v2092_v27 = vsel %vm2064_vm7, %v2033_v5, 0.0 }
 0x2b8   :  { %v2091_v26 = vadd.f32 %v2090_v25, %v2089_v24 }
 0x2ba   :  { %v2093_v42 = vadd.f32 %v2092_v27, %v2091_v26  ;;  %v2035_v30 = vpop.permute.xlu1 %2034  ;;  %v2037_v31 = vpop.permute.xlu0 %2036 }
 0x2bb   :  { %v2094_v14 = vsel %vm2064_vm7, %v2035_v30, 0.0  ;;  %v2096_v33 = vsel %vm2064_vm7, %v2037_v31, 0.0 }
 0x2bc   :  { %v2095_v32 = vadd.f32 %v2094_v14, %v2093_v42 }
 0x2be   :  { %v2097_v34 = vadd.f32 %v2096_v33, %v2095_v32  ;;  %v2039_v35 = vpop.permute.xlu1 %2038  ;;  %v2041_v3 = vpop.permute.xlu0 %2040 }
 0x2bf   :  { %v2098_v37 = vsel %vm2064_vm7, %v2039_v35, 0.0  ;;  %v2100_v10 = vsel %vm2064_vm7, %v2041_v3, 0.0 }
 0x2c0   :  { %v2099_v44 = vadd.f32 %v2098_v37, %v2097_v34 }
 0x2c2   :  { %v2101_v41 = vadd.f32 %v2100_v10, %v2099_v44  ;;  %v2043_v46 = vpop.permute.xlu1 %2042 }
 0x2c3   :  { %v2102_v48 = vsel %vm2064_vm7, %v2043_v46, 0.0 }
 0x2c4   :  { %v2103_v51 = vadd.f32 %v2102_v48, %v2101_v41 }
 0x2c6   :  { %2104 = vadd.xlane.f32.xlu1 %v2103_v51 }
 0x2ca   :  { %3040 = vadd.xlane.f32.xlu1 %v3039_v53 }
 0x2ce   :  { %3046 = vadd.xlane.f32.xlu1 %v3045_v23 }
 0x2d2   :  { %3052 = vadd.xlane.f32.xlu1 %v3051_v61 }
 0x2d6   :  { %3058 = vadd.xlane.f32.xlu1 %v3057_v60 }
 0x2da   :  { %3064 = vadd.xlane.f32.xlu1 %v3063_v11 }
 0x2de   :  { %3070 = vadd.xlane.f32.xlu1 %v3069_v39 }
 0x2e2   :  { %3076 = vadd.xlane.f32.xlu1 %v3075_v45 }
 0x2e6   :  { %3082 = vadd.xlane.f32.xlu1 %v3081_v7 }
 0x2ea   :  { %3088 = vadd.xlane.f32.xlu1 %v3087_v29 }
 0x2ee   :  { %3094 = vadd.xlane.f32.xlu1 %v3093_v13 }
 0x2f8   :  { %v1976_v15 = vpop.xlane.xlu0 %1975 }
 0x2f9   :  { %v1977_v9 = vrot.slane %v1976_v15, 4 }
 0x2fb   :  { %v1978_v16 = vadd.f32 %v1977_v9, %v1976_v15 }
 0x2fd   :  { %v1979_v18 = vrot.slane %v1978_v16, 2 }
 0x2ff   :  { %v1980_v19 = vadd.f32 %v1979_v18, %v1978_v16 }
 0x301   :  { %v1981_v22 = vrot.slane %v1980_v19, 1 }
 0x303   :  { %v1982_v43 = vadd.f32 %v1981_v22, %v1980_v19 }
 0x305   :  { %3668 = vpush %v1982_v43 }
 0x306   :  { %3694 = shalt.err (!%p3691_p4)
}
 0x307   :  { %s3695_s15 = scalar_lea.hbm %s4556_s5, 2560 }
 0x308   :  { %p3696_p5 = scmp.ne.s32.totalorder %s4556_s5, %s3695_s15  ;;  %p3699_p6 = scmp.lt.u32.totalorder %s3695_s15, %s4556_s5 }
 0x30a   :  { %p3701_p7 = pnand %p3699_p6, %p3696_p5 }
 0x30c   :  { %3704 = shalt.err (!%p3701_p7)
}
 0x30d   :  { %s3758_s20 = smov 128   ;;  %s3759_s21 = smov 8   ;;  %v2149_v40 = vpop.xlane.xlu0 %2148  ;;  %v3116_v57 = vlaneseq  ;;  %vm3127_vm9 = vcmask 130112   ;;  %vm3210_vm10 = vcmask 1041409   ;;  %vm3212_vm11 = vcmask 1042434  }
 0x30e   :  { %3242 = dma.vmem_to_hbm [thread:$0]  %s3237_s12, 2560, %s4556_s5, [#allocation3], %s3758_s20, %s3758_s20, %s3759_s21   ;;  %v2150_v54 = vrot.slane %v2149_v40, 4  ;;  %vm3214_vm12 = vcmask 1043459   ;;  %vm3216_vm13 = vcmask 1044484   ;;  %vm3218_vm14 = vcmask 1045509  }
 0x30f   :  { %v3117_v5 = vand.u32 127, %v3116_v57  ;;  %v3119_v42 = vshrl.u32 %v3116_v57, 7  ;;  %vm3220_vm15 = vcmask 1046534   ;;  %vm3222_vm0 = vcmask 1047559   ;;  %s3760_s27 = smov [#allocation4]   ;;  %s3761_s30 = smov [#allocation6]  }
 0x310   :  { %v2151_v24 = vadd.f32 %v2150_v54, %v2149_v40  ;;  %vm3227_vm1 = vcmask 72704   ;;  %vm3229_vm2 = vcmask 66560   ;;  %s3249_s28 = sshll.u32 %s3760_s27, 4  ;;  %vm2161_vm3 = vcmask 0   ;;  %s3259_s9 = sshll.u32 %s3761_s30, 4  ;;  %s3250_s28 = int_to_ptr.vmem [resolvable:$true] %s3249_s28  ;;  %s4519_s9 = int_to_ptr.vmem [resolvable:$true] %s3259_s9 }
 0x311   :  { %v3122_v14 = vadd.s32 4294967288, %v3117_v5  ;;  %v4477_v35 = vsub.s32 %v3117_v5, %v3119_v42  ;;  %s3705_s11 = scalar_lea.vmem %s3250_s28, 16  ;;  %p3710_p9 = scmp.lt.s32.totalorder %s3250_s28, %s3250_s28 }
 0x312   :  { %v2152_v25 = vrot.slane %v2151_v24, 2  ;;  %p3706_p8 = scmp.ne.s32.totalorder %s3250_s28, %s3705_s11 }
 0x313   :  { %v4479_v3 = vsub.s32 %v3122_v14, %v3119_v42 }
 0x314   :  { %v2153_v33 = vadd.f32 %v2152_v25, %v2151_v24 }
 0x316   :  { %v2154_v2 = vrot.slane %v2153_v33, 1 }
 0x318   :  { %v2155_v28 = vadd.f32 %v2154_v2, %v2153_v33 }
 0x31c   :  { %v3037_v20 = vpop.xlane.xlu0 %3036 }
 0x31d   :  { %v3121_v46 = vrot.slane %v3037_v20, %v4477_v35 }
 0x320   :  { %v3044_v47 = vpop.xlane.xlu0 %3043 }
 0x321   :  { %v3132_v21 = vrot.slane %v3044_v47, %v4477_v35 }
 0x324   :  { %v3050_v38 = vpop.xlane.xlu0 %3049 }
 0x325   :  { %v3141_v62 = vrot.slane %v3050_v38, %v4477_v35 }
 0x328   :  { %v3056_v30 = vpop.xlane.xlu0 %3055 }
 0x329   :  { %v3150_v63 = vrot.slane %v3056_v30, %v4477_v35 }
 0x32c   :  { %v3062_v10 = vpop.xlane.xlu0 %3061 }
 0x32d   :  { %v3159_v11 = vrot.slane %v3062_v10, %v4477_v35 }
 0x330   :  { %v3068_v23 = vpop.xlane.xlu0 %3067 }
 0x331   :  { %v3168_v4 = vrot.slane %v3068_v23, %v4477_v35 }
 0x334   :  { %v3074_v36 = vpop.xlane.xlu0 %3073 }
 0x335   :  { %v3177_v13 = vrot.slane %v3074_v36, %v4477_v35 }
 0x336   :  { %s3669_s25 = spop %3668 }
 0x338   :  { %v3080_v8 = vpop.xlane.xlu0 %3079 }
 0x339   :  { %v3186_v22 = vrot.slane %v3080_v8, %v4477_v35 }
 0x33c   :  { %v3086_v18 = vpop.xlane.xlu0 %3085 }
 0x33d   :  { %v3195_v5 = vrot.slane %v3086_v18, %v4477_v35 }
 0x340   :  { %v3092_v24 = vpop.xlane.xlu0 %3091 }
 0x341   :  { %v3204_v25 = vrot.slane %v3092_v24, %v4477_v35 }
 0x353   :  { %v2105_v26 = vpop.xlane.xlu1 %2104 }
 0x354   :  { %v2106_v27 = vrot.slane %v2105_v26, 4 }
 0x356   :  { %v2107_v31 = vadd.f32 %v2106_v27, %v2105_v26 }
 0x357   :  { %v3041_v32 = vpop.xlane.xlu1 %3040 }
 0x358   :  { %v2108_v34 = vrot.slane %v2107_v31, 2  ;;  %v3126_v48 = vrot.slane %v3041_v32, %v4479_v3 }
 0x35a   :  { %v2109_v37 = vadd.f32 %v2108_v34, %v2107_v31  ;;  %v3128_v56 = vsel %vm3127_vm9, %v3126_v48, %v3121_v46 }
 0x35b   :  { %v3047_v44 = vpop.xlane.xlu1 %3046 }
 0x35c   :  { %v2110_v41 = vrot.slane %v2109_v37, 1  ;;  %v3136_v50 = vrot.slane %v3047_v44, %v4479_v3 }
 0x35e   :  { %v2111_v51 = vadd.f32 %v2110_v41, %v2109_v37  ;;  %v3137_v52 = vsel %vm3127_vm9, %v3136_v50, %v3132_v21 }
 0x35f   :  { %v3053_v53 = vpop.xlane.xlu1 %3052  ;;  %v3211_v60 = vsel %vm3210_vm10, %v3137_v52, %v3128_v56 }
 0x360   :  { %3670 = vpush %v2111_v51  ;;  %v3145_v55 = vrot.slane %v3053_v53, %v4479_v3 }
 0x361   :  { %3672 = vpush %v2155_v28 }
 0x362   :  { %v3146_v58 = vsel %vm3127_vm9, %v3145_v55, %v3141_v62 }
 0x363   :  { %v3059_v61 = vpop.xlane.xlu1 %3058  ;;  %v3213_v0 = vsel %vm3212_vm11, %v3146_v58, %v3211_v60 }
 0x364   :  { %v3154_v17 = vrot.slane %v3059_v61, %v4479_v3 }
 0x366   :  { %v3155_v39 = vsel %vm3127_vm9, %v3154_v17, %v3150_v63 }
 0x367   :  { %v3065_v59 = vpop.xlane.xlu1 %3064  ;;  %v3215_v45 = vsel %vm3214_vm12, %v3155_v39, %v3213_v0 }
 0x368   :  { %v3163_v1 = vrot.slane %v3065_v59, %v4479_v3 }
 0x36a   :  { %v3164_v6 = vsel %vm3127_vm9, %v3163_v1, %v3159_v11 }
 0x36b   :  { %v3071_v7 = vpop.xlane.xlu1 %3070  ;;  %v3217_v12 = vsel %vm3216_vm13, %v3164_v6, %v3215_v45 }
 0x36c   :  { %v3172_v49 = vrot.slane %v3071_v7, %v4479_v3 }
 0x36e   :  { %v3173_v29 = vsel %vm3127_vm9, %v3172_v49, %v3168_v4 }
 0x36f   :  { %v3077_v15 = vpop.xlane.xlu1 %3076  ;;  %v3219_v16 = vsel %vm3218_vm14, %v3173_v29, %v3217_v12 }
 0x370   :  { %v3181_v9 = vrot.slane %v3077_v15, %v4479_v3 }
 0x372   :  { %v3182_v19 = vsel %vm3127_vm9, %v3181_v9, %v3177_v13 }
 0x373   :  { %v3083_v43 = vpop.xlane.xlu1 %3082  ;;  %v3221_v40 = vsel %vm3220_vm15, %v3182_v19, %v3219_v16 }
 0x374   :  { %v3190_v20 = vrot.slane %v3083_v43, %v4479_v3 }
 0x376   :  { %v3191_v47 = vsel %vm3127_vm9, %v3190_v20, %v3186_v22 }
 0x377   :  { %v3223_v54 = vsel %vm3222_vm0, %v3191_v47, %v3221_v40  ;;  %v3089_v57 = vpop.xlane.xlu1 %3088 }
 0x378   :  { %3228 = vst.msk [vmem:[%s4559_s8] sm:$0xff] %vm3227_vm1, %v3223_v54  ;;  %v3199_v38 = vrot.slane %v3089_v57, %v4479_v3 }
 0x37a   :  { %v3200_v27 = vsel %vm3127_vm9, %v3199_v38, %v3195_v5 }
 0x37b   :  { %v3095_v26 = vpop.xlane.xlu1 %3094 }
 0x37c   :  { %v3208_v42 = vrot.slane %v3095_v26, %v4479_v3 }
 0x37e   :  { %v3209_v30 = vsel %vm3127_vm9, %v3208_v42, %v3204_v25 }
 0x37f   :  { %v3224_v31 = vsel %vm3210_vm10, %v3209_v30, %v3200_v27 }
 0x380   :  { %3230 = vst.msk [vmem:[%s4559_s8 + $0x8] sm:$0x3] %vm3229_vm2, %v3224_v31  ;;  %s3709_s8 = scalar_lea.vmem %s3250_s28, 32 }
 0x381   :  { %p3711_p10 = scmp.lt.s32.totalorder %s3709_s8, %s3705_s11 }
 0x383   :  { %p3712_p11 = por %p3711_p10, %p3710_p9 }
 0x385   :  { %p3713_p12 = pnand %p3712_p11, %p3706_p8 }
 0x391   :  { %s3671_s26 = spop %3670 }
 0x392   :  { %s2113_s29 = sadd.f32 %s3671_s26, %s3669_s25  ;;  %s3673_s0 = spop %3672 }
 0x393   :  { %s2159_s1 = smul.f32 0.00048828125, %s3673_s0 }
 0x394   :  { %s2116_s2 = smul.f32 0.000390625, %s2113_s29 }
 0x395   :  { %v2163_v14 = vstv %s2159_s1 }
 0x396   :  { %v2160_v32 = vstv %s2116_s2  ;;  %2164 = vst.msk [vmem:[#allocation6] sm:$0x1] %vm2161_vm3, %v2163_v14 }
 0x397   :  { %2162 = vst.msk [vmem:[#allocation4] sm:$0x1] %vm2161_vm3, %v2160_v32 }
 0x398   :  { %3716 = shalt.err (!%p3713_p12)
}
 0x399   :  { %s3717_s13 = scalar_lea.hbm %s4557_s6, 16 }
 0x39a   :  { %p3718_p13 = scmp.ne.s32.totalorder %s4557_s6, %s3717_s13  ;;  %p3721_p0 = scmp.lt.u32.totalorder %s3717_s13, %s4557_s6 }
 0x39c   :  { %p3723_p1 = pnand %p3721_p0, %p3718_p13 }
 0x39e   :  { %3726 = shalt.err (!%p3723_p1)
}
 0x39f   :  { %3252 = dma.vmem_to_hbm [thread:$0]  %s3250_s28, 16, %s4557_s6, [#allocation5]  }
 0x3a0   :  { %s3727_s20 = scalar_lea.vmem %s4519_s9, 16  ;;  %s3731_s21 = scalar_lea.vmem %s4519_s9, 32 }
 0x3a1   :  { %p3728_p2 = scmp.ne.s32.totalorder %s4519_s9, %s3727_s20  ;;  %p3732_p3 = scmp.lt.s32.totalorder %s4519_s9, %s4519_s9 }
 0x3a2   :  { %p3733_p4 = scmp.lt.s32.totalorder %s3731_s21, %s3727_s20 }
 0x3a4   :  { %p3734_p5 = por %p3733_p4, %p3732_p3 }
 0x3a6   :  { %p3735_p6 = pnand %p3734_p5, %p3728_p2 }
 0x3a8   :  { %3738 = shalt.err (!%p3735_p6)
}
 0x3a9   :  { %s3739_s5 = scalar_lea.hbm %s4558_s7, 16 }
 0x3aa   :  { %p3740_p7 = scmp.ne.s32.totalorder %s4558_s7, %s3739_s5  ;;  %p3743_p8 = scmp.lt.u32.totalorder %s3739_s5, %s4558_s7 }
 0x3ac   :  { %p3745_p9 = pnand %p3743_p8, %p3740_p7 }
 0x3ae   :  { %3748 = shalt.err (!%p3745_p9)
}
 0x3af   :  { %3262 = dma.vmem_to_hbm [thread:$0]  %s4519_s9, 16, %s4558_s7, [#allocation5]  }
 0x3b0   :  { %3749 = dma.done.wait [#allocation3], 2560  }
 0x3b1   :  { %3750 = vsyncadd [#allocation3], 4294964736 }
 0x3b2   :  { %3751 = dma.done.wait [#allocation5], 32  }
 0x3b3   :  { %3752 = vsyncadd [#allocation5], 4294967264 }
 0x3b4   :  { %3276 = vsyncpa [#allocation3], 1 }
 0x3b5   :  { %3277 = vsyncpa [#allocation5], 1 }

</bundles_post_ra>
